<compile_context>
chip_gen: v5e
topology: v5e:2x2
jax: 0.10.0
libtpu: 0.0.40
codegen_flags: <defaults>
</compile_context>

<pallas_src>
import functools

import jax
import jax.numpy as jnp
from jax.experimental import pallas as pl
from jax.experimental.pallas import tpu as pltpu


def _round_up(x, m):
    return ((x + m - 1) // m) * m


# ----------------------------------------------------------------------------
# Pallas kernel: fused 4x4 / stride-2 conv (from a space-to-depth input)
#                + optional BatchNorm (training-mode batch stats)
#                + optional LeakyReLU
# ----------------------------------------------------------------------------
def _conv_s2d_kernel(x_ref, w_ref, *rest, N, Ho, Wo, apply_bn, apply_lrelu,
                     negative_slope, eps):
    """x_ref : (N, Ho+1, Wo+1, 4*Cin) bf16 — 2x2 space-to-depth of the
               zero-padded NHWC input (channel order (di, dj, cin)).
       w_ref : (16*Cin, Cout_pad) bf16 — conv weight with K ordered
               (block_row bi, block_col bj, di, dj, cin).
       optional g_ref, b_ref : (1, Cout_pad) f32 (only when apply_bn).
       o_ref : (N*Ho*Wo, Cout_pad) bf16, rows in (n, ho, wo) order.
    One program computes the whole layer so BN stats cover the full batch."""
    if apply_bn:
        g_ref, b_ref, o_ref = rest
    else:
        (o_ref,) = rest

    w = w_ref[...]                                   # (16*Cin, Cout_pad) bf16
    cout = o_ref.shape[-1]

    ys = []
    s = jnp.zeros((1, cout), jnp.float32)
    ss = jnp.zeros((1, cout), jnp.float32)

    # Unrolled over (n, output-row).  Each step gathers the four 2x2-block
    # shifts with unit-stride slices, forms a (Wo, 16*Cin) lane-dense LHS and
    # runs one bf16 MXU matmul with f32 accumulation.
    for n in range(N):
        for ho in range(Ho):
            parts = [x_ref[n, ho + bi, bj:bj + Wo, :]
                     for bi in (0, 1) for bj in (0, 1)]      # 4 x (Wo, 4*Cin)
            lhs = jnp.concatenate(parts, axis=-1)            # (Wo, 16*Cin)
            y = jnp.dot(lhs, w, preferred_element_type=jnp.float32)
            if apply_bn:
                # one-pass batch statistics
                s = s + jnp.sum(y, axis=0, keepdims=True)
                ss = ss + jnp.sum(y * y, axis=0, keepdims=True)
                ys.append((n, ho, y))
            else:
                if apply_lrelu:
                    y = jnp.where(y > 0, y, negative_slope * y)
                base = (n * Ho + ho) * Wo
                o_ref[base:base + Wo, :] = y.astype(o_ref.dtype)

    if apply_bn:
        m = float(N * Ho * Wo)
        mean = s / m
        var = ss / m - mean * mean          # biased (training-mode) variance
        scale = g_ref[...] * jax.lax.rsqrt(var + eps)
        bias = b_ref[...] - mean * scale
        for n, ho, y in ys:
            y = y * scale + bias            # single folded FMA
            if apply_lrelu:
                y = jnp.where(y > 0, y, negative_slope * y)
            base = (n * Ho + ho) * Wo
            o_ref[base:base + Wo, :] = y.astype(o_ref.dtype)


def conv_s2d_block(x_s2d, w, gamma, beta, *, apply_bn, apply_lrelu,
                   negative_slope=0.2, eps=1e-5):
    N, HB, WB, _ = x_s2d.shape
    Ho, Wo = HB - 1, WB - 1
    cout_pad = w.shape[1]
    kernel = functools.partial(
        _conv_s2d_kernel, N=N, Ho=Ho, Wo=Wo, apply_bn=apply_bn,
        apply_lrelu=apply_lrelu, negative_slope=negative_slope, eps=eps)
    vmem = pl.BlockSpec(memory_space=pltpu.MemorySpace.VMEM)
    operands = [x_s2d, w] + ([gamma, beta] if apply_bn else [])
    out = pl.pallas_call(
        kernel,
        out_shape=jax.ShapeDtypeStruct((N * Ho * Wo, cout_pad), jnp.bfloat16),
        in_specs=[vmem] * len(operands),
        out_specs=vmem,
        compiler_params=pltpu.CompilerParams(vmem_limit_bytes=32 * 1024 * 1024),
    )(*operands)
    return out.reshape(N, Ho, Wo, cout_pad)


# ----------------------------------------------------------------------------
# Pallas kernel: final 4x4 "valid" conv on the 4x4 map == one matmul
# ----------------------------------------------------------------------------
def _final_matmul_kernel(x_ref, w_ref, o_ref):
    o_ref[...] = jnp.dot(x_ref[...], w_ref[...],
                         preferred_element_type=jnp.float32)


def final_conv_block(x_flat, w):
    N = x_flat.shape[0]
    cout_pad = w.shape[1]
    vmem = pl.BlockSpec(memory_space=pltpu.MemorySpace.VMEM)
    return pl.pallas_call(
        _final_matmul_kernel,
        out_shape=jax.ShapeDtypeStruct((N, cout_pad), jnp.float32),
        in_specs=[vmem, vmem],
        out_specs=vmem,
        compiler_params=pltpu.CompilerParams(vmem_limit_bytes=32 * 1024 * 1024),
    )(x_flat, w)


# ----------------------------------------------------------------------------
# XLA glue: zero-pad(1) + 2x2 space-to-depth (≈1x activation traffic; XLA
# fuses slice/pad/reshape/transpose into one fusion under jit)
# ----------------------------------------------------------------------------
def _space_to_depth_pad1(x):
    x = jnp.pad(x, ((0, 0), (1, 1), (1, 1), (0, 0)))
    N, Hp, Wp, C = x.shape
    x = x.reshape(N, Hp // 2, 2, Wp // 2, 2, C)
    x = jnp.transpose(x, (0, 1, 3, 2, 4, 5))        # (n, a, b, di, dj, c)
    return x.reshape(N, Hp // 2, Wp // 2, 4 * C)


def _prep_s2d_weight(w_hwio, cin_pad, cout_pad):
    """(4,4,Cin,Cout) HWIO -> (16*Cin_pad, Cout_pad) bf16 with K ordered
    (bi, bj, di, dj, cin) to match the kernel's block-shift gather."""
    kh, kw, cin, cout = w_hwio.shape
    assert (kh, kw) == (4, 4)
    if cin_pad > cin:
        w_hwio = jnp.pad(w_hwio, ((0, 0), (0, 0), (0, cin_pad - cin), (0, 0)))
    w = w_hwio.reshape(2, 2, 2, 2, cin_pad, cout)   # (bi, di, bj, dj, c, o)
    w = jnp.transpose(w, (0, 2, 1, 3, 4, 5))        # (bi, bj, di, dj, c, o)
    w = w.reshape(16 * cin_pad, cout)
    if cout_pad > cout:
        w = jnp.pad(w, ((0, 0), (0, cout_pad - cout)))
    return w.astype(jnp.bfloat16)


# ----------------------------------------------------------------------------
# Encoder parameters (mirrors the nn.Sequential structure)
# ----------------------------------------------------------------------------
def build_encoder_params(key, input_size, n_channel, k=16, ndf=8):
    assert input_size % 16 == 0, "isize has to be a multiple of 16"

    def conv_init(key, cin, cout):
        return jax.random.normal(key, (4, 4, cin, cout), jnp.float32) * 0.05

    s2d_layers = []
    # initial conv: n_channel -> ndf, 4x4, stride 2, pad 1, LeakyReLU (no BN)
    key, sub = jax.random.split(key)
    cin_pad = _round_up(n_channel, 8)                # K = 16*cin_pad multiple of 128
    cout_pad = _round_up(ndf, 128)                   # lane-dense output
    s2d_layers.append(dict(
        w=_prep_s2d_weight(conv_init(sub, n_channel, ndf), cin_pad, cout_pad),
        cin_pad=cin_pad, cout=ndf, bn=False, lrelu=True, gamma=None, beta=None))

    csize, cndf = input_size // 2, ndf
    while csize > 4:
        key, sub = jax.random.split(key)
        out_feat = cndf * 2
        cout_pad = _round_up(out_feat, 128)
        s2d_layers.append(dict(
            w=_prep_s2d_weight(conv_init(sub, cndf, out_feat),
                               _round_up(cndf, 8), cout_pad),
            cin_pad=_round_up(cndf, 8), cout=out_feat, bn=True, lrelu=True,
            gamma=jnp.ones((1, cout_pad), jnp.float32),
            beta=jnp.zeros((1, cout_pad), jnp.float32)))
        cndf, csize = out_feat, csize // 2

    # final conv: cndf -> k, 4x4, stride 1, pad 0 (acts on the 4x4 map)
    key, sub = jax.random.split(key)
    wf = conv_init(sub, cndf, k).reshape(16 * cndf, k)        # (h, w, c) order
    wf = jnp.pad(wf, ((0, 0), (0, _round_up(k, 128) - k))).astype(jnp.bfloat16)
    return dict(s2d_layers=s2d_layers, final_w=wf, k=k)


# ----------------------------------------------------------------------------
# Forward pass
# ----------------------------------------------------------------------------
def encoder_forward(params, x_nchw):
    # PyTorch NCHW -> NHWC; activations carried as bf16 (they are consumed as
    # bf16 MXU operands anyway, accumulation stays f32 inside the kernels).
    x = jnp.transpose(x_nchw, (0, 2, 3, 1)).astype(jnp.bfloat16)
    for layer in params["s2d_layers"]:
        if layer["cin_pad"] > x.shape[-1]:
            x = jnp.pad(x, ((0, 0), (0, 0), (0, 0),
                            (0, layer["cin_pad"] - x.shape[-1])))
        x_s2d = _space_to_depth_pad1(x)
        y = conv_s2d_block(x_s2d, layer["w"], layer["gamma"], layer["beta"],
                           apply_bn=layer["bn"], apply_lrelu=layer["lrelu"])
        x = y[..., :layer["cout"]]                    # drop lane padding
    # final 4x4 valid conv on the 4x4 map == a single (N, 16*C) matmul
    N = x.shape[0]
    x_flat = x.reshape(N, -1)                         # (h, w, c) order
    y = final_conv_block(x_flat, params["final_w"])   # (N, 128) f32
    k = params["k"]
    return y[:, :k].reshape(N, k, 1, 1).astype(jnp.float32)
    # TODO(synk): BatchNorm running_mean/running_var buffer updates (eval-mode
    # statistics) are not modeled; only training-mode batch statistics.


if __name__ == "__main__":
    key = jax.random.PRNGKey(0)
    key, xkey = jax.random.split(key)

    batch, n_channel, input_size = 2, 3, 16
    k_latent, ndf = 16, 8

    x = jax.random.normal(xkey, (batch, n_channel, input_size, input_size),
                          dtype=jnp.float32)
    params = build_encoder_params(key, input_size, n_channel,
                                  k=k_latent, ndf=ndf)

    fwd = jax.jit(lambda inp: encoder_forward(params, inp))
    out = jax.block_until_ready(fwd(x))

    assert out.shape == (batch, k_latent, 1, 1), out.shape
    assert bool(jnp.all(jnp.isfinite(out)))
    print("KERNEL_OK")
</pallas_src>

<mosaic_0001>
module attributes {stable_mosaic.version = 11 : i64} {
  func.func @_conv_s2d_kernel(%arg0: memref<2x9x9x32xbf16, #tpu.memory_space<vmem>>, %arg1: memref<128x128xbf16, #tpu.memory_space<vmem>>, %arg2: memref<128x128xbf16, #tpu.memory_space<vmem>>) attributes {dimension_semantics = [], scalar_prefetch = 0 : i64, scratch_operands = 0 : i64, tpu.core_type = #tpu.core_type<tc>} {
    %c0 = arith.constant 0 : index
    %c0_0 = arith.constant 0 : index
    %0 = vector.load %arg1[%c0, %c0_0] : memref<128x128xbf16, #tpu.memory_space<vmem>>, vector<128x128xbf16>
    %c0_1 = arith.constant 0 : index
    %c0_2 = arith.constant 0 : index
    %c0_3 = arith.constant 0 : index
    %c0_4 = arith.constant 0 : index
    %1 = vector.load %arg0[%c0_1, %c0_2, %c0_3, %c0_4] : memref<2x9x9x32xbf16, #tpu.memory_space<vmem>>, vector<1x1x8x32xbf16>
    %2 = vector.shape_cast %1 : vector<1x1x8x32xbf16> to vector<8x32xbf16>
    %c0_5 = arith.constant 0 : index
    %c0_6 = arith.constant 0 : index
    %c1 = arith.constant 1 : index
    %c0_7 = arith.constant 0 : index
    %3 = vector.load %arg0[%c0_5, %c0_6, %c1, %c0_7] : memref<2x9x9x32xbf16, #tpu.memory_space<vmem>>, vector<1x1x8x32xbf16>
    %4 = vector.shape_cast %3 : vector<1x1x8x32xbf16> to vector<8x32xbf16>
    %c0_8 = arith.constant 0 : index
    %c1_9 = arith.constant 1 : index
    %c0_10 = arith.constant 0 : index
    %c0_11 = arith.constant 0 : index
    %5 = vector.load %arg0[%c0_8, %c1_9, %c0_10, %c0_11] : memref<2x9x9x32xbf16, #tpu.memory_space<vmem>>, vector<1x1x8x32xbf16>
    %6 = vector.shape_cast %5 : vector<1x1x8x32xbf16> to vector<8x32xbf16>
    %c0_12 = arith.constant 0 : index
    %c1_13 = arith.constant 1 : index
    %c1_14 = arith.constant 1 : index
    %c0_15 = arith.constant 0 : index
    %7 = vector.load %arg0[%c0_12, %c1_13, %c1_14, %c0_15] : memref<2x9x9x32xbf16, #tpu.memory_space<vmem>>, vector<1x1x8x32xbf16>
    %8 = vector.shape_cast %7 : vector<1x1x8x32xbf16> to vector<8x32xbf16>
    %9 = tpu.concatenate %2, %4, %6, %8 in 1 : vector<8x32xbf16>, vector<8x32xbf16>, vector<8x32xbf16>, vector<8x32xbf16> -> vector<8x128xbf16>
    %cst = arith.constant dense<0.000000e+00> : vector<8x128xf32>
    %10 = tpu.matmul %9, %0, %cst {dimension_numbers = #tpu.dot_dimension_numbers<[1], [0], [0], [1], [0, 0, 1, 1], [], []>} : vector<8x128xbf16>, vector<128x128xbf16>, vector<8x128xf32> -> vector<8x128xf32>
    %cst_16 = arith.constant 0.000000e+00 : f32
    %11 = vector.broadcast %cst_16 : f32 to vector<8x128xf32>
    %12 = arith.cmpf ogt, %10, %11 : vector<8x128xf32>
    %cst_17 = arith.constant 2.000000e-01 : f32
    %13 = vector.broadcast %cst_17 : f32 to vector<8x128xf32>
    %14 = arith.mulf %13, %10 : vector<8x128xf32>
    %15 = arith.select %12, %10, %14 : vector<8x128xi1>, vector<8x128xf32>
    %16 = arith.truncf %15 : vector<8x128xf32> to vector<8x128xbf16>
    %c0_18 = arith.constant 0 : index
    %c0_19 = arith.constant 0 : index
    %17 = vector.load %arg2[%c0_18, %c0_19] : memref<128x128xbf16, #tpu.memory_space<vmem>>, vector<8x128xbf16>
    tpu.vector_store %arg2[%c0_18, %c0_19], %16 {strides = array<i32>} : memref<128x128xbf16, #tpu.memory_space<vmem>>, vector<8x128xbf16>,
    %c0_20 = arith.constant 0 : index
    %c1_21 = arith.constant 1 : index
    %c0_22 = arith.constant 0 : index
    %c0_23 = arith.constant 0 : index
    %18 = vector.load %arg0[%c0_20, %c1_21, %c0_22, %c0_23] : memref<2x9x9x32xbf16, #tpu.memory_space<vmem>>, vector<1x1x8x32xbf16>
    %19 = vector.shape_cast %18 : vector<1x1x8x32xbf16> to vector<8x32xbf16>
    %c0_24 = arith.constant 0 : index
    %c1_25 = arith.constant 1 : index
    %c1_26 = arith.constant 1 : index
    %c0_27 = arith.constant 0 : index
    %20 = vector.load %arg0[%c0_24, %c1_25, %c1_26, %c0_27] : memref<2x9x9x32xbf16, #tpu.memory_space<vmem>>, vector<1x1x8x32xbf16>
    %21 = vector.shape_cast %20 : vector<1x1x8x32xbf16> to vector<8x32xbf16>
    %c0_28 = arith.constant 0 : index
    %c2 = arith.constant 2 : index
    %c0_29 = arith.constant 0 : index
    %c0_30 = arith.constant 0 : index
    %22 = vector.load %arg0[%c0_28, %c2, %c0_29, %c0_30] : memref<2x9x9x32xbf16, #tpu.memory_space<vmem>>, vector<1x1x8x32xbf16>
    %23 = vector.shape_cast %22 : vector<1x1x8x32xbf16> to vector<8x32xbf16>
    %c0_31 = arith.constant 0 : index
    %c2_32 = arith.constant 2 : index
    %c1_33 = arith.constant 1 : index
    %c0_34 = arith.constant 0 : index
    %24 = vector.load %arg0[%c0_31, %c2_32, %c1_33, %c0_34] : memref<2x9x9x32xbf16, #tpu.memory_space<vmem>>, vector<1x1x8x32xbf16>
    %25 = vector.shape_cast %24 : vector<1x1x8x32xbf16> to vector<8x32xbf16>
    %26 = tpu.concatenate %19, %21, %23, %25 in 1 : vector<8x32xbf16>, vector<8x32xbf16>, vector<8x32xbf16>, vector<8x32xbf16> -> vector<8x128xbf16>
    %cst_35 = arith.constant dense<0.000000e+00> : vector<8x128xf32>
    %27 = tpu.matmul %26, %0, %cst_35 {dimension_numbers = #tpu.dot_dimension_numbers<[1], [0], [0], [1], [0, 0, 1, 1], [], []>} : vector<8x128xbf16>, vector<128x128xbf16>, vector<8x128xf32> -> vector<8x128xf32>
    %cst_36 = arith.constant 0.000000e+00 : f32
    %28 = vector.broadcast %cst_36 : f32 to vector<8x128xf32>
    %29 = arith.cmpf ogt, %27, %28 : vector<8x128xf32>
    %cst_37 = arith.constant 2.000000e-01 : f32
    %30 = vector.broadcast %cst_37 : f32 to vector<8x128xf32>
    %31 = arith.mulf %30, %27 : vector<8x128xf32>
    %32 = arith.select %29, %27, %31 : vector<8x128xi1>, vector<8x128xf32>
    %33 = arith.truncf %32 : vector<8x128xf32> to vector<8x128xbf16>
    %c8 = arith.constant 8 : index
    %c0_38 = arith.constant 0 : index
    %34 = vector.load %arg2[%c8, %c0_38] : memref<128x128xbf16, #tpu.memory_space<vmem>>, vector<8x128xbf16>
    tpu.vector_store %arg2[%c8, %c0_38], %33 {strides = array<i32>} : memref<128x128xbf16, #tpu.memory_space<vmem>>, vector<8x128xbf16>,
    %c0_39 = arith.constant 0 : index
    %c2_40 = arith.constant 2 : index
    %c0_41 = arith.constant 0 : index
    %c0_42 = arith.constant 0 : index
    %35 = vector.load %arg0[%c0_39, %c2_40, %c0_41, %c0_42] : memref<2x9x9x32xbf16, #tpu.memory_space<vmem>>, vector<1x1x8x32xbf16>
    %36 = vector.shape_cast %35 : vector<1x1x8x32xbf16> to vector<8x32xbf16>
    %c0_43 = arith.constant 0 : index
    %c2_44 = arith.constant 2 : index
    %c1_45 = arith.constant 1 : index
    %c0_46 = arith.constant 0 : index
    %37 = vector.load %arg0[%c0_43, %c2_44, %c1_45, %c0_46] : memref<2x9x9x32xbf16, #tpu.memory_space<vmem>>, vector<1x1x8x32xbf16>
    %38 = vector.shape_cast %37 : vector<1x1x8x32xbf16> to vector<8x32xbf16>
    %c0_47 = arith.constant 0 : index
    %c3 = arith.constant 3 : index
    %c0_48 = arith.constant 0 : index
    %c0_49 = arith.constant 0 : index
    %39 = vector.load %arg0[%c0_47, %c3, %c0_48, %c0_49] : memref<2x9x9x32xbf16, #tpu.memory_space<vmem>>, vector<1x1x8x32xbf16>
    %40 = vector.shape_cast %39 : vector<1x1x8x32xbf16> to vector<8x32xbf16>
    %c0_50 = arith.constant 0 : index
    %c3_51 = arith.constant 3 : index
    %c1_52 = arith.constant 1 : index
    %c0_53 = arith.constant 0 : index
    %41 = vector.load %arg0[%c0_50, %c3_51, %c1_52, %c0_53] : memref<2x9x9x32xbf16, #tpu.memory_space<vmem>>, vector<1x1x8x32xbf16>
    %42 = vector.shape_cast %41 : vector<1x1x8x32xbf16> to vector<8x32xbf16>
    %43 = tpu.concatenate %36, %38, %40, %42 in 1 : vector<8x32xbf16>, vector<8x32xbf16>, vector<8x32xbf16>, vector<8x32xbf16> -> vector<8x128xbf16>
    %cst_54 = arith.constant dense<0.000000e+00> : vector<8x128xf32>
    %44 = tpu.matmul %43, %0, %cst_54 {dimension_numbers = #tpu.dot_dimension_numbers<[1], [0], [0], [1], [0, 0, 1, 1], [], []>} : vector<8x128xbf16>, vector<128x128xbf16>, vector<8x128xf32> -> vector<8x128xf32>
    %cst_55 = arith.constant 0.000000e+00 : f32
    %45 = vector.broadcast %cst_55 : f32 to vector<8x128xf32>
    %46 = arith.cmpf ogt, %44, %45 : vector<8x128xf32>
    %cst_56 = arith.constant 2.000000e-01 : f32
    %47 = vector.broadcast %cst_56 : f32 to vector<8x128xf32>
    %48 = arith.mulf %47, %44 : vector<8x128xf32>
    %49 = arith.select %46, %44, %48 : vector<8x128xi1>, vector<8x128xf32>
    %50 = arith.truncf %49 : vector<8x128xf32> to vector<8x128xbf16>
    %c16 = arith.constant 16 : index
    %c0_57 = arith.constant 0 : index
    %51 = vector.load %arg2[%c16, %c0_57] : memref<128x128xbf16, #tpu.memory_space<vmem>>, vector<8x128xbf16>
    tpu.vector_store %arg2[%c16, %c0_57], %50 {strides = array<i32>} : memref<128x128xbf16, #tpu.memory_space<vmem>>, vector<8x128xbf16>,
    %c0_58 = arith.constant 0 : index
    %c3_59 = arith.constant 3 : index
    %c0_60 = arith.constant 0 : index
    %c0_61 = arith.constant 0 : index
    %52 = vector.load %arg0[%c0_58, %c3_59, %c0_60, %c0_61] : memref<2x9x9x32xbf16, #tpu.memory_space<vmem>>, vector<1x1x8x32xbf16>
    %53 = vector.shape_cast %52 : vector<1x1x8x32xbf16> to vector<8x32xbf16>
    %c0_62 = arith.constant 0 : index
    %c3_63 = arith.constant 3 : index
    %c1_64 = arith.constant 1 : index
    %c0_65 = arith.constant 0 : index
    %54 = vector.load %arg0[%c0_62, %c3_63, %c1_64, %c0_65] : memref<2x9x9x32xbf16, #tpu.memory_space<vmem>>, vector<1x1x8x32xbf16>
    %55 = vector.shape_cast %54 : vector<1x1x8x32xbf16> to vector<8x32xbf16>
    %c0_66 = arith.constant 0 : index
    %c4 = arith.constant 4 : index
    %c0_67 = arith.constant 0 : index
    %c0_68 = arith.constant 0 : index
    %56 = vector.load %arg0[%c0_66, %c4, %c0_67, %c0_68] : memref<2x9x9x32xbf16, #tpu.memory_space<vmem>>, vector<1x1x8x32xbf16>
    %57 = vector.shape_cast %56 : vector<1x1x8x32xbf16> to vector<8x32xbf16>
    %c0_69 = arith.constant 0 : index
    %c4_70 = arith.constant 4 : index
    %c1_71 = arith.constant 1 : index
    %c0_72 = arith.constant 0 : index
    %58 = vector.load %arg0[%c0_69, %c4_70, %c1_71, %c0_72] : memref<2x9x9x32xbf16, #tpu.memory_space<vmem>>, vector<1x1x8x32xbf16>
    %59 = vector.shape_cast %58 : vector<1x1x8x32xbf16> to vector<8x32xbf16>
    %60 = tpu.concatenate %53, %55, %57, %59 in 1 : vector<8x32xbf16>, vector<8x32xbf16>, vector<8x32xbf16>, vector<8x32xbf16> -> vector<8x128xbf16>
    %cst_73 = arith.constant dense<0.000000e+00> : vector<8x128xf32>
    %61 = tpu.matmul %60, %0, %cst_73 {dimension_numbers = #tpu.dot_dimension_numbers<[1], [0], [0], [1], [0, 0, 1, 1], [], []>} : vector<8x128xbf16>, vector<128x128xbf16>, vector<8x128xf32> -> vector<8x128xf32>
    %cst_74 = arith.constant 0.000000e+00 : f32
    %62 = vector.broadcast %cst_74 : f32 to vector<8x128xf32>
    %63 = arith.cmpf ogt, %61, %62 : vector<8x128xf32>
    %cst_75 = arith.constant 2.000000e-01 : f32
    %64 = vector.broadcast %cst_75 : f32 to vector<8x128xf32>
    %65 = arith.mulf %64, %61 : vector<8x128xf32>
    %66 = arith.select %63, %61, %65 : vector<8x128xi1>, vector<8x128xf32>
    %67 = arith.truncf %66 : vector<8x128xf32> to vector<8x128xbf16>
    %c24 = arith.constant 24 : index
    %c0_76 = arith.constant 0 : index
    %68 = vector.load %arg2[%c24, %c0_76] : memref<128x128xbf16, #tpu.memory_space<vmem>>, vector<8x128xbf16>
    tpu.vector_store %arg2[%c24, %c0_76], %67 {strides = array<i32>} : memref<128x128xbf16, #tpu.memory_space<vmem>>, vector<8x128xbf16>,
    %c0_77 = arith.constant 0 : index
    %c4_78 = arith.constant 4 : index
    %c0_79 = arith.constant 0 : index
    %c0_80 = arith.constant 0 : index
    %69 = vector.load %arg0[%c0_77, %c4_78, %c0_79, %c0_80] : memref<2x9x9x32xbf16, #tpu.memory_space<vmem>>, vector<1x1x8x32xbf16>
    %70 = vector.shape_cast %69 : vector<1x1x8x32xbf16> to vector<8x32xbf16>
    %c0_81 = arith.constant 0 : index
    %c4_82 = arith.constant 4 : index
    %c1_83 = arith.constant 1 : index
    %c0_84 = arith.constant 0 : index
    %71 = vector.load %arg0[%c0_81, %c4_82, %c1_83, %c0_84] : memref<2x9x9x32xbf16, #tpu.memory_space<vmem>>, vector<1x1x8x32xbf16>
    %72 = vector.shape_cast %71 : vector<1x1x8x32xbf16> to vector<8x32xbf16>
    %c0_85 = arith.constant 0 : index
    %c5 = arith.constant 5 : index
    %c0_86 = arith.constant 0 : index
    %c0_87 = arith.constant 0 : index
    %73 = vector.load %arg0[%c0_85, %c5, %c0_86, %c0_87] : memref<2x9x9x32xbf16, #tpu.memory_space<vmem>>, vector<1x1x8x32xbf16>
    %74 = vector.shape_cast %73 : vector<1x1x8x32xbf16> to vector<8x32xbf16>
    %c0_88 = arith.constant 0 : index
    %c5_89 = arith.constant 5 : index
    %c1_90 = arith.constant 1 : index
    %c0_91 = arith.constant 0 : index
    %75 = vector.load %arg0[%c0_88, %c5_89, %c1_90, %c0_91] : memref<2x9x9x32xbf16, #tpu.memory_space<vmem>>, vector<1x1x8x32xbf16>
    %76 = vector.shape_cast %75 : vector<1x1x8x32xbf16> to vector<8x32xbf16>
    %77 = tpu.concatenate %70, %72, %74, %76 in 1 : vector<8x32xbf16>, vector<8x32xbf16>, vector<8x32xbf16>, vector<8x32xbf16> -> vector<8x128xbf16>
    %cst_92 = arith.constant dense<0.000000e+00> : vector<8x128xf32>
    %78 = tpu.matmul %77, %0, %cst_92 {dimension_numbers = #tpu.dot_dimension_numbers<[1], [0], [0], [1], [0, 0, 1, 1], [], []>} : vector<8x128xbf16>, vector<128x128xbf16>, vector<8x128xf32> -> vector<8x128xf32>
    %cst_93 = arith.constant 0.000000e+00 : f32
    %79 = vector.broadcast %cst_93 : f32 to vector<8x128xf32>
    %80 = arith.cmpf ogt, %78, %79 : vector<8x128xf32>
    %cst_94 = arith.constant 2.000000e-01 : f32
    %81 = vector.broadcast %cst_94 : f32 to vector<8x128xf32>
    %82 = arith.mulf %81, %78 : vector<8x128xf32>
    %83 = arith.select %80, %78, %82 : vector<8x128xi1>, vector<8x128xf32>
    %84 = arith.truncf %83 : vector<8x128xf32> to vector<8x128xbf16>
    %c32 = arith.constant 32 : index
    %c0_95 = arith.constant 0 : index
    %85 = vector.load %arg2[%c32, %c0_95] : memref<128x128xbf16, #tpu.memory_space<vmem>>, vector<8x128xbf16>
    tpu.vector_store %arg2[%c32, %c0_95], %84 {strides = array<i32>} : memref<128x128xbf16, #tpu.memory_space<vmem>>, vector<8x128xbf16>,
    %c0_96 = arith.constant 0 : index
    %c5_97 = arith.constant 5 : index
    %c0_98 = arith.constant 0 : index
    %c0_99 = arith.constant 0 : index
    %86 = vector.load %arg0[%c0_96, %c5_97, %c0_98, %c0_99] : memref<2x9x9x32xbf16, #tpu.memory_space<vmem>>, vector<1x1x8x32xbf16>
    %87 = vector.shape_cast %86 : vector<1x1x8x32xbf16> to vector<8x32xbf16>
    %c0_100 = arith.constant 0 : index
    %c5_101 = arith.constant 5 : index
    %c1_102 = arith.constant 1 : index
    %c0_103 = arith.constant 0 : index
    %88 = vector.load %arg0[%c0_100, %c5_101, %c1_102, %c0_103] : memref<2x9x9x32xbf16, #tpu.memory_space<vmem>>, vector<1x1x8x32xbf16>
    %89 = vector.shape_cast %88 : vector<1x1x8x32xbf16> to vector<8x32xbf16>
    %c0_104 = arith.constant 0 : index
    %c6 = arith.constant 6 : index
    %c0_105 = arith.constant 0 : index
    %c0_106 = arith.constant 0 : index
    %90 = vector.load %arg0[%c0_104, %c6, %c0_105, %c0_106] : memref<2x9x9x32xbf16, #tpu.memory_space<vmem>>, vector<1x1x8x32xbf16>
    %91 = vector.shape_cast %90 : vector<1x1x8x32xbf16> to vector<8x32xbf16>
    %c0_107 = arith.constant 0 : index
    %c6_108 = arith.constant 6 : index
    %c1_109 = arith.constant 1 : index
    %c0_110 = arith.constant 0 : index
    %92 = vector.load %arg0[%c0_107, %c6_108, %c1_109, %c0_110] : memref<2x9x9x32xbf16, #tpu.memory_space<vmem>>, vector<1x1x8x32xbf16>
    %93 = vector.shape_cast %92 : vector<1x1x8x32xbf16> to vector<8x32xbf16>
    %94 = tpu.concatenate %87, %89, %91, %93 in 1 : vector<8x32xbf16>, vector<8x32xbf16>, vector<8x32xbf16>, vector<8x32xbf16> -> vector<8x128xbf16>
    %cst_111 = arith.constant dense<0.000000e+00> : vector<8x128xf32>
    %95 = tpu.matmul %94, %0, %cst_111 {dimension_numbers = #tpu.dot_dimension_numbers<[1], [0], [0], [1], [0, 0, 1, 1], [], []>} : vector<8x128xbf16>, vector<128x128xbf16>, vector<8x128xf32> -> vector<8x128xf32>
    %cst_112 = arith.constant 0.000000e+00 : f32
    %96 = vector.broadcast %cst_112 : f32 to vector<8x128xf32>
    %97 = arith.cmpf ogt, %95, %96 : vector<8x128xf32>
    %cst_113 = arith.constant 2.000000e-01 : f32
    %98 = vector.broadcast %cst_113 : f32 to vector<8x128xf32>
    %99 = arith.mulf %98, %95 : vector<8x128xf32>
    %100 = arith.select %97, %95, %99 : vector<8x128xi1>, vector<8x128xf32>
    %101 = arith.truncf %100 : vector<8x128xf32> to vector<8x128xbf16>
    %c40 = arith.constant 40 : index
    %c0_114 = arith.constant 0 : index
    %102 = vector.load %arg2[%c40, %c0_114] : memref<128x128xbf16, #tpu.memory_space<vmem>>, vector<8x128xbf16>
    tpu.vector_store %arg2[%c40, %c0_114], %101 {strides = array<i32>} : memref<128x128xbf16, #tpu.memory_space<vmem>>, vector<8x128xbf16>,
    %c0_115 = arith.constant 0 : index
    %c6_116 = arith.constant 6 : index
    %c0_117 = arith.constant 0 : index
    %c0_118 = arith.constant 0 : index
    %103 = vector.load %arg0[%c0_115, %c6_116, %c0_117, %c0_118] : memref<2x9x9x32xbf16, #tpu.memory_space<vmem>>, vector<1x1x8x32xbf16>
    %104 = vector.shape_cast %103 : vector<1x1x8x32xbf16> to vector<8x32xbf16>
    %c0_119 = arith.constant 0 : index
    %c6_120 = arith.constant 6 : index
    %c1_121 = arith.constant 1 : index
    %c0_122 = arith.constant 0 : index
    %105 = vector.load %arg0[%c0_119, %c6_120, %c1_121, %c0_122] : memref<2x9x9x32xbf16, #tpu.memory_space<vmem>>, vector<1x1x8x32xbf16>
    %106 = vector.shape_cast %105 : vector<1x1x8x32xbf16> to vector<8x32xbf16>
    %c0_123 = arith.constant 0 : index
    %c7 = arith.constant 7 : index
    %c0_124 = arith.constant 0 : index
    %c0_125 = arith.constant 0 : index
    %107 = vector.load %arg0[%c0_123, %c7, %c0_124, %c0_125] : memref<2x9x9x32xbf16, #tpu.memory_space<vmem>>, vector<1x1x8x32xbf16>
    %108 = vector.shape_cast %107 : vector<1x1x8x32xbf16> to vector<8x32xbf16>
    %c0_126 = arith.constant 0 : index
    %c7_127 = arith.constant 7 : index
    %c1_128 = arith.constant 1 : index
    %c0_129 = arith.constant 0 : index
    %109 = vector.load %arg0[%c0_126, %c7_127, %c1_128, %c0_129] : memref<2x9x9x32xbf16, #tpu.memory_space<vmem>>, vector<1x1x8x32xbf16>
    %110 = vector.shape_cast %109 : vector<1x1x8x32xbf16> to vector<8x32xbf16>
    %111 = tpu.concatenate %104, %106, %108, %110 in 1 : vector<8x32xbf16>, vector<8x32xbf16>, vector<8x32xbf16>, vector<8x32xbf16> -> vector<8x128xbf16>
    %cst_130 = arith.constant dense<0.000000e+00> : vector<8x128xf32>
    %112 = tpu.matmul %111, %0, %cst_130 {dimension_numbers = #tpu.dot_dimension_numbers<[1], [0], [0], [1], [0, 0, 1, 1], [], []>} : vector<8x128xbf16>, vector<128x128xbf16>, vector<8x128xf32> -> vector<8x128xf32>
    %cst_131 = arith.constant 0.000000e+00 : f32
    %113 = vector.broadcast %cst_131 : f32 to vector<8x128xf32>
    %114 = arith.cmpf ogt, %112, %113 : vector<8x128xf32>
    %cst_132 = arith.constant 2.000000e-01 : f32
    %115 = vector.broadcast %cst_132 : f32 to vector<8x128xf32>
    %116 = arith.mulf %115, %112 : vector<8x128xf32>
    %117 = arith.select %114, %112, %116 : vector<8x128xi1>, vector<8x128xf32>
    %118 = arith.truncf %117 : vector<8x128xf32> to vector<8x128xbf16>
    %c48 = arith.constant 48 : index
    %c0_133 = arith.constant 0 : index
    %119 = vector.load %arg2[%c48, %c0_133] : memref<128x128xbf16, #tpu.memory_space<vmem>>, vector<8x128xbf16>
    tpu.vector_store %arg2[%c48, %c0_133], %118 {strides = array<i32>} : memref<128x128xbf16, #tpu.memory_space<vmem>>, vector<8x128xbf16>,
    %c0_134 = arith.constant 0 : index
    %c7_135 = arith.constant 7 : index
    %c0_136 = arith.constant 0 : index
    %c0_137 = arith.constant 0 : index
    %120 = vector.load %arg0[%c0_134, %c7_135, %c0_136, %c0_137] : memref<2x9x9x32xbf16, #tpu.memory_space<vmem>>, vector<1x1x8x32xbf16>
    %121 = vector.shape_cast %120 : vector<1x1x8x32xbf16> to vector<8x32xbf16>
    %c0_138 = arith.constant 0 : index
    %c7_139 = arith.constant 7 : index
    %c1_140 = arith.constant 1 : index
    %c0_141 = arith.constant 0 : index
    %122 = vector.load %arg0[%c0_138, %c7_139, %c1_140, %c0_141] : memref<2x9x9x32xbf16, #tpu.memory_space<vmem>>, vector<1x1x8x32xbf16>
    %123 = vector.shape_cast %122 : vector<1x1x8x32xbf16> to vector<8x32xbf16>
    %c0_142 = arith.constant 0 : index
    %c8_143 = arith.constant 8 : index
    %c0_144 = arith.constant 0 : index
    %c0_145 = arith.constant 0 : index
    %124 = vector.load %arg0[%c0_142, %c8_143, %c0_144, %c0_145] : memref<2x9x9x32xbf16, #tpu.memory_space<vmem>>, vector<1x1x8x32xbf16>
    %125 = vector.shape_cast %124 : vector<1x1x8x32xbf16> to vector<8x32xbf16>
    %c0_146 = arith.constant 0 : index
    %c8_147 = arith.constant 8 : index
    %c1_148 = arith.constant 1 : index
    %c0_149 = arith.constant 0 : index
    %126 = vector.load %arg0[%c0_146, %c8_147, %c1_148, %c0_149] : memref<2x9x9x32xbf16, #tpu.memory_space<vmem>>, vector<1x1x8x32xbf16>
    %127 = vector.shape_cast %126 : vector<1x1x8x32xbf16> to vector<8x32xbf16>
    %128 = tpu.concatenate %121, %123, %125, %127 in 1 : vector<8x32xbf16>, vector<8x32xbf16>, vector<8x32xbf16>, vector<8x32xbf16> -> vector<8x128xbf16>
    %cst_150 = arith.constant dense<0.000000e+00> : vector<8x128xf32>
    %129 = tpu.matmul %128, %0, %cst_150 {dimension_numbers = #tpu.dot_dimension_numbers<[1], [0], [0], [1], [0, 0, 1, 1], [], []>} : vector<8x128xbf16>, vector<128x128xbf16>, vector<8x128xf32> -> vector<8x128xf32>
    %cst_151 = arith.constant 0.000000e+00 : f32
    %130 = vector.broadcast %cst_151 : f32 to vector<8x128xf32>
    %131 = arith.cmpf ogt, %129, %130 : vector<8x128xf32>
    %cst_152 = arith.constant 2.000000e-01 : f32
    %132 = vector.broadcast %cst_152 : f32 to vector<8x128xf32>
    %133 = arith.mulf %132, %129 : vector<8x128xf32>
    %134 = arith.select %131, %129, %133 : vector<8x128xi1>, vector<8x128xf32>
    %135 = arith.truncf %134 : vector<8x128xf32> to vector<8x128xbf16>
    %c56 = arith.constant 56 : index
    %c0_153 = arith.constant 0 : index
    %136 = vector.load %arg2[%c56, %c0_153] : memref<128x128xbf16, #tpu.memory_space<vmem>>, vector<8x128xbf16>
    tpu.vector_store %arg2[%c56, %c0_153], %135 {strides = array<i32>} : memref<128x128xbf16, #tpu.memory_space<vmem>>, vector<8x128xbf16>,
    %c1_154 = arith.constant 1 : index
    %c0_155 = arith.constant 0 : index
    %c0_156 = arith.constant 0 : index
    %c0_157 = arith.constant 0 : index
    %137 = vector.load %arg0[%c1_154, %c0_155, %c0_156, %c0_157] : memref<2x9x9x32xbf16, #tpu.memory_space<vmem>>, vector<1x1x8x32xbf16>
    %138 = vector.shape_cast %137 : vector<1x1x8x32xbf16> to vector<8x32xbf16>
    %c1_158 = arith.constant 1 : index
    %c0_159 = arith.constant 0 : index
    %c1_160 = arith.constant 1 : index
    %c0_161 = arith.constant 0 : index
    %139 = vector.load %arg0[%c1_158, %c0_159, %c1_160, %c0_161] : memref<2x9x9x32xbf16, #tpu.memory_space<vmem>>, vector<1x1x8x32xbf16>
    %140 = vector.shape_cast %139 : vector<1x1x8x32xbf16> to vector<8x32xbf16>
    %c1_162 = arith.constant 1 : index
    %c1_163 = arith.constant 1 : index
    %c0_164 = arith.constant 0 : index
    %c0_165 = arith.constant 0 : index
    %141 = vector.load %arg0[%c1_162, %c1_163, %c0_164, %c0_165] : memref<2x9x9x32xbf16, #tpu.memory_space<vmem>>, vector<1x1x8x32xbf16>
    %142 = vector.shape_cast %141 : vector<1x1x8x32xbf16> to vector<8x32xbf16>
    %c1_166 = arith.constant 1 : index
    %c1_167 = arith.constant 1 : index
    %c1_168 = arith.constant 1 : index
    %c0_169 = arith.constant 0 : index
    %143 = vector.load %arg0[%c1_166, %c1_167, %c1_168, %c0_169] : memref<2x9x9x32xbf16, #tpu.memory_space<vmem>>, vector<1x1x8x32xbf16>
    %144 = vector.shape_cast %143 : vector<1x1x8x32xbf16> to vector<8x32xbf16>
    %145 = tpu.concatenate %138, %140, %142, %144 in 1 : vector<8x32xbf16>, vector<8x32xbf16>, vector<8x32xbf16>, vector<8x32xbf16> -> vector<8x128xbf16>
    %cst_170 = arith.constant dense<0.000000e+00> : vector<8x128xf32>
    %146 = tpu.matmul %145, %0, %cst_170 {dimension_numbers = #tpu.dot_dimension_numbers<[1], [0], [0], [1], [0, 0, 1, 1], [], []>} : vector<8x128xbf16>, vector<128x128xbf16>, vector<8x128xf32> -> vector<8x128xf32>
    %cst_171 = arith.constant 0.000000e+00 : f32
    %147 = vector.broadcast %cst_171 : f32 to vector<8x128xf32>
    %148 = arith.cmpf ogt, %146, %147 : vector<8x128xf32>
    %cst_172 = arith.constant 2.000000e-01 : f32
    %149 = vector.broadcast %cst_172 : f32 to vector<8x128xf32>
    %150 = arith.mulf %149, %146 : vector<8x128xf32>
    %151 = arith.select %148, %146, %150 : vector<8x128xi1>, vector<8x128xf32>
    %152 = arith.truncf %151 : vector<8x128xf32> to vector<8x128xbf16>
    %c64 = arith.constant 64 : index
    %c0_173 = arith.constant 0 : index
    %153 = vector.load %arg2[%c64, %c0_173] : memref<128x128xbf16, #tpu.memory_space<vmem>>, vector<8x128xbf16>
    tpu.vector_store %arg2[%c64, %c0_173], %152 {strides = array<i32>} : memref<128x128xbf16, #tpu.memory_space<vmem>>, vector<8x128xbf16>,
    %c1_174 = arith.constant 1 : index
    %c1_175 = arith.constant 1 : index
    %c0_176 = arith.constant 0 : index
    %c0_177 = arith.constant 0 : index
    %154 = vector.load %arg0[%c1_174, %c1_175, %c0_176, %c0_177] : memref<2x9x9x32xbf16, #tpu.memory_space<vmem>>, vector<1x1x8x32xbf16>
    %155 = vector.shape_cast %154 : vector<1x1x8x32xbf16> to vector<8x32xbf16>
    %c1_178 = arith.constant 1 : index
    %c1_179 = arith.constant 1 : index
    %c1_180 = arith.constant 1 : index
    %c0_181 = arith.constant 0 : index
    %156 = vector.load %arg0[%c1_178, %c1_179, %c1_180, %c0_181] : memref<2x9x9x32xbf16, #tpu.memory_space<vmem>>, vector<1x1x8x32xbf16>
    %157 = vector.shape_cast %156 : vector<1x1x8x32xbf16> to vector<8x32xbf16>
    %c1_182 = arith.constant 1 : index
    %c2_183 = arith.constant 2 : index
    %c0_184 = arith.constant 0 : index
    %c0_185 = arith.constant 0 : index
    %158 = vector.load %arg0[%c1_182, %c2_183, %c0_184, %c0_185] : memref<2x9x9x32xbf16, #tpu.memory_space<vmem>>, vector<1x1x8x32xbf16>
    %159 = vector.shape_cast %158 : vector<1x1x8x32xbf16> to vector<8x32xbf16>
    %c1_186 = arith.constant 1 : index
    %c2_187 = arith.constant 2 : index
    %c1_188 = arith.constant 1 : index
    %c0_189 = arith.constant 0 : index
    %160 = vector.load %arg0[%c1_186, %c2_187, %c1_188, %c0_189] : memref<2x9x9x32xbf16, #tpu.memory_space<vmem>>, vector<1x1x8x32xbf16>
    %161 = vector.shape_cast %160 : vector<1x1x8x32xbf16> to vector<8x32xbf16>
    %162 = tpu.concatenate %155, %157, %159, %161 in 1 : vector<8x32xbf16>, vector<8x32xbf16>, vector<8x32xbf16>, vector<8x32xbf16> -> vector<8x128xbf16>
    %cst_190 = arith.constant dense<0.000000e+00> : vector<8x128xf32>
    %163 = tpu.matmul %162, %0, %cst_190 {dimension_numbers = #tpu.dot_dimension_numbers<[1], [0], [0], [1], [0, 0, 1, 1], [], []>} : vector<8x128xbf16>, vector<128x128xbf16>, vector<8x128xf32> -> vector<8x128xf32>
    %cst_191 = arith.constant 0.000000e+00 : f32
    %164 = vector.broadcast %cst_191 : f32 to vector<8x128xf32>
    %165 = arith.cmpf ogt, %163, %164 : vector<8x128xf32>
    %cst_192 = arith.constant 2.000000e-01 : f32
    %166 = vector.broadcast %cst_192 : f32 to vector<8x128xf32>
    %167 = arith.mulf %166, %163 : vector<8x128xf32>
    %168 = arith.select %165, %163, %167 : vector<8x128xi1>, vector<8x128xf32>
    %169 = arith.truncf %168 : vector<8x128xf32> to vector<8x128xbf16>
    %c72 = arith.constant 72 : index
    %c0_193 = arith.constant 0 : index
    %170 = vector.load %arg2[%c72, %c0_193] : memref<128x128xbf16, #tpu.memory_space<vmem>>, vector<8x128xbf16>
    tpu.vector_store %arg2[%c72, %c0_193], %169 {strides = array<i32>} : memref<128x128xbf16, #tpu.memory_space<vmem>>, vector<8x128xbf16>,
    %c1_194 = arith.constant 1 : index
    %c2_195 = arith.constant 2 : index
    %c0_196 = arith.constant 0 : index
    %c0_197 = arith.constant 0 : index
    %171 = vector.load %arg0[%c1_194, %c2_195, %c0_196, %c0_197] : memref<2x9x9x32xbf16, #tpu.memory_space<vmem>>, vector<1x1x8x32xbf16>
    %172 = vector.shape_cast %171 : vector<1x1x8x32xbf16> to vector<8x32xbf16>
    %c1_198 = arith.constant 1 : index
    %c2_199 = arith.constant 2 : index
    %c1_200 = arith.constant 1 : index
    %c0_201 = arith.constant 0 : index
    %173 = vector.load %arg0[%c1_198, %c2_199, %c1_200, %c0_201] : memref<2x9x9x32xbf16, #tpu.memory_space<vmem>>, vector<1x1x8x32xbf16>
    %174 = vector.shape_cast %173 : vector<1x1x8x32xbf16> to vector<8x32xbf16>
    %c1_202 = arith.constant 1 : index
    %c3_203 = arith.constant 3 : index
    %c0_204 = arith.constant 0 : index
    %c0_205 = arith.constant 0 : index
    %175 = vector.load %arg0[%c1_202, %c3_203, %c0_204, %c0_205] : memref<2x9x9x32xbf16, #tpu.memory_space<vmem>>, vector<1x1x8x32xbf16>
    %176 = vector.shape_cast %175 : vector<1x1x8x32xbf16> to vector<8x32xbf16>
    %c1_206 = arith.constant 1 : index
    %c3_207 = arith.constant 3 : index
    %c1_208 = arith.constant 1 : index
    %c0_209 = arith.constant 0 : index
    %177 = vector.load %arg0[%c1_206, %c3_207, %c1_208, %c0_209] : memref<2x9x9x32xbf16, #tpu.memory_space<vmem>>, vector<1x1x8x32xbf16>
    %178 = vector.shape_cast %177 : vector<1x1x8x32xbf16> to vector<8x32xbf16>
    %179 = tpu.concatenate %172, %174, %176, %178 in 1 : vector<8x32xbf16>, vector<8x32xbf16>, vector<8x32xbf16>, vector<8x32xbf16> -> vector<8x128xbf16>
    %cst_210 = arith.constant dense<0.000000e+00> : vector<8x128xf32>
    %180 = tpu.matmul %179, %0, %cst_210 {dimension_numbers = #tpu.dot_dimension_numbers<[1], [0], [0], [1], [0, 0, 1, 1], [], []>} : vector<8x128xbf16>, vector<128x128xbf16>, vector<8x128xf32> -> vector<8x128xf32>
    %cst_211 = arith.constant 0.000000e+00 : f32
    %181 = vector.broadcast %cst_211 : f32 to vector<8x128xf32>
    %182 = arith.cmpf ogt, %180, %181 : vector<8x128xf32>
    %cst_212 = arith.constant 2.000000e-01 : f32
    %183 = vector.broadcast %cst_212 : f32 to vector<8x128xf32>
    %184 = arith.mulf %183, %180 : vector<8x128xf32>
    %185 = arith.select %182, %180, %184 : vector<8x128xi1>, vector<8x128xf32>
    %186 = arith.truncf %185 : vector<8x128xf32> to vector<8x128xbf16>
    %c80 = arith.constant 80 : index
    %c0_213 = arith.constant 0 : index
    %187 = vector.load %arg2[%c80, %c0_213] : memref<128x128xbf16, #tpu.memory_space<vmem>>, vector<8x128xbf16>
    tpu.vector_store %arg2[%c80, %c0_213], %186 {strides = array<i32>} : memref<128x128xbf16, #tpu.memory_space<vmem>>, vector<8x128xbf16>,
    %c1_214 = arith.constant 1 : index
    %c3_215 = arith.constant 3 : index
    %c0_216 = arith.constant 0 : index
    %c0_217 = arith.constant 0 : index
    %188 = vector.load %arg0[%c1_214, %c3_215, %c0_216, %c0_217] : memref<2x9x9x32xbf16, #tpu.memory_space<vmem>>, vector<1x1x8x32xbf16>
    %189 = vector.shape_cast %188 : vector<1x1x8x32xbf16> to vector<8x32xbf16>
    %c1_218 = arith.constant 1 : index
    %c3_219 = arith.constant 3 : index
    %c1_220 = arith.constant 1 : index
    %c0_221 = arith.constant 0 : index
    %190 = vector.load %arg0[%c1_218, %c3_219, %c1_220, %c0_221] : memref<2x9x9x32xbf16, #tpu.memory_space<vmem>>, vector<1x1x8x32xbf16>
    %191 = vector.shape_cast %190 : vector<1x1x8x32xbf16> to vector<8x32xbf16>
    %c1_222 = arith.constant 1 : index
    %c4_223 = arith.constant 4 : index
    %c0_224 = arith.constant 0 : index
    %c0_225 = arith.constant 0 : index
    %192 = vector.load %arg0[%c1_222, %c4_223, %c0_224, %c0_225] : memref<2x9x9x32xbf16, #tpu.memory_space<vmem>>, vector<1x1x8x32xbf16>
    %193 = vector.shape_cast %192 : vector<1x1x8x32xbf16> to vector<8x32xbf16>
    %c1_226 = arith.constant 1 : index
    %c4_227 = arith.constant 4 : index
    %c1_228 = arith.constant 1 : index
    %c0_229 = arith.constant 0 : index
    %194 = vector.load %arg0[%c1_226, %c4_227, %c1_228, %c0_229] : memref<2x9x9x32xbf16, #tpu.memory_space<vmem>>, vector<1x1x8x32xbf16>
    %195 = vector.shape_cast %194 : vector<1x1x8x32xbf16> to vector<8x32xbf16>
    %196 = tpu.concatenate %189, %191, %193, %195 in 1 : vector<8x32xbf16>, vector<8x32xbf16>, vector<8x32xbf16>, vector<8x32xbf16> -> vector<8x128xbf16>
    %cst_230 = arith.constant dense<0.000000e+00> : vector<8x128xf32>
    %197 = tpu.matmul %196, %0, %cst_230 {dimension_numbers = #tpu.dot_dimension_numbers<[1], [0], [0], [1], [0, 0, 1, 1], [], []>} : vector<8x128xbf16>, vector<128x128xbf16>, vector<8x128xf32> -> vector<8x128xf32>
    %cst_231 = arith.constant 0.000000e+00 : f32
    %198 = vector.broadcast %cst_231 : f32 to vector<8x128xf32>
    %199 = arith.cmpf ogt, %197, %198 : vector<8x128xf32>
    %cst_232 = arith.constant 2.000000e-01 : f32
    %200 = vector.broadcast %cst_232 : f32 to vector<8x128xf32>
    %201 = arith.mulf %200, %197 : vector<8x128xf32>
    %202 = arith.select %199, %197, %201 : vector<8x128xi1>, vector<8x128xf32>
    %203 = arith.truncf %202 : vector<8x128xf32> to vector<8x128xbf16>
    %c88 = arith.constant 88 : index
    %c0_233 = arith.constant 0 : index
    %204 = vector.load %arg2[%c88, %c0_233] : memref<128x128xbf16, #tpu.memory_space<vmem>>, vector<8x128xbf16>
    tpu.vector_store %arg2[%c88, %c0_233], %203 {strides = array<i32>} : memref<128x128xbf16, #tpu.memory_space<vmem>>, vector<8x128xbf16>,
    %c1_234 = arith.constant 1 : index
    %c4_235 = arith.constant 4 : index
    %c0_236 = arith.constant 0 : index
    %c0_237 = arith.constant 0 : index
    %205 = vector.load %arg0[%c1_234, %c4_235, %c0_236, %c0_237] : memref<2x9x9x32xbf16, #tpu.memory_space<vmem>>, vector<1x1x8x32xbf16>
    %206 = vector.shape_cast %205 : vector<1x1x8x32xbf16> to vector<8x32xbf16>
    %c1_238 = arith.constant 1 : index
    %c4_239 = arith.constant 4 : index
    %c1_240 = arith.constant 1 : index
    %c0_241 = arith.constant 0 : index
    %207 = vector.load %arg0[%c1_238, %c4_239, %c1_240, %c0_241] : memref<2x9x9x32xbf16, #tpu.memory_space<vmem>>, vector<1x1x8x32xbf16>
    %208 = vector.shape_cast %207 : vector<1x1x8x32xbf16> to vector<8x32xbf16>
    %c1_242 = arith.constant 1 : index
    %c5_243 = arith.constant 5 : index
    %c0_244 = arith.constant 0 : index
    %c0_245 = arith.constant 0 : index
    %209 = vector.load %arg0[%c1_242, %c5_243, %c0_244, %c0_245] : memref<2x9x9x32xbf16, #tpu.memory_space<vmem>>, vector<1x1x8x32xbf16>
    %210 = vector.shape_cast %209 : vector<1x1x8x32xbf16> to vector<8x32xbf16>
    %c1_246 = arith.constant 1 : index
    %c5_247 = arith.constant 5 : index
    %c1_248 = arith.constant 1 : index
    %c0_249 = arith.constant 0 : index
    %211 = vector.load %arg0[%c1_246, %c5_247, %c1_248, %c0_249] : memref<2x9x9x32xbf16, #tpu.memory_space<vmem>>, vector<1x1x8x32xbf16>
    %212 = vector.shape_cast %211 : vector<1x1x8x32xbf16> to vector<8x32xbf16>
    %213 = tpu.concatenate %206, %208, %210, %212 in 1 : vector<8x32xbf16>, vector<8x32xbf16>, vector<8x32xbf16>, vector<8x32xbf16> -> vector<8x128xbf16>
    %cst_250 = arith.constant dense<0.000000e+00> : vector<8x128xf32>
    %214 = tpu.matmul %213, %0, %cst_250 {dimension_numbers = #tpu.dot_dimension_numbers<[1], [0], [0], [1], [0, 0, 1, 1], [], []>} : vector<8x128xbf16>, vector<128x128xbf16>, vector<8x128xf32> -> vector<8x128xf32>
    %cst_251 = arith.constant 0.000000e+00 : f32
    %215 = vector.broadcast %cst_251 : f32 to vector<8x128xf32>
    %216 = arith.cmpf ogt, %214, %215 : vector<8x128xf32>
    %cst_252 = arith.constant 2.000000e-01 : f32
    %217 = vector.broadcast %cst_252 : f32 to vector<8x128xf32>
    %218 = arith.mulf %217, %214 : vector<8x128xf32>
    %219 = arith.select %216, %214, %218 : vector<8x128xi1>, vector<8x128xf32>
    %220 = arith.truncf %219 : vector<8x128xf32> to vector<8x128xbf16>
    %c96 = arith.constant 96 : index
    %c0_253 = arith.constant 0 : index
    %221 = vector.load %arg2[%c96, %c0_253] : memref<128x128xbf16, #tpu.memory_space<vmem>>, vector<8x128xbf16>
    tpu.vector_store %arg2[%c96, %c0_253], %220 {strides = array<i32>} : memref<128x128xbf16, #tpu.memory_space<vmem>>, vector<8x128xbf16>,
    %c1_254 = arith.constant 1 : index
    %c5_255 = arith.constant 5 : index
    %c0_256 = arith.constant 0 : index
    %c0_257 = arith.constant 0 : index
    %222 = vector.load %arg0[%c1_254, %c5_255, %c0_256, %c0_257] : memref<2x9x9x32xbf16, #tpu.memory_space<vmem>>, vector<1x1x8x32xbf16>
    %223 = vector.shape_cast %222 : vector<1x1x8x32xbf16> to vector<8x32xbf16>
    %c1_258 = arith.constant 1 : index
    %c5_259 = arith.constant 5 : index
    %c1_260 = arith.constant 1 : index
    %c0_261 = arith.constant 0 : index
    %224 = vector.load %arg0[%c1_258, %c5_259, %c1_260, %c0_261] : memref<2x9x9x32xbf16, #tpu.memory_space<vmem>>, vector<1x1x8x32xbf16>
    %225 = vector.shape_cast %224 : vector<1x1x8x32xbf16> to vector<8x32xbf16>
    %c1_262 = arith.constant 1 : index
    %c6_263 = arith.constant 6 : index
    %c0_264 = arith.constant 0 : index
    %c0_265 = arith.constant 0 : index
    %226 = vector.load %arg0[%c1_262, %c6_263, %c0_264, %c0_265] : memref<2x9x9x32xbf16, #tpu.memory_space<vmem>>, vector<1x1x8x32xbf16>
    %227 = vector.shape_cast %226 : vector<1x1x8x32xbf16> to vector<8x32xbf16>
    %c1_266 = arith.constant 1 : index
    %c6_267 = arith.constant 6 : index
    %c1_268 = arith.constant 1 : index
    %c0_269 = arith.constant 0 : index
    %228 = vector.load %arg0[%c1_266, %c6_267, %c1_268, %c0_269] : memref<2x9x9x32xbf16, #tpu.memory_space<vmem>>, vector<1x1x8x32xbf16>
    %229 = vector.shape_cast %228 : vector<1x1x8x32xbf16> to vector<8x32xbf16>
    %230 = tpu.concatenate %223, %225, %227, %229 in 1 : vector<8x32xbf16>, vector<8x32xbf16>, vector<8x32xbf16>, vector<8x32xbf16> -> vector<8x128xbf16>
    %cst_270 = arith.constant dense<0.000000e+00> : vector<8x128xf32>
    %231 = tpu.matmul %230, %0, %cst_270 {dimension_numbers = #tpu.dot_dimension_numbers<[1], [0], [0], [1], [0, 0, 1, 1], [], []>} : vector<8x128xbf16>, vector<128x128xbf16>, vector<8x128xf32> -> vector<8x128xf32>
    %cst_271 = arith.constant 0.000000e+00 : f32
    %232 = vector.broadcast %cst_271 : f32 to vector<8x128xf32>
    %233 = arith.cmpf ogt, %231, %232 : vector<8x128xf32>
    %cst_272 = arith.constant 2.000000e-01 : f32
    %234 = vector.broadcast %cst_272 : f32 to vector<8x128xf32>
    %235 = arith.mulf %234, %231 : vector<8x128xf32>
    %236 = arith.select %233, %231, %235 : vector<8x128xi1>, vector<8x128xf32>
    %237 = arith.truncf %236 : vector<8x128xf32> to vector<8x128xbf16>
    %c104 = arith.constant 104 : index
    %c0_273 = arith.constant 0 : index
    %238 = vector.load %arg2[%c104, %c0_273] : memref<128x128xbf16, #tpu.memory_space<vmem>>, vector<8x128xbf16>
    tpu.vector_store %arg2[%c104, %c0_273], %237 {strides = array<i32>} : memref<128x128xbf16, #tpu.memory_space<vmem>>, vector<8x128xbf16>,
    %c1_274 = arith.constant 1 : index
    %c6_275 = arith.constant 6 : index
    %c0_276 = arith.constant 0 : index
    %c0_277 = arith.constant 0 : index
    %239 = vector.load %arg0[%c1_274, %c6_275, %c0_276, %c0_277] : memref<2x9x9x32xbf16, #tpu.memory_space<vmem>>, vector<1x1x8x32xbf16>
    %240 = vector.shape_cast %239 : vector<1x1x8x32xbf16> to vector<8x32xbf16>
    %c1_278 = arith.constant 1 : index
    %c6_279 = arith.constant 6 : index
    %c1_280 = arith.constant 1 : index
    %c0_281 = arith.constant 0 : index
    %241 = vector.load %arg0[%c1_278, %c6_279, %c1_280, %c0_281] : memref<2x9x9x32xbf16, #tpu.memory_space<vmem>>, vector<1x1x8x32xbf16>
    %242 = vector.shape_cast %241 : vector<1x1x8x32xbf16> to vector<8x32xbf16>
    %c1_282 = arith.constant 1 : index
    %c7_283 = arith.constant 7 : index
    %c0_284 = arith.constant 0 : index
    %c0_285 = arith.constant 0 : index
    %243 = vector.load %arg0[%c1_282, %c7_283, %c0_284, %c0_285] : memref<2x9x9x32xbf16, #tpu.memory_space<vmem>>, vector<1x1x8x32xbf16>
    %244 = vector.shape_cast %243 : vector<1x1x8x32xbf16> to vector<8x32xbf16>
    %c1_286 = arith.constant 1 : index
    %c7_287 = arith.constant 7 : index
    %c1_288 = arith.constant 1 : index
    %c0_289 = arith.constant 0 : index
    %245 = vector.load %arg0[%c1_286, %c7_287, %c1_288, %c0_289] : memref<2x9x9x32xbf16, #tpu.memory_space<vmem>>, vector<1x1x8x32xbf16>
    %246 = vector.shape_cast %245 : vector<1x1x8x32xbf16> to vector<8x32xbf16>
    %247 = tpu.concatenate %240, %242, %244, %246 in 1 : vector<8x32xbf16>, vector<8x32xbf16>, vector<8x32xbf16>, vector<8x32xbf16> -> vector<8x128xbf16>
    %cst_290 = arith.constant dense<0.000000e+00> : vector<8x128xf32>
    %248 = tpu.matmul %247, %0, %cst_290 {dimension_numbers = #tpu.dot_dimension_numbers<[1], [0], [0], [1], [0, 0, 1, 1], [], []>} : vector<8x128xbf16>, vector<128x128xbf16>, vector<8x128xf32> -> vector<8x128xf32>
    %cst_291 = arith.constant 0.000000e+00 : f32
    %249 = vector.broadcast %cst_291 : f32 to vector<8x128xf32>
    %250 = arith.cmpf ogt, %248, %249 : vector<8x128xf32>
    %cst_292 = arith.constant 2.000000e-01 : f32
    %251 = vector.broadcast %cst_292 : f32 to vector<8x128xf32>
    %252 = arith.mulf %251, %248 : vector<8x128xf32>
    %253 = arith.select %250, %248, %252 : vector<8x128xi1>, vector<8x128xf32>
    %254 = arith.truncf %253 : vector<8x128xf32> to vector<8x128xbf16>
    %c112 = arith.constant 112 : index
    %c0_293 = arith.constant 0 : index
    %255 = vector.load %arg2[%c112, %c0_293] : memref<128x128xbf16, #tpu.memory_space<vmem>>, vector<8x128xbf16>
    tpu.vector_store %arg2[%c112, %c0_293], %254 {strides = array<i32>} : memref<128x128xbf16, #tpu.memory_space<vmem>>, vector<8x128xbf16>,
    %c1_294 = arith.constant 1 : index
    %c7_295 = arith.constant 7 : index
    %c0_296 = arith.constant 0 : index
    %c0_297 = arith.constant 0 : index
    %256 = vector.load %arg0[%c1_294, %c7_295, %c0_296, %c0_297] : memref<2x9x9x32xbf16, #tpu.memory_space<vmem>>, vector<1x1x8x32xbf16>
    %257 = vector.shape_cast %256 : vector<1x1x8x32xbf16> to vector<8x32xbf16>
    %c1_298 = arith.constant 1 : index
    %c7_299 = arith.constant 7 : index
    %c1_300 = arith.constant 1 : index
    %c0_301 = arith.constant 0 : index
    %258 = vector.load %arg0[%c1_298, %c7_299, %c1_300, %c0_301] : memref<2x9x9x32xbf16, #tpu.memory_space<vmem>>, vector<1x1x8x32xbf16>
    %259 = vector.shape_cast %258 : vector<1x1x8x32xbf16> to vector<8x32xbf16>
    %c1_302 = arith.constant 1 : index
    %c8_303 = arith.constant 8 : index
    %c0_304 = arith.constant 0 : index
    %c0_305 = arith.constant 0 : index
    %260 = vector.load %arg0[%c1_302, %c8_303, %c0_304, %c0_305] : memref<2x9x9x32xbf16, #tpu.memory_space<vmem>>, vector<1x1x8x32xbf16>
    %261 = vector.shape_cast %260 : vector<1x1x8x32xbf16> to vector<8x32xbf16>
    %c1_306 = arith.constant 1 : index
    %c8_307 = arith.constant 8 : index
    %c1_308 = arith.constant 1 : index
    %c0_309 = arith.constant 0 : index
    %262 = vector.load %arg0[%c1_306, %c8_307, %c1_308, %c0_309] : memref<2x9x9x32xbf16, #tpu.memory_space<vmem>>, vector<1x1x8x32xbf16>
    %263 = vector.shape_cast %262 : vector<1x1x8x32xbf16> to vector<8x32xbf16>
    %264 = tpu.concatenate %257, %259, %261, %263 in 1 : vector<8x32xbf16>, vector<8x32xbf16>, vector<8x32xbf16>, vector<8x32xbf16> -> vector<8x128xbf16>
    %cst_310 = arith.constant dense<0.000000e+00> : vector<8x128xf32>
    %265 = tpu.matmul %264, %0, %cst_310 {dimension_numbers = #tpu.dot_dimension_numbers<[1], [0], [0], [1], [0, 0, 1, 1], [], []>} : vector<8x128xbf16>, vector<128x128xbf16>, vector<8x128xf32> -> vector<8x128xf32>
    %cst_311 = arith.constant 0.000000e+00 : f32
    %266 = vector.broadcast %cst_311 : f32 to vector<8x128xf32>
    %267 = arith.cmpf ogt, %265, %266 : vector<8x128xf32>
    %cst_312 = arith.constant 2.000000e-01 : f32
    %268 = vector.broadcast %cst_312 : f32 to vector<8x128xf32>
    %269 = arith.mulf %268, %265 : vector<8x128xf32>
    %270 = arith.select %267, %265, %269 : vector<8x128xi1>, vector<8x128xf32>
    %271 = arith.truncf %270 : vector<8x128xf32> to vector<8x128xbf16>
    %c120 = arith.constant 120 : index
    %c0_313 = arith.constant 0 : index
    %272 = vector.load %arg2[%c120, %c0_313] : memref<128x128xbf16, #tpu.memory_space<vmem>>, vector<8x128xbf16>
    tpu.vector_store %arg2[%c120, %c0_313], %271 {strides = array<i32>} : memref<128x128xbf16, #tpu.memory_space<vmem>>, vector<8x128xbf16>,
    return
  }
}

module attributes {stable_mosaic.version = 11 : i64} {
  func.func @_conv_s2d_kernel(%arg0: memref<2x5x5x32xbf16, #tpu.memory_space<vmem>>, %arg1: memref<128x128xbf16, #tpu.memory_space<vmem>>, %arg2: memref<1x128xf32, #tpu.memory_space<vmem>>, %arg3: memref<1x128xf32, #tpu.memory_space<vmem>>, %arg4: memref<32x128xbf16, #tpu.memory_space<vmem>>) attributes {dimension_semantics = [], scalar_prefetch = 0 : i64, scratch_operands = 0 : i64, tpu.core_type = #tpu.core_type<tc>} {
    %c0 = arith.constant 0 : index
    %c0_0 = arith.constant 0 : index
    %0 = vector.load %arg1[%c0, %c0_0] : memref<128x128xbf16, #tpu.memory_space<vmem>>, vector<128x128xbf16>
    %cst = arith.constant 0.000000e+00 : f32
    %1 = vector.broadcast %cst : f32 to vector<1x128xf32>
    %cst_1 = arith.constant 0.000000e+00 : f32
    %2 = vector.broadcast %cst_1 : f32 to vector<1x128xf32>
    %c0_2 = arith.constant 0 : index
    %c0_3 = arith.constant 0 : index
    %c0_4 = arith.constant 0 : index
    %c0_5 = arith.constant 0 : index
    %3 = vector.load %arg0[%c0_2, %c0_3, %c0_4, %c0_5] : memref<2x5x5x32xbf16, #tpu.memory_space<vmem>>, vector<1x1x4x32xbf16>
    %4 = vector.shape_cast %3 : vector<1x1x4x32xbf16> to vector<4x32xbf16>
    %c0_6 = arith.constant 0 : index
    %c0_7 = arith.constant 0 : index
    %c1 = arith.constant 1 : index
    %c0_8 = arith.constant 0 : index
    %5 = vector.load %arg0[%c0_6, %c0_7, %c1, %c0_8] : memref<2x5x5x32xbf16, #tpu.memory_space<vmem>>, vector<1x1x4x32xbf16>
    %6 = vector.shape_cast %5 : vector<1x1x4x32xbf16> to vector<4x32xbf16>
    %c0_9 = arith.constant 0 : index
    %c1_10 = arith.constant 1 : index
    %c0_11 = arith.constant 0 : index
    %c0_12 = arith.constant 0 : index
    %7 = vector.load %arg0[%c0_9, %c1_10, %c0_11, %c0_12] : memref<2x5x5x32xbf16, #tpu.memory_space<vmem>>, vector<1x1x4x32xbf16>
    %8 = vector.shape_cast %7 : vector<1x1x4x32xbf16> to vector<4x32xbf16>
    %c0_13 = arith.constant 0 : index
    %c1_14 = arith.constant 1 : index
    %c1_15 = arith.constant 1 : index
    %c0_16 = arith.constant 0 : index
    %9 = vector.load %arg0[%c0_13, %c1_14, %c1_15, %c0_16] : memref<2x5x5x32xbf16, #tpu.memory_space<vmem>>, vector<1x1x4x32xbf16>
    %10 = vector.shape_cast %9 : vector<1x1x4x32xbf16> to vector<4x32xbf16>
    %11 = tpu.concatenate %4, %6, %8, %10 in 1 : vector<4x32xbf16>, vector<4x32xbf16>, vector<4x32xbf16>, vector<4x32xbf16> -> vector<4x128xbf16>
    %cst_17 = arith.constant dense<0.000000e+00> : vector<4x128xf32>
    %12 = tpu.matmul %11, %0, %cst_17 {dimension_numbers = #tpu.dot_dimension_numbers<[1], [0], [0], [1], [0, 0, 1, 1], [], []>} : vector<4x128xbf16>, vector<128x128xbf16>, vector<4x128xf32> -> vector<4x128xf32>
    %cst_18 = arith.constant dense<0.000000e+00> : vector<128xf32>
    %13 = vector.multi_reduction <add>, %12, %cst_18 [0] : vector<4x128xf32> to vector<128xf32>
    %14 = vector.shape_cast %13 : vector<128xf32> to vector<1x128xf32>
    %15 = arith.addf %1, %14 : vector<1x128xf32>
    %16 = arith.mulf %12, %12 : vector<4x128xf32>
    %cst_19 = arith.constant dense<0.000000e+00> : vector<128xf32>
    %17 = vector.multi_reduction <add>, %16, %cst_19 [0] : vector<4x128xf32> to vector<128xf32>
    %18 = vector.shape_cast %17 : vector<128xf32> to vector<1x128xf32>
    %19 = arith.addf %2, %18 : vector<1x128xf32>
    %c0_20 = arith.constant 0 : index
    %c1_21 = arith.constant 1 : index
    %c0_22 = arith.constant 0 : index
    %c0_23 = arith.constant 0 : index
    %20 = vector.load %arg0[%c0_20, %c1_21, %c0_22, %c0_23] : memref<2x5x5x32xbf16, #tpu.memory_space<vmem>>, vector<1x1x4x32xbf16>
    %21 = vector.shape_cast %20 : vector<1x1x4x32xbf16> to vector<4x32xbf16>
    %c0_24 = arith.constant 0 : index
    %c1_25 = arith.constant 1 : index
    %c1_26 = arith.constant 1 : index
    %c0_27 = arith.constant 0 : index
    %22 = vector.load %arg0[%c0_24, %c1_25, %c1_26, %c0_27] : memref<2x5x5x32xbf16, #tpu.memory_space<vmem>>, vector<1x1x4x32xbf16>
    %23 = vector.shape_cast %22 : vector<1x1x4x32xbf16> to vector<4x32xbf16>
    %c0_28 = arith.constant 0 : index
    %c2 = arith.constant 2 : index
    %c0_29 = arith.constant 0 : index
    %c0_30 = arith.constant 0 : index
    %24 = vector.load %arg0[%c0_28, %c2, %c0_29, %c0_30] : memref<2x5x5x32xbf16, #tpu.memory_space<vmem>>, vector<1x1x4x32xbf16>
    %25 = vector.shape_cast %24 : vector<1x1x4x32xbf16> to vector<4x32xbf16>
    %c0_31 = arith.constant 0 : index
    %c2_32 = arith.constant 2 : index
    %c1_33 = arith.constant 1 : index
    %c0_34 = arith.constant 0 : index
    %26 = vector.load %arg0[%c0_31, %c2_32, %c1_33, %c0_34] : memref<2x5x5x32xbf16, #tpu.memory_space<vmem>>, vector<1x1x4x32xbf16>
    %27 = vector.shape_cast %26 : vector<1x1x4x32xbf16> to vector<4x32xbf16>
    %28 = tpu.concatenate %21, %23, %25, %27 in 1 : vector<4x32xbf16>, vector<4x32xbf16>, vector<4x32xbf16>, vector<4x32xbf16> -> vector<4x128xbf16>
    %cst_35 = arith.constant dense<0.000000e+00> : vector<4x128xf32>
    %29 = tpu.matmul %28, %0, %cst_35 {dimension_numbers = #tpu.dot_dimension_numbers<[1], [0], [0], [1], [0, 0, 1, 1], [], []>} : vector<4x128xbf16>, vector<128x128xbf16>, vector<4x128xf32> -> vector<4x128xf32>
    %cst_36 = arith.constant dense<0.000000e+00> : vector<128xf32>
    %30 = vector.multi_reduction <add>, %29, %cst_36 [0] : vector<4x128xf32> to vector<128xf32>
    %31 = vector.shape_cast %30 : vector<128xf32> to vector<1x128xf32>
    %32 = arith.addf %15, %31 : vector<1x128xf32>
    %33 = arith.mulf %29, %29 : vector<4x128xf32>
    %cst_37 = arith.constant dense<0.000000e+00> : vector<128xf32>
    %34 = vector.multi_reduction <add>, %33, %cst_37 [0] : vector<4x128xf32> to vector<128xf32>
    %35 = vector.shape_cast %34 : vector<128xf32> to vector<1x128xf32>
    %36 = arith.addf %19, %35 : vector<1x128xf32>
    %c0_38 = arith.constant 0 : index
    %c2_39 = arith.constant 2 : index
    %c0_40 = arith.constant 0 : index
    %c0_41 = arith.constant 0 : index
    %37 = vector.load %arg0[%c0_38, %c2_39, %c0_40, %c0_41] : memref<2x5x5x32xbf16, #tpu.memory_space<vmem>>, vector<1x1x4x32xbf16>
    %38 = vector.shape_cast %37 : vector<1x1x4x32xbf16> to vector<4x32xbf16>
    %c0_42 = arith.constant 0 : index
    %c2_43 = arith.constant 2 : index
    %c1_44 = arith.constant 1 : index
    %c0_45 = arith.constant 0 : index
    %39 = vector.load %arg0[%c0_42, %c2_43, %c1_44, %c0_45] : memref<2x5x5x32xbf16, #tpu.memory_space<vmem>>, vector<1x1x4x32xbf16>
    %40 = vector.shape_cast %39 : vector<1x1x4x32xbf16> to vector<4x32xbf16>
    %c0_46 = arith.constant 0 : index
    %c3 = arith.constant 3 : index
    %c0_47 = arith.constant 0 : index
    %c0_48 = arith.constant 0 : index
    %41 = vector.load %arg0[%c0_46, %c3, %c0_47, %c0_48] : memref<2x5x5x32xbf16, #tpu.memory_space<vmem>>, vector<1x1x4x32xbf16>
    %42 = vector.shape_cast %41 : vector<1x1x4x32xbf16> to vector<4x32xbf16>
    %c0_49 = arith.constant 0 : index
    %c3_50 = arith.constant 3 : index
    %c1_51 = arith.constant 1 : index
    %c0_52 = arith.constant 0 : index
    %43 = vector.load %arg0[%c0_49, %c3_50, %c1_51, %c0_52] : memref<2x5x5x32xbf16, #tpu.memory_space<vmem>>, vector<1x1x4x32xbf16>
    %44 = vector.shape_cast %43 : vector<1x1x4x32xbf16> to vector<4x32xbf16>
    %45 = tpu.concatenate %38, %40, %42, %44 in 1 : vector<4x32xbf16>, vector<4x32xbf16>, vector<4x32xbf16>, vector<4x32xbf16> -> vector<4x128xbf16>
    %cst_53 = arith.constant dense<0.000000e+00> : vector<4x128xf32>
    %46 = tpu.matmul %45, %0, %cst_53 {dimension_numbers = #tpu.dot_dimension_numbers<[1], [0], [0], [1], [0, 0, 1, 1], [], []>} : vector<4x128xbf16>, vector<128x128xbf16>, vector<4x128xf32> -> vector<4x128xf32>
    %cst_54 = arith.constant dense<0.000000e+00> : vector<128xf32>
    %47 = vector.multi_reduction <add>, %46, %cst_54 [0] : vector<4x128xf32> to vector<128xf32>
    %48 = vector.shape_cast %47 : vector<128xf32> to vector<1x128xf32>
    %49 = arith.addf %32, %48 : vector<1x128xf32>
    %50 = arith.mulf %46, %46 : vector<4x128xf32>
    %cst_55 = arith.constant dense<0.000000e+00> : vector<128xf32>
    %51 = vector.multi_reduction <add>, %50, %cst_55 [0] : vector<4x128xf32> to vector<128xf32>
    %52 = vector.shape_cast %51 : vector<128xf32> to vector<1x128xf32>
    %53 = arith.addf %36, %52 : vector<1x128xf32>
    %c0_56 = arith.constant 0 : index
    %c3_57 = arith.constant 3 : index
    %c0_58 = arith.constant 0 : index
    %c0_59 = arith.constant 0 : index
    %54 = vector.load %arg0[%c0_56, %c3_57, %c0_58, %c0_59] : memref<2x5x5x32xbf16, #tpu.memory_space<vmem>>, vector<1x1x4x32xbf16>
    %55 = vector.shape_cast %54 : vector<1x1x4x32xbf16> to vector<4x32xbf16>
    %c0_60 = arith.constant 0 : index
    %c3_61 = arith.constant 3 : index
    %c1_62 = arith.constant 1 : index
    %c0_63 = arith.constant 0 : index
    %56 = vector.load %arg0[%c0_60, %c3_61, %c1_62, %c0_63] : memref<2x5x5x32xbf16, #tpu.memory_space<vmem>>, vector<1x1x4x32xbf16>
    %57 = vector.shape_cast %56 : vector<1x1x4x32xbf16> to vector<4x32xbf16>
    %c0_64 = arith.constant 0 : index
    %c4 = arith.constant 4 : index
    %c0_65 = arith.constant 0 : index
    %c0_66 = arith.constant 0 : index
    %58 = vector.load %arg0[%c0_64, %c4, %c0_65, %c0_66] : memref<2x5x5x32xbf16, #tpu.memory_space<vmem>>, vector<1x1x4x32xbf16>
    %59 = vector.shape_cast %58 : vector<1x1x4x32xbf16> to vector<4x32xbf16>
    %c0_67 = arith.constant 0 : index
    %c4_68 = arith.constant 4 : index
    %c1_69 = arith.constant 1 : index
    %c0_70 = arith.constant 0 : index
    %60 = vector.load %arg0[%c0_67, %c4_68, %c1_69, %c0_70] : memref<2x5x5x32xbf16, #tpu.memory_space<vmem>>, vector<1x1x4x32xbf16>
    %61 = vector.shape_cast %60 : vector<1x1x4x32xbf16> to vector<4x32xbf16>
    %62 = tpu.concatenate %55, %57, %59, %61 in 1 : vector<4x32xbf16>, vector<4x32xbf16>, vector<4x32xbf16>, vector<4x32xbf16> -> vector<4x128xbf16>
    %cst_71 = arith.constant dense<0.000000e+00> : vector<4x128xf32>
    %63 = tpu.matmul %62, %0, %cst_71 {dimension_numbers = #tpu.dot_dimension_numbers<[1], [0], [0], [1], [0, 0, 1, 1], [], []>} : vector<4x128xbf16>, vector<128x128xbf16>, vector<4x128xf32> -> vector<4x128xf32>
    %cst_72 = arith.constant dense<0.000000e+00> : vector<128xf32>
    %64 = vector.multi_reduction <add>, %63, %cst_72 [0] : vector<4x128xf32> to vector<128xf32>
    %65 = vector.shape_cast %64 : vector<128xf32> to vector<1x128xf32>
    %66 = arith.addf %49, %65 : vector<1x128xf32>
    %67 = arith.mulf %63, %63 : vector<4x128xf32>
    %cst_73 = arith.constant dense<0.000000e+00> : vector<128xf32>
    %68 = vector.multi_reduction <add>, %67, %cst_73 [0] : vector<4x128xf32> to vector<128xf32>
    %69 = vector.shape_cast %68 : vector<128xf32> to vector<1x128xf32>
    %70 = arith.addf %53, %69 : vector<1x128xf32>
    %c1_74 = arith.constant 1 : index
    %c0_75 = arith.constant 0 : index
    %c0_76 = arith.constant 0 : index
    %c0_77 = arith.constant 0 : index
    %71 = vector.load %arg0[%c1_74, %c0_75, %c0_76, %c0_77] : memref<2x5x5x32xbf16, #tpu.memory_space<vmem>>, vector<1x1x4x32xbf16>
    %72 = vector.shape_cast %71 : vector<1x1x4x32xbf16> to vector<4x32xbf16>
    %c1_78 = arith.constant 1 : index
    %c0_79 = arith.constant 0 : index
    %c1_80 = arith.constant 1 : index
    %c0_81 = arith.constant 0 : index
    %73 = vector.load %arg0[%c1_78, %c0_79, %c1_80, %c0_81] : memref<2x5x5x32xbf16, #tpu.memory_space<vmem>>, vector<1x1x4x32xbf16>
    %74 = vector.shape_cast %73 : vector<1x1x4x32xbf16> to vector<4x32xbf16>
    %c1_82 = arith.constant 1 : index
    %c1_83 = arith.constant 1 : index
    %c0_84 = arith.constant 0 : index
    %c0_85 = arith.constant 0 : index
    %75 = vector.load %arg0[%c1_82, %c1_83, %c0_84, %c0_85] : memref<2x5x5x32xbf16, #tpu.memory_space<vmem>>, vector<1x1x4x32xbf16>
    %76 = vector.shape_cast %75 : vector<1x1x4x32xbf16> to vector<4x32xbf16>
    %c1_86 = arith.constant 1 : index
    %c1_87 = arith.constant 1 : index
    %c1_88 = arith.constant 1 : index
    %c0_89 = arith.constant 0 : index
    %77 = vector.load %arg0[%c1_86, %c1_87, %c1_88, %c0_89] : memref<2x5x5x32xbf16, #tpu.memory_space<vmem>>, vector<1x1x4x32xbf16>
    %78 = vector.shape_cast %77 : vector<1x1x4x32xbf16> to vector<4x32xbf16>
    %79 = tpu.concatenate %72, %74, %76, %78 in 1 : vector<4x32xbf16>, vector<4x32xbf16>, vector<4x32xbf16>, vector<4x32xbf16> -> vector<4x128xbf16>
    %cst_90 = arith.constant dense<0.000000e+00> : vector<4x128xf32>
    %80 = tpu.matmul %79, %0, %cst_90 {dimension_numbers = #tpu.dot_dimension_numbers<[1], [0], [0], [1], [0, 0, 1, 1], [], []>} : vector<4x128xbf16>, vector<128x128xbf16>, vector<4x128xf32> -> vector<4x128xf32>
    %cst_91 = arith.constant dense<0.000000e+00> : vector<128xf32>
    %81 = vector.multi_reduction <add>, %80, %cst_91 [0] : vector<4x128xf32> to vector<128xf32>
    %82 = vector.shape_cast %81 : vector<128xf32> to vector<1x128xf32>
    %83 = arith.addf %66, %82 : vector<1x128xf32>
    %84 = arith.mulf %80, %80 : vector<4x128xf32>
    %cst_92 = arith.constant dense<0.000000e+00> : vector<128xf32>
    %85 = vector.multi_reduction <add>, %84, %cst_92 [0] : vector<4x128xf32> to vector<128xf32>
    %86 = vector.shape_cast %85 : vector<128xf32> to vector<1x128xf32>
    %87 = arith.addf %70, %86 : vector<1x128xf32>
    %c1_93 = arith.constant 1 : index
    %c1_94 = arith.constant 1 : index
    %c0_95 = arith.constant 0 : index
    %c0_96 = arith.constant 0 : index
    %88 = vector.load %arg0[%c1_93, %c1_94, %c0_95, %c0_96] : memref<2x5x5x32xbf16, #tpu.memory_space<vmem>>, vector<1x1x4x32xbf16>
    %89 = vector.shape_cast %88 : vector<1x1x4x32xbf16> to vector<4x32xbf16>
    %c1_97 = arith.constant 1 : index
    %c1_98 = arith.constant 1 : index
    %c1_99 = arith.constant 1 : index
    %c0_100 = arith.constant 0 : index
    %90 = vector.load %arg0[%c1_97, %c1_98, %c1_99, %c0_100] : memref<2x5x5x32xbf16, #tpu.memory_space<vmem>>, vector<1x1x4x32xbf16>
    %91 = vector.shape_cast %90 : vector<1x1x4x32xbf16> to vector<4x32xbf16>
    %c1_101 = arith.constant 1 : index
    %c2_102 = arith.constant 2 : index
    %c0_103 = arith.constant 0 : index
    %c0_104 = arith.constant 0 : index
    %92 = vector.load %arg0[%c1_101, %c2_102, %c0_103, %c0_104] : memref<2x5x5x32xbf16, #tpu.memory_space<vmem>>, vector<1x1x4x32xbf16>
    %93 = vector.shape_cast %92 : vector<1x1x4x32xbf16> to vector<4x32xbf16>
    %c1_105 = arith.constant 1 : index
    %c2_106 = arith.constant 2 : index
    %c1_107 = arith.constant 1 : index
    %c0_108 = arith.constant 0 : index
    %94 = vector.load %arg0[%c1_105, %c2_106, %c1_107, %c0_108] : memref<2x5x5x32xbf16, #tpu.memory_space<vmem>>, vector<1x1x4x32xbf16>
    %95 = vector.shape_cast %94 : vector<1x1x4x32xbf16> to vector<4x32xbf16>
    %96 = tpu.concatenate %89, %91, %93, %95 in 1 : vector<4x32xbf16>, vector<4x32xbf16>, vector<4x32xbf16>, vector<4x32xbf16> -> vector<4x128xbf16>
    %cst_109 = arith.constant dense<0.000000e+00> : vector<4x128xf32>
    %97 = tpu.matmul %96, %0, %cst_109 {dimension_numbers = #tpu.dot_dimension_numbers<[1], [0], [0], [1], [0, 0, 1, 1], [], []>} : vector<4x128xbf16>, vector<128x128xbf16>, vector<4x128xf32> -> vector<4x128xf32>
    %cst_110 = arith.constant dense<0.000000e+00> : vector<128xf32>
    %98 = vector.multi_reduction <add>, %97, %cst_110 [0] : vector<4x128xf32> to vector<128xf32>
    %99 = vector.shape_cast %98 : vector<128xf32> to vector<1x128xf32>
    %100 = arith.addf %83, %99 : vector<1x128xf32>
    %101 = arith.mulf %97, %97 : vector<4x128xf32>
    %cst_111 = arith.constant dense<0.000000e+00> : vector<128xf32>
    %102 = vector.multi_reduction <add>, %101, %cst_111 [0] : vector<4x128xf32> to vector<128xf32>
    %103 = vector.shape_cast %102 : vector<128xf32> to vector<1x128xf32>
    %104 = arith.addf %87, %103 : vector<1x128xf32>
    %c1_112 = arith.constant 1 : index
    %c2_113 = arith.constant 2 : index
    %c0_114 = arith.constant 0 : index
    %c0_115 = arith.constant 0 : index
    %105 = vector.load %arg0[%c1_112, %c2_113, %c0_114, %c0_115] : memref<2x5x5x32xbf16, #tpu.memory_space<vmem>>, vector<1x1x4x32xbf16>
    %106 = vector.shape_cast %105 : vector<1x1x4x32xbf16> to vector<4x32xbf16>
    %c1_116 = arith.constant 1 : index
    %c2_117 = arith.constant 2 : index
    %c1_118 = arith.constant 1 : index
    %c0_119 = arith.constant 0 : index
    %107 = vector.load %arg0[%c1_116, %c2_117, %c1_118, %c0_119] : memref<2x5x5x32xbf16, #tpu.memory_space<vmem>>, vector<1x1x4x32xbf16>
    %108 = vector.shape_cast %107 : vector<1x1x4x32xbf16> to vector<4x32xbf16>
    %c1_120 = arith.constant 1 : index
    %c3_121 = arith.constant 3 : index
    %c0_122 = arith.constant 0 : index
    %c0_123 = arith.constant 0 : index
    %109 = vector.load %arg0[%c1_120, %c3_121, %c0_122, %c0_123] : memref<2x5x5x32xbf16, #tpu.memory_space<vmem>>, vector<1x1x4x32xbf16>
    %110 = vector.shape_cast %109 : vector<1x1x4x32xbf16> to vector<4x32xbf16>
    %c1_124 = arith.constant 1 : index
    %c3_125 = arith.constant 3 : index
    %c1_126 = arith.constant 1 : index
    %c0_127 = arith.constant 0 : index
    %111 = vector.load %arg0[%c1_124, %c3_125, %c1_126, %c0_127] : memref<2x5x5x32xbf16, #tpu.memory_space<vmem>>, vector<1x1x4x32xbf16>
    %112 = vector.shape_cast %111 : vector<1x1x4x32xbf16> to vector<4x32xbf16>
    %113 = tpu.concatenate %106, %108, %110, %112 in 1 : vector<4x32xbf16>, vector<4x32xbf16>, vector<4x32xbf16>, vector<4x32xbf16> -> vector<4x128xbf16>
    %cst_128 = arith.constant dense<0.000000e+00> : vector<4x128xf32>
    %114 = tpu.matmul %113, %0, %cst_128 {dimension_numbers = #tpu.dot_dimension_numbers<[1], [0], [0], [1], [0, 0, 1, 1], [], []>} : vector<4x128xbf16>, vector<128x128xbf16>, vector<4x128xf32> -> vector<4x128xf32>
    %cst_129 = arith.constant dense<0.000000e+00> : vector<128xf32>
    %115 = vector.multi_reduction <add>, %114, %cst_129 [0] : vector<4x128xf32> to vector<128xf32>
    %116 = vector.shape_cast %115 : vector<128xf32> to vector<1x128xf32>
    %117 = arith.addf %100, %116 : vector<1x128xf32>
    %118 = arith.mulf %114, %114 : vector<4x128xf32>
    %cst_130 = arith.constant dense<0.000000e+00> : vector<128xf32>
    %119 = vector.multi_reduction <add>, %118, %cst_130 [0] : vector<4x128xf32> to vector<128xf32>
    %120 = vector.shape_cast %119 : vector<128xf32> to vector<1x128xf32>
    %121 = arith.addf %104, %120 : vector<1x128xf32>
    %c1_131 = arith.constant 1 : index
    %c3_132 = arith.constant 3 : index
    %c0_133 = arith.constant 0 : index
    %c0_134 = arith.constant 0 : index
    %122 = vector.load %arg0[%c1_131, %c3_132, %c0_133, %c0_134] : memref<2x5x5x32xbf16, #tpu.memory_space<vmem>>, vector<1x1x4x32xbf16>
    %123 = vector.shape_cast %122 : vector<1x1x4x32xbf16> to vector<4x32xbf16>
    %c1_135 = arith.constant 1 : index
    %c3_136 = arith.constant 3 : index
    %c1_137 = arith.constant 1 : index
    %c0_138 = arith.constant 0 : index
    %124 = vector.load %arg0[%c1_135, %c3_136, %c1_137, %c0_138] : memref<2x5x5x32xbf16, #tpu.memory_space<vmem>>, vector<1x1x4x32xbf16>
    %125 = vector.shape_cast %124 : vector<1x1x4x32xbf16> to vector<4x32xbf16>
    %c1_139 = arith.constant 1 : index
    %c4_140 = arith.constant 4 : index
    %c0_141 = arith.constant 0 : index
    %c0_142 = arith.constant 0 : index
    %126 = vector.load %arg0[%c1_139, %c4_140, %c0_141, %c0_142] : memref<2x5x5x32xbf16, #tpu.memory_space<vmem>>, vector<1x1x4x32xbf16>
    %127 = vector.shape_cast %126 : vector<1x1x4x32xbf16> to vector<4x32xbf16>
    %c1_143 = arith.constant 1 : index
    %c4_144 = arith.constant 4 : index
    %c1_145 = arith.constant 1 : index
    %c0_146 = arith.constant 0 : index
    %128 = vector.load %arg0[%c1_143, %c4_144, %c1_145, %c0_146] : memref<2x5x5x32xbf16, #tpu.memory_space<vmem>>, vector<1x1x4x32xbf16>
    %129 = vector.shape_cast %128 : vector<1x1x4x32xbf16> to vector<4x32xbf16>
    %130 = tpu.concatenate %123, %125, %127, %129 in 1 : vector<4x32xbf16>, vector<4x32xbf16>, vector<4x32xbf16>, vector<4x32xbf16> -> vector<4x128xbf16>
    %cst_147 = arith.constant dense<0.000000e+00> : vector<4x128xf32>
    %131 = tpu.matmul %130, %0, %cst_147 {dimension_numbers = #tpu.dot_dimension_numbers<[1], [0], [0], [1], [0, 0, 1, 1], [], []>} : vector<4x128xbf16>, vector<128x128xbf16>, vector<4x128xf32> -> vector<4x128xf32>
    %cst_148 = arith.constant dense<0.000000e+00> : vector<128xf32>
    %132 = vector.multi_reduction <add>, %131, %cst_148 [0] : vector<4x128xf32> to vector<128xf32>
    %133 = vector.shape_cast %132 : vector<128xf32> to vector<1x128xf32>
    %134 = arith.addf %117, %133 : vector<1x128xf32>
    %135 = arith.mulf %131, %131 : vector<4x128xf32>
    %cst_149 = arith.constant dense<0.000000e+00> : vector<128xf32>
    %136 = vector.multi_reduction <add>, %135, %cst_149 [0] : vector<4x128xf32> to vector<128xf32>
    %137 = vector.shape_cast %136 : vector<128xf32> to vector<1x128xf32>
    %138 = arith.addf %121, %137 : vector<1x128xf32>
    %cst_150 = arith.constant 3.200000e+01 : f32
    %139 = vector.broadcast %cst_150 : f32 to vector<1x128xf32>
    %140 = arith.divf %134, %139 : vector<1x128xf32>
    %cst_151 = arith.constant 3.200000e+01 : f32
    %141 = vector.broadcast %cst_151 : f32 to vector<1x128xf32>
    %142 = arith.divf %138, %141 : vector<1x128xf32>
    %143 = arith.mulf %140, %140 : vector<1x128xf32>
    %144 = arith.subf %142, %143 : vector<1x128xf32>
    %c0_152 = arith.constant 0 : index
    %c0_153 = arith.constant 0 : index
    %145 = vector.load %arg2[%c0_152, %c0_153] : memref<1x128xf32, #tpu.memory_space<vmem>>, vector<1x128xf32>
    %cst_154 = arith.constant 9.99999974E-6 : f32
    %146 = vector.broadcast %cst_154 : f32 to vector<1x128xf32>
    %147 = arith.addf %144, %146 : vector<1x128xf32>
    %148 = math.rsqrt %147 : vector<1x128xf32>
    %149 = arith.mulf %145, %148 : vector<1x128xf32>
    %c0_155 = arith.constant 0 : index
    %c0_156 = arith.constant 0 : index
    %150 = vector.load %arg3[%c0_155, %c0_156] : memref<1x128xf32, #tpu.memory_space<vmem>>, vector<1x128xf32>
    %151 = arith.mulf %140, %149 : vector<1x128xf32>
    %152 = arith.subf %150, %151 : vector<1x128xf32>
    %153 = vector.broadcast %149 : vector<1x128xf32> to vector<4x128xf32>
    %154 = arith.mulf %12, %153 : vector<4x128xf32>
    %155 = vector.broadcast %152 : vector<1x128xf32> to vector<4x128xf32>
    %156 = arith.addf %154, %155 : vector<4x128xf32>
    %cst_157 = arith.constant 0.000000e+00 : f32
    %157 = vector.broadcast %cst_157 : f32 to vector<4x128xf32>
    %158 = arith.cmpf ogt, %156, %157 : vector<4x128xf32>
    %cst_158 = arith.constant 2.000000e-01 : f32
    %159 = vector.broadcast %cst_158 : f32 to vector<4x128xf32>
    %160 = arith.mulf %159, %156 : vector<4x128xf32>
    %161 = arith.select %158, %156, %160 : vector<4x128xi1>, vector<4x128xf32>
    %162 = arith.truncf %161 : vector<4x128xf32> to vector<4x128xbf16>
    %c0_159 = arith.constant 0 : index
    %c0_160 = arith.constant 0 : index
    %163 = vector.load %arg4[%c0_159, %c0_160] : memref<32x128xbf16, #tpu.memory_space<vmem>>, vector<4x128xbf16>
    tpu.vector_store %arg4[%c0_159, %c0_160], %162 {strides = array<i32>} : memref<32x128xbf16, #tpu.memory_space<vmem>>, vector<4x128xbf16>,
    %164 = vector.broadcast %149 : vector<1x128xf32> to vector<4x128xf32>
    %165 = arith.mulf %29, %164 : vector<4x128xf32>
    %166 = vector.broadcast %152 : vector<1x128xf32> to vector<4x128xf32>
    %167 = arith.addf %165, %166 : vector<4x128xf32>
    %cst_161 = arith.constant 0.000000e+00 : f32
    %168 = vector.broadcast %cst_161 : f32 to vector<4x128xf32>
    %169 = arith.cmpf ogt, %167, %168 : vector<4x128xf32>
    %cst_162 = arith.constant 2.000000e-01 : f32
    %170 = vector.broadcast %cst_162 : f32 to vector<4x128xf32>
    %171 = arith.mulf %170, %167 : vector<4x128xf32>
    %172 = arith.select %169, %167, %171 : vector<4x128xi1>, vector<4x128xf32>
    %173 = arith.truncf %172 : vector<4x128xf32> to vector<4x128xbf16>
    %c4_163 = arith.constant 4 : index
    %c0_164 = arith.constant 0 : index
    %174 = vector.load %arg4[%c4_163, %c0_164] : memref<32x128xbf16, #tpu.memory_space<vmem>>, vector<4x128xbf16>
    tpu.vector_store %arg4[%c4_163, %c0_164], %173 {strides = array<i32>} : memref<32x128xbf16, #tpu.memory_space<vmem>>, vector<4x128xbf16>,
    %175 = vector.broadcast %149 : vector<1x128xf32> to vector<4x128xf32>
    %176 = arith.mulf %46, %175 : vector<4x128xf32>
    %177 = vector.broadcast %152 : vector<1x128xf32> to vector<4x128xf32>
    %178 = arith.addf %176, %177 : vector<4x128xf32>
    %cst_165 = arith.constant 0.000000e+00 : f32
    %179 = vector.broadcast %cst_165 : f32 to vector<4x128xf32>
    %180 = arith.cmpf ogt, %178, %179 : vector<4x128xf32>
    %cst_166 = arith.constant 2.000000e-01 : f32
    %181 = vector.broadcast %cst_166 : f32 to vector<4x128xf32>
    %182 = arith.mulf %181, %178 : vector<4x128xf32>
    %183 = arith.select %180, %178, %182 : vector<4x128xi1>, vector<4x128xf32>
    %184 = arith.truncf %183 : vector<4x128xf32> to vector<4x128xbf16>
    %c8 = arith.constant 8 : index
    %c0_167 = arith.constant 0 : index
    %185 = vector.load %arg4[%c8, %c0_167] : memref<32x128xbf16, #tpu.memory_space<vmem>>, vector<4x128xbf16>
    tpu.vector_store %arg4[%c8, %c0_167], %184 {strides = array<i32>} : memref<32x128xbf16, #tpu.memory_space<vmem>>, vector<4x128xbf16>,
    %186 = vector.broadcast %149 : vector<1x128xf32> to vector<4x128xf32>
    %187 = arith.mulf %63, %186 : vector<4x128xf32>
    %188 = vector.broadcast %152 : vector<1x128xf32> to vector<4x128xf32>
    %189 = arith.addf %187, %188 : vector<4x128xf32>
    %cst_168 = arith.constant 0.000000e+00 : f32
    %190 = vector.broadcast %cst_168 : f32 to vector<4x128xf32>
    %191 = arith.cmpf ogt, %189, %190 : vector<4x128xf32>
    %cst_169 = arith.constant 2.000000e-01 : f32
    %192 = vector.broadcast %cst_169 : f32 to vector<4x128xf32>
    %193 = arith.mulf %192, %189 : vector<4x128xf32>
    %194 = arith.select %191, %189, %193 : vector<4x128xi1>, vector<4x128xf32>
    %195 = arith.truncf %194 : vector<4x128xf32> to vector<4x128xbf16>
    %c12 = arith.constant 12 : index
    %c0_170 = arith.constant 0 : index
    %196 = vector.load %arg4[%c12, %c0_170] : memref<32x128xbf16, #tpu.memory_space<vmem>>, vector<4x128xbf16>
    tpu.vector_store %arg4[%c12, %c0_170], %195 {strides = array<i32>} : memref<32x128xbf16, #tpu.memory_space<vmem>>, vector<4x128xbf16>,
    %197 = vector.broadcast %149 : vector<1x128xf32> to vector<4x128xf32>
    %198 = arith.mulf %80, %197 : vector<4x128xf32>
    %199 = vector.broadcast %152 : vector<1x128xf32> to vector<4x128xf32>
    %200 = arith.addf %198, %199 : vector<4x128xf32>
    %cst_171 = arith.constant 0.000000e+00 : f32
    %201 = vector.broadcast %cst_171 : f32 to vector<4x128xf32>
    %202 = arith.cmpf ogt, %200, %201 : vector<4x128xf32>
    %cst_172 = arith.constant 2.000000e-01 : f32
    %203 = vector.broadcast %cst_172 : f32 to vector<4x128xf32>
    %204 = arith.mulf %203, %200 : vector<4x128xf32>
    %205 = arith.select %202, %200, %204 : vector<4x128xi1>, vector<4x128xf32>
    %206 = arith.truncf %205 : vector<4x128xf32> to vector<4x128xbf16>
    %c16 = arith.constant 16 : index
    %c0_173 = arith.constant 0 : index
    %207 = vector.load %arg4[%c16, %c0_173] : memref<32x128xbf16, #tpu.memory_space<vmem>>, vector<4x128xbf16>
    tpu.vector_store %arg4[%c16, %c0_173], %206 {strides = array<i32>} : memref<32x128xbf16, #tpu.memory_space<vmem>>, vector<4x128xbf16>,
    %208 = vector.broadcast %149 : vector<1x128xf32> to vector<4x128xf32>
    %209 = arith.mulf %97, %208 : vector<4x128xf32>
    %210 = vector.broadcast %152 : vector<1x128xf32> to vector<4x128xf32>
    %211 = arith.addf %209, %210 : vector<4x128xf32>
    %cst_174 = arith.constant 0.000000e+00 : f32
    %212 = vector.broadcast %cst_174 : f32 to vector<4x128xf32>
    %213 = arith.cmpf ogt, %211, %212 : vector<4x128xf32>
    %cst_175 = arith.constant 2.000000e-01 : f32
    %214 = vector.broadcast %cst_175 : f32 to vector<4x128xf32>
    %215 = arith.mulf %214, %211 : vector<4x128xf32>
    %216 = arith.select %213, %211, %215 : vector<4x128xi1>, vector<4x128xf32>
    %217 = arith.truncf %216 : vector<4x128xf32> to vector<4x128xbf16>
    %c20 = arith.constant 20 : index
    %c0_176 = arith.constant 0 : index
    %218 = vector.load %arg4[%c20, %c0_176] : memref<32x128xbf16, #tpu.memory_space<vmem>>, vector<4x128xbf16>
    tpu.vector_store %arg4[%c20, %c0_176], %217 {strides = array<i32>} : memref<32x128xbf16, #tpu.memory_space<vmem>>, vector<4x128xbf16>,
    %219 = vector.broadcast %149 : vector<1x128xf32> to vector<4x128xf32>
    %220 = arith.mulf %114, %219 : vector<4x128xf32>
    %221 = vector.broadcast %152 : vector<1x128xf32> to vector<4x128xf32>
    %222 = arith.addf %220, %221 : vector<4x128xf32>
    %cst_177 = arith.constant 0.000000e+00 : f32
    %223 = vector.broadcast %cst_177 : f32 to vector<4x128xf32>
    %224 = arith.cmpf ogt, %222, %223 : vector<4x128xf32>
    %cst_178 = arith.constant 2.000000e-01 : f32
    %225 = vector.broadcast %cst_178 : f32 to vector<4x128xf32>
    %226 = arith.mulf %225, %222 : vector<4x128xf32>
    %227 = arith.select %224, %222, %226 : vector<4x128xi1>, vector<4x128xf32>
    %228 = arith.truncf %227 : vector<4x128xf32> to vector<4x128xbf16>
    %c24 = arith.constant 24 : index
    %c0_179 = arith.constant 0 : index
    %229 = vector.load %arg4[%c24, %c0_179] : memref<32x128xbf16, #tpu.memory_space<vmem>>, vector<4x128xbf16>
    tpu.vector_store %arg4[%c24, %c0_179], %228 {strides = array<i32>} : memref<32x128xbf16, #tpu.memory_space<vmem>>, vector<4x128xbf16>,
    %230 = vector.broadcast %149 : vector<1x128xf32> to vector<4x128xf32>
    %231 = arith.mulf %131, %230 : vector<4x128xf32>
    %232 = vector.broadcast %152 : vector<1x128xf32> to vector<4x128xf32>
    %233 = arith.addf %231, %232 : vector<4x128xf32>
    %cst_180 = arith.constant 0.000000e+00 : f32
    %234 = vector.broadcast %cst_180 : f32 to vector<4x128xf32>
    %235 = arith.cmpf ogt, %233, %234 : vector<4x128xf32>
    %cst_181 = arith.constant 2.000000e-01 : f32
    %236 = vector.broadcast %cst_181 : f32 to vector<4x128xf32>
    %237 = arith.mulf %236, %233 : vector<4x128xf32>
    %238 = arith.select %235, %233, %237 : vector<4x128xi1>, vector<4x128xf32>
    %239 = arith.truncf %238 : vector<4x128xf32> to vector<4x128xbf16>
    %c28 = arith.constant 28 : index
    %c0_182 = arith.constant 0 : index
    %240 = vector.load %arg4[%c28, %c0_182] : memref<32x128xbf16, #tpu.memory_space<vmem>>, vector<4x128xbf16>
    tpu.vector_store %arg4[%c28, %c0_182], %239 {strides = array<i32>} : memref<32x128xbf16, #tpu.memory_space<vmem>>, vector<4x128xbf16>,
    return
  }
}

module attributes {stable_mosaic.version = 11 : i64} {
  func.func @_final_matmul_kernel(%arg0: memref<2x256xbf16, #tpu.memory_space<vmem>>, %arg1: memref<256x128xbf16, #tpu.memory_space<vmem>>, %arg2: memref<2x128xf32, #tpu.memory_space<vmem>>) attributes {dimension_semantics = [], scalar_prefetch = 0 : i64, scratch_operands = 0 : i64, tpu.core_type = #tpu.core_type<tc>} {
    %c0 = arith.constant 0 : index
    %c0_0 = arith.constant 0 : index
    %0 = vector.load %arg0[%c0, %c0_0] : memref<2x256xbf16, #tpu.memory_space<vmem>>, vector<2x256xbf16>
    %c0_1 = arith.constant 0 : index
    %c0_2 = arith.constant 0 : index
    %1 = vector.load %arg1[%c0_1, %c0_2] : memref<256x128xbf16, #tpu.memory_space<vmem>>, vector<256x128xbf16>
    %cst = arith.constant dense<0.000000e+00> : vector<2x128xf32>
    %2 = tpu.matmul %0, %1, %cst {dimension_numbers = #tpu.dot_dimension_numbers<[1], [0], [0], [1], [0, 0, 1, 1], [], []>} : vector<2x256xbf16>, vector<256x128xbf16>, vector<2x128xf32> -> vector<2x128xf32>
    %c0_3 = arith.constant 0 : index
    %c0_4 = arith.constant 0 : index
    %3 = vector.load %arg2[%c0_3, %c0_4] : memref<2x128xf32, #tpu.memory_space<vmem>>, vector<2x128xf32>
    tpu.vector_store %arg2[%c0_3, %c0_4], %2 {strides = array<i32>} : memref<2x128xf32, #tpu.memory_space<vmem>>, vector<2x128xf32>,
    return
  }
}

</mosaic_0001>

<bundles_post_ra>
// kernel: _lambda_.4
= control target key start
LH: loop header
LB: loop body
LE: loop exit
PB: predicated region body
PF: predicated region fallthrough
CT: control target
= control target key end

     0   :  { %s761_s27 = smov 64   ;;  %s762_s6 = smov 32   ;;  %vm67_vm0 = vcmask 261120   ;;  %vm74_vm1 = vcmask 785408   ;;  %vm71_vm2 = vcmask 523264   ;;  %vm139_vm3 = vcmask 1043456   ;;  %s1091_s0 = inlined_call_operand.vmem [shape: bf16[2,5,5,32], index: 0, kind: input, shape index: {}]   ;;  %s1092_s1 = inlined_call_operand.vmem [shape: bf16[128,128], index: 1, kind: input, shape index: {}]   ;;  %s1093_s2 = inlined_call_operand.vmem [shape: f32[1,128], index: 2, kind: input, shape index: {}]   ;;  %s1094_s3 = inlined_call_operand.vmem [shape: f32[1,128], index: 3, kind: input, shape index: {}]   ;;  %s1095_s4 = inlined_call_operand.vmem [shape: bf16[32,128], index: 4, kind: output, shape index: {}]  }
   0x1   :  { %v793_v0 = vld [vmem:[%s1091_s0 + $0xc] sm:$0x3]  ;;  %v34_v1 = vld [vmem:[%s1091_s0] sm:$0x7]  ;;  %v730_v2 = vld [vmem:[%s1091_s0 + $0x8] sm:$0x7] }
   0x2   :  { %v223_v3 = vunpack.c.l.b16 %v793_v0  ;;  %v39_v4 = vunpack.c.l.b16 %v34_v1  ;;  %v168_v5 = vunpack.c.l.b16 %v730_v2  ;;  %v732_v6 = vld [vmem:[%s1091_s0 + $0xc] sm:$0x7]  ;;  %v808_v8 = vld [vmem:[%s1091_s0 + $0x4] sm:$0x3]  ;;  %v734_v20 = vld [vmem:[%s1091_s0 + $0x10] sm:$0x7] }
   0x3   :  { %v228_v7 = vunpack.c.l.b16 %v732_v6  ;;  %v696_v12 = vld [vmem:[%s1091_s0 + $0x4] sm:$0x7]  ;;  %v51_v14 = vunpack.c.l.b16 %v808_v8  ;;  %v288_v27 = vunpack.c.l.b16 %v734_v20  ;;  %v733_v28 = vld [vmem:[%s1091_s0 + $0x10] sm:$0x3]  ;;  %v740_v34 = vld [vmem:[%s1091_s0 + $0x1c] sm:$0x7] }
   0x4   :  { %v224_v9 = vpack.c.b16 %v223_v3, %v223_v3  ;;  %v40_v10 = vpack.c.b16 %v39_v4, %v39_v4  ;;  %v169_v11 = vpack.c.b16 %v168_v5, %v168_v5  ;;  %v56_v19 = vunpack.c.l.b16 %v696_v12  ;;  %v736_v40 = vld [vmem:[%s1091_s0 + $0x14] sm:$0x7]  ;;  %s763_s11 = smov 96   ;;  %v742_v47 = vld [vmem:[%s1091_s0 + $0x20] sm:$0x7]  ;;  %v858_v3 = vld [vmem:[%s1092_s1 + $0x38] sm:$0xff] }
   0x5   :  { %v229_v13 = vpack.c.b16 %v228_v7, %v228_v7  ;;  %v52_v24 = vpack.c.b16 %v51_v14, %v51_v14  ;;  %v283_v32 = vunpack.c.l.b16 %v733_v28  ;;  %v289_v33 = vpack.c.b16 %v288_v27, %v288_v27  ;;  %v839_v49 = vld [vmem:[%s1091_s0 + $0x8] sm:$0x3]  ;;  %v848_v60 = vld [vmem:[%s1091_s0 + $0x20] sm:$0x3]  ;;  %v738_v4 = vld [vmem:[%s1091_s0 + $0x18] sm:$0x7]  ;;  %247 = vmatpush.bf16.msra.mxu2 %v858_v3  ;;  %126 = vmatpush.bf16.msra.mxu0 %v858_v3 }
   0x6   :  { %225 = vrot.lane.b32.xlu0 %v224_v9, %s761_s27  ;;  %v42_v15 = vshrl.u32 %v40_v10, 16  ;;  %v44_v16 = vshll.u32 %v40_v10, 16  ;;  %v171_v17 = vshrl.u32 %v169_v11, 16  ;;  %v173_v18 = vshll.u32 %v169_v11, 16  ;;  %v869_v9 = vld [vmem:[%s1092_s1 + $0x30] sm:$0xff]  ;;  %307 = vmatpush.bf16.msra.mxu3 %v858_v3  ;;  %v748_v27 = vld [vmem:[%s1092_s1 + $0x18] sm:$0xff] }
   0x7   :  { %v233_v23 = vshll.u32 %v229_v13, 16  ;;  %53 = vrot.lane.b32.xlu2 %v52_v24, %s761_s27  ;;  %v231_v29 = vshrl.u32 %v229_v13, 16  ;;  %v57_v31 = vpack.c.b16 %v56_v19, %v56_v19  ;;  %v284_v37 = vpack.c.b16 %v283_v32, %v283_v32  ;;  %v744_v10 = vld [vmem:[%s1091_s0 + $0x24] sm:$0x7]  ;;  %v877_v11 = vld [vmem:[%s1091_s0 + $0x18] sm:$0x3]  ;;  %187 = vmatpush.bf16.msra.mxu1 %v858_v3 }
   0x8   :  { %v46_v21 = vrot.slane %v44_v16, 1  ;;  %v175_v22 = vrot.slane %v173_v18, 1  ;;  %v293_v38 = vshll.u32 %v289_v33, 16  ;;  %v421_v39 = vunpack.c.l.b16 %v740_v34  ;;  %v743_v18 = vld [vmem:[%s1091_s0 + $0x24] sm:$0x3] }
   0x9   :  { %v235_v30 = vrot.slane %v233_v23, 1  ;;  %v61_v36 = vshll.u32 %v57_v31, 16  ;;  %v59_v41 = vshrl.u32 %v57_v31, 16  ;;  %v291_v43 = vshrl.u32 %v289_v33, 16  ;;  %248 = vmatpush.bf16.msra.mxu2 %v869_v9  ;;  %127 = vmatpush.bf16.msra.mxu0 %v869_v9  ;;  %v902_v23 = vld [vmem:[%s1092_s1 + $0x20] sm:$0xff] }
   0xa   :  { %v47_v25 = vor.u32 %v46_v21, %v42_v15  ;;  %v176_v26 = vor.u32 %v175_v22, %v171_v17  ;;  %v295_v44 = vrot.slane %v293_v38, 1  ;;  %v422_v45 = vpack.c.b16 %v421_v39, %v421_v39  ;;  %v888_v17 = vld [vmem:[%s1092_s1 + $0x28] sm:$0xff]  ;;  %308 = vmatpush.bf16.msra.mxu3 %v869_v9  ;;  %v920_v33 = vld [vmem:[%s1091_s0 + $0x1c] sm:$0x3]  ;;  %v745_v39 = vld [vmem:[%s1092_s1] sm:$0xff] }
   0xb   :  { %v236_v35 = vor.u32 %v235_v30, %v231_v29  ;;  %v63_v42 = vrot.slane %v61_v36, 1  ;;  %v344_v46 = vunpack.c.l.b16 %v736_v40  ;;  %v481_v52 = vunpack.c.l.b16 %v742_v47  ;;  %188 = vmatpush.bf16.msra.mxu1 %v869_v9  ;;  %v746_v38 = vld [vmem:[%s1092_s1 + $0x8] sm:$0xff] }
   0xc   :  { %48 = vrot.lane.b32.xlu1 %v47_v25, %s762_s6  ;;  %v296_v50 = vor.u32 %v295_v44, %v291_v43  ;;  %v426_v51 = vshll.u32 %v422_v45, 16  ;;  %v163_v54 = vunpack.c.l.b16 %v839_v49  ;;  %v424_v55 = vshrl.u32 %v422_v45, 16 }
   0xd   :  { %v64_v48 = vor.u32 %v63_v42, %v59_v41  ;;  %v345_v53 = vpack.c.b16 %v344_v46, %v344_v46  ;;  %v482_v57 = vpack.c.b16 %v481_v52, %v481_v52  ;;  %v476_v2 = vunpack.c.l.b16 %v848_v60  ;;  %249 = vmatpush.bf16.msra.mxu2 %v888_v17  ;;  %128 = vmatpush.bf16.msra.mxu0 %v888_v17 }
   0xe   :  { %220 = vrot.lane.b32.xlu0 %v176_v26, %s762_s6  ;;  %v428_v56 = vrot.slane %v426_v51, 1  ;;  %v164_v59 = vpack.c.b16 %v163_v54, %v163_v54  ;;  %v361_v13 = vunpack.c.l.b16 %v738_v4  ;;  %v541_v15 = vunpack.c.l.b16 %v744_v10  ;;  %309 = vmatpush.bf16.msra.mxu3 %v888_v17  ;;  %v33_v51 = vld [vmem:[%s1091_s0] sm:$0x3] }
   0xf   :  { %280 = vrot.lane.b32.xlu2 %v236_v35, %s762_s6  ;;  %v349_v58 = vshll.u32 %v345_v53, 16  ;;  %v486_v62 = vshll.u32 %v482_v57, 16  ;;  %v347_v63 = vshrl.u32 %v345_v53, 16  ;;  %v484_v5 = vshrl.u32 %v482_v57, 16  ;;  %189 = vmatpush.bf16.msra.mxu1 %v888_v17 }
  0x10   :  { %v850_v61 = vor.u32 %v428_v56, %v424_v55  ;;  %v477_v12 = vpack.c.b16 %v476_v2, %v476_v2  ;;  %v356_v16 = vunpack.c.l.b16 %v877_v11  ;;  %v362_v19 = vpack.c.b16 %v361_v13, %v361_v13 }
  0x11   :  { %v351_v1 = vrot.slane %v349_v58, 1  ;;  %v488_v6 = vrot.slane %v486_v62, 1  ;;  %v536_v20 = vunpack.c.l.b16 %v743_v18  ;;  %v542_v21 = vpack.c.b16 %v541_v15, %v541_v15  ;;  %250 = vmatpush.bf16.msra.mxu2 %v902_v23  ;;  %129 = vmatpush.bf16.msra.mxu0 %v902_v23 }
  0x12   :  { %v357_v22 = vpack.c.b16 %v356_v16, %v356_v16  ;;  %v366_v24 = vshll.u32 %v362_v19, 16  ;;  %310 = vmatpush.bf16.msra.mxu3 %v902_v23  ;;  %v364_v28 = vshrl.u32 %v362_v19, 16 }
  0x13   :  { %v352_v7 = vor.u32 %v351_v1, %v347_v63  ;;  %v489_v14 = vor.u32 %v488_v6, %v484_v5  ;;  %v537_v25 = vpack.c.b16 %v536_v20, %v536_v20  ;;  %190 = vmatpush.bf16.msra.mxu1 %v902_v23  ;;  %v544_v30 = vshrl.u32 %v542_v21, 16 }
  0x14   :  { %237 = vrot.lane.b32.xlu1 %v236_v35, %s763_s11  ;;  %v368_v29 = vrot.slane %v366_v24, 1  ;;  %v416_v35 = vunpack.c.l.b16 %v920_v33 }
  0x15   :  { %251 = vmatpush.bf16.msra.mxu2 %v748_v27  ;;  %130 = vmatpush.bf16.msra.mxu0 %v748_v27 }
  0x16   :  { %285 = vrot.lane.b32.xlu0 %v284_v37, %s761_s27  ;;  %311 = vmatpush.bf16.msra.mxu3 %v748_v27  ;;  %v369_v32 = vor.u32 %v368_v29, %v364_v28  ;;  %v417_v36 = vpack.c.b16 %v416_v35, %v416_v35  ;;  %v747_v37 = vld [vmem:[%s1092_s1 + $0x10] sm:$0xff] }
  0x17   :  { %160 = vrot.lane.b32.xlu2 %v64_v48, %s762_s6  ;;  %191 = vmatpush.bf16.msra.mxu1 %v748_v27 }
  0x19   :  { %252 = vmatpush.bf16.msra.mxu2 %v747_v37  ;;  %131 = vmatpush.bf16.msra.mxu0 %v747_v37 }
  0x1a   :  { %312 = vmatpush.bf16.msra.mxu3 %v747_v37 }
  0x1b   :  { %192 = vmatpush.bf16.msra.mxu1 %v747_v37 }
  0x1c   :  { %65 = vrot.lane.b32.xlu1 %v64_v48, %s763_s11 }
  0x1d   :  { %253 = vmatpush.bf16.msra.mxu2 %v746_v38  ;;  %132 = vmatpush.bf16.msra.mxu0 %v746_v38 }
  0x1e   :  { %297 = vrot.lane.b32.xlu0 %v296_v50, %s763_s11  ;;  %313 = vmatpush.bf16.msra.mxu3 %v746_v38 }
  0x1f   :  { %177 = vrot.lane.b32.xlu2 %v176_v26, %s763_s11  ;;  %v546_v26 = vshll.u32 %v542_v21, 16  ;;  %193 = vmatpush.bf16.msra.mxu1 %v746_v38 }
  0x21   :  { %v548_v31 = vrot.slane %v546_v26, 1  ;;  %254 = vmatpush.bf16.msra.mxu2 %v745_v39  ;;  %133 = vmatpush.bf16.msra.mxu0 %v745_v39 }
  0x22   :  { %314 = vmatpush.bf16.msra.mxu3 %v745_v39 }
  0x23   :  { %v549_v34 = vor.u32 %v548_v31, %v544_v30  ;;  %194 = vmatpush.bf16.msra.mxu1 %v745_v39 }
  0x24   :  { %165 = vrot.lane.b32.xlu1 %v164_v59, %s761_s27 }
  0x25   :  { %500 = vmatpush.bf16.msrb.mxu2 %v858_v3  ;;  %380 = vmatpush.bf16.msrb.mxu0 %v858_v3 }
  0x26   :  { %473 = vrot.lane.b32.xlu0 %v850_v61, %s762_s6  ;;  %560 = vmatpush.bf16.msrb.mxu3 %v858_v3 }
  0x27   :  { %353 = vrot.lane.b32.xlu2 %v352_v7, %s762_s6  ;;  %440 = vmatpush.bf16.msrb.mxu1 %v858_v3 }
  0x29   :  { %501 = vmatpush.bf16.msrb.mxu2 %v869_v9  ;;  %381 = vmatpush.bf16.msrb.mxu0 %v869_v9 }
  0x2a   :  { %561 = vmatpush.bf16.msrb.mxu3 %v869_v9 }
  0x2b   :  { %441 = vmatpush.bf16.msrb.mxu1 %v869_v9 }
  0x2c   :  { %478 = vrot.lane.b32.xlu1 %v477_v12, %s761_s27  ;;  %v735_v12 = vld [vmem:[%s1091_s0 + $0x14] sm:$0x3] }
  0x2d   :  { %502 = vmatpush.bf16.msrb.mxu2 %v888_v17  ;;  %382 = vmatpush.bf16.msrb.mxu0 %v888_v17 }
  0x2e   :  { %490 = vrot.lane.b32.xlu0 %v489_v14, %s763_s11  ;;  %562 = vmatpush.bf16.msrb.mxu3 %v888_v17 }
  0x2f   :  { %358 = vrot.lane.b32.xlu2 %v357_v22, %s761_s27  ;;  %442 = vmatpush.bf16.msrb.mxu1 %v888_v17 }
  0x31   :  { %503 = vmatpush.bf16.msrb.mxu2 %v902_v23  ;;  %383 = vmatpush.bf16.msrb.mxu0 %v902_v23 }
  0x32   :  { %563 = vmatpush.bf16.msrb.mxu3 %v902_v23 }
  0x33   :  { %443 = vmatpush.bf16.msrb.mxu1 %v902_v23 }
  0x34   :  { %533 = vrot.lane.b32.xlu1 %v489_v14, %s762_s6 }
  0x35   :  { %504 = vmatpush.bf16.msrb.mxu2 %v748_v27  ;;  %384 = vmatpush.bf16.msrb.mxu0 %v748_v27 }
  0x36   :  { %538 = vrot.lane.b32.xlu0 %v537_v25, %s761_s27  ;;  %564 = vmatpush.bf16.msrb.mxu3 %v748_v27 }
  0x37   :  { %413 = vrot.lane.b32.xlu2 %v369_v32, %s762_s6  ;;  %444 = vmatpush.bf16.msrb.mxu1 %v748_v27 }
  0x39   :  { %505 = vmatpush.bf16.msrb.mxu2 %v747_v37  ;;  %385 = vmatpush.bf16.msrb.mxu0 %v747_v37 }
  0x3a   :  { %565 = vmatpush.bf16.msrb.mxu3 %v747_v37 }
  0x3b   :  { %445 = vmatpush.bf16.msrb.mxu1 %v747_v37 }
  0x3c   :  { %370 = vrot.lane.b32.xlu1 %v369_v32, %s763_s11 }
  0x3d   :  { %506 = vmatpush.bf16.msrb.mxu2 %v746_v38  ;;  %386 = vmatpush.bf16.msrb.mxu0 %v746_v38 }
  0x3e   :  { %550 = vrot.lane.b32.xlu0 %v549_v34, %s763_s11  ;;  %566 = vmatpush.bf16.msrb.mxu3 %v746_v38 }
  0x3f   :  { %430 = vrot.lane.b32.xlu2 %v850_v61, %s763_s11  ;;  %446 = vmatpush.bf16.msrb.mxu1 %v746_v38 }
  0x41   :  { %507 = vmatpush.bf16.msrb.mxu2 %v745_v39  ;;  %387 = vmatpush.bf16.msrb.mxu0 %v745_v39 }
  0x42   :  { %567 = vmatpush.bf16.msrb.mxu3 %v745_v39 }
  0x43   :  { %447 = vmatpush.bf16.msrb.mxu1 %v745_v39 }
  0x44   :  { %418 = vrot.lane.b32.xlu1 %v417_v36, %s761_s27 }
  0x61   :  { %v54_v40 = vpop.permute.xlu2 %53 }
  0x69   :  { %v281_v42 = vpop.permute.xlu2 %280 }
  0x6a   :  { %v301_v54 = vsel %vm67_vm0, %v793_v0, %v281_v42 }
  0x71   :  { %v161_v46 = vpop.permute.xlu2 %160 }
  0x72   :  { %v181_v62 = vsel %vm67_vm0, %v808_v8, %v161_v46 }
  0x78   :  { %v226_v41 = vpop.permute.xlu0 %225 }
  0x79   :  { %v178_v56 = vpop.permute.xlu2 %177 }
  0x7e   :  { %v49_v43 = vpop.permute.xlu1 %48 }
  0x7f   :  { %v70_v53 = vsel %vm67_vm0, %v33_v51, %v49_v43 }
  0x80   :  { %v221_v44 = vpop.permute.xlu0 %220  ;;  %v73_v55 = vsel %vm71_vm2, %v70_v53, %v54_v40 }
  0x81   :  { %v241_v45 = vsel %vm67_vm0, %v839_v49, %v221_v44  ;;  %v354_v3 = vpop.permute.xlu2 %353 }
  0x82   :  { %v243_v48 = vsel %vm71_vm2, %v241_v45, %v226_v41  ;;  %v374_v14 = vsel %vm67_vm0, %v735_v12, %v354_v3 }
  0x86   :  { %v238_v47 = vpop.permute.xlu1 %237 }
  0x87   :  { %v245_v50 = vsel %vm74_vm1, %v243_v48, %v238_v47 }
  0x88   :  { %v286_v52 = vpop.permute.xlu0 %285  ;;  %255 = vmatmul.bf16.vlgmr.msra.gmra.mxu2 %v245_v50 }
  0x89   :  { %v303_v58 = vsel %vm71_vm2, %v301_v54, %v286_v52  ;;  %v359_v10 = vpop.permute.xlu2 %358 }
  0x8a   :  { %v376_v17 = vsel %vm71_vm2, %v374_v14, %v359_v10 }
  0x8e   :  { %v66_v49 = vpop.permute.xlu1 %65 }
  0x8f   :  { %v76_v57 = vsel %vm74_vm1, %v73_v55, %v66_v49 }
  0x90   :  { %v298_v59 = vpop.permute.xlu0 %297  ;;  %134 = vmatmul.bf16.vlgmr.msra.gmra.mxu0 %v76_v57 }
  0x91   :  { %v305_v61 = vsel %vm74_vm1, %v303_v58, %v298_v59  ;;  %v414_v15 = vpop.permute.xlu2 %413 }
  0x92   :  { %315 = vmatmul.bf16.vlgmr.msra.gmra.mxu3 %v305_v61  ;;  %v434_v24 = vsel %vm67_vm0, %v877_v11, %v414_v15 }
  0x96   :  { %v166_v63 = vpop.permute.xlu1 %165 }
  0x97   :  { %v183_v1 = vsel %vm71_vm2, %v181_v62, %v166_v63 }
  0x98   :  { %v474_v0 = vpop.permute.xlu0 %473  ;;  %v185_v2 = vsel %vm74_vm1, %v183_v1, %v178_v56 }
  0x99   :  { %195 = vmatmul.bf16.vlgmr.msra.gmra.mxu1 %v185_v2  ;;  %v494_v4 = vsel %vm67_vm0, %v920_v33, %v474_v0  ;;  %v431_v23 = vpop.permute.xlu2 %430 }
  0x9e   :  { %v479_v5 = vpop.permute.xlu1 %478 }
  0x9f   :  { %v496_v6 = vsel %vm71_vm2, %v494_v4, %v479_v5 }
  0xa0   :  { %v491_v7 = vpop.permute.xlu0 %490 }
  0xa1   :  { %v498_v9 = vsel %vm74_vm1, %v496_v6, %v491_v7 }
  0xa2   :  { %508 = vmatmul.bf16.vlgmr.msrb.gmra.mxu2 %v498_v9 }
  0xa6   :  { %v534_v8 = vpop.permute.xlu1 %533 }
  0xa7   :  { %v554_v16 = vsel %vm67_vm0, %v848_v60, %v534_v8 }
  0xa8   :  { %v539_v13 = vpop.permute.xlu0 %538 }
  0xa9   :  { %v556_v20 = vsel %vm71_vm2, %v554_v16, %v539_v13  ;;  %v764_v16 = vmov 32.0  }
  0xaa   :  { %757 = vrcp.f32 %v764_v16 }
  0xae   :  { %v371_v18 = vpop.permute.xlu1 %370 }
  0xaf   :  { %v378_v19 = vsel %vm74_vm1, %v376_v17, %v371_v18 }
  0xb0   :  { %v551_v21 = vpop.permute.xlu0 %550  ;;  %388 = vmatmul.bf16.vlgmr.msrb.gmra.mxu0 %v378_v19 }
  0xb1   :  { %v558_v22 = vsel %vm74_vm1, %v556_v20, %v551_v21 }
  0xb2   :  { %568 = vmatmul.bf16.vlgmr.msrb.gmra.mxu3 %v558_v22 }
  0xb6   :  { %v419_v25 = vpop.permute.xlu1 %418 }
  0xb7   :  { %v436_v26 = vsel %vm71_vm2, %v434_v24, %v419_v25 }
  0xb8   :  { %v438_v60 = vsel %vm74_vm1, %v436_v26, %v431_v23 }
  0xb9   :  { %448 = vmatmul.bf16.vlgmr.msrb.gmra.mxu1 %v438_v60 }
 0x10b   :  { %v990_v27 = vpop.f32.mrf.mxu2 }
 0x10c   :  { %v260_v33 = vsel %vm139_vm3, %v990_v27, 0.0  ;;  %v268_v35 = vmul.f32 %v990_v27, %v990_v27 }
 0x10d   :  { %v992_v28 = vpop.f32.mrf.mxu0  ;;  %v261_v40 = vrot.slane %v260_v33, 4 }
 0x10e   :  { %v148_v11 = vmul.f32 %v992_v28, %v992_v28  ;;  %v140_v37 = vsel %vm139_vm3, %v992_v28, 0.0  ;;  %v269_v44 = vsel %vm139_vm3, %v268_v35, 0.0 }
 0x10f   :  { %v141_v45 = vrot.slane %v140_v37, 4  ;;  %v262_v48 = vadd.f32 %v261_v40, %v260_v33  ;;  %v270_v52 = vrot.slane %v269_v44, 4 }
 0x110   :  { %v149_v38 = vsel %vm139_vm3, %v148_v11, 0.0 }
 0x111   :  { %v150_v46 = vrot.slane %v149_v38, 4  ;;  %v142_v54 = vadd.f32 %v141_v45, %v140_v37  ;;  %v263_v58 = vrot.slane %v262_v48, 2  ;;  %v271_v61 = vadd.f32 %v270_v52, %v269_v44  ;;  %v1032_v37 = vpop.eup %757 }
 0x112   :  { %vm595_vm4 = vweird.f32 %v1032_v37 }
 0x113   :  { %v258_v29 = vpop.f32.mrf.mxu2  ;;  %v151_v49 = vadd.f32 %v150_v46, %v149_v38  ;;  %v143_v63 = vrot.slane %v142_v54, 2  ;;  %v264_v3 = vadd.f32 %v263_v58, %v262_v48  ;;  %v272_v5 = vrot.slane %v271_v61, 2 }
 0x115   :  { %v137_v30 = vpop.f32.mrf.mxu0  ;;  %v994_v31 = vpop.f32.mrf.mxu3  ;;  %v152_v1 = vrot.slane %v151_v49, 2  ;;  %v144_v7 = vadd.f32 %v143_v63, %v142_v54  ;;  %v265_v17 = vrot.slane %v264_v3, 1  ;;  %v273_v21 = vadd.f32 %v272_v5, %v271_v61 }
 0x116   :  { %v996_v32 = vpop.f32.mrf.mxu1  ;;  %v328_v47 = vmul.f32 %v994_v31, %v994_v31  ;;  %v320_v50 = vsel %vm139_vm3, %v994_v31, 0.0 }
 0x117   :  { %v208_v34 = vmul.f32 %v996_v32, %v996_v32  ;;  %v200_v36 = vsel %vm139_vm3, %v996_v32, 0.0  ;;  %v321_v55 = vrot.slane %v320_v50, 4  ;;  %v153_v9 = vadd.f32 %v152_v1, %v151_v49 }
 0x118   :  { %v201_v42 = vrot.slane %v200_v36, 4  ;;  %v329_v56 = vsel %vm139_vm3, %v328_v47, 0.0  ;;  %v145_v25 = vrot.slane %v144_v7, 1  ;;  %v266_v35 = vadd.f32 %v265_v17, %v264_v3 }
 0x119   :  { %v209_v43 = vsel %vm139_vm3, %v208_v34, 0.0  ;;  %v330_v0 = vrot.slane %v329_v56, 4  ;;  %v322_v2 = vadd.f32 %v321_v55, %v320_v50  ;;  %v154_v26 = vrot.slane %v153_v9, 1 }
 0x11a   :  { %v210_v51 = vrot.slane %v209_v43, 4  ;;  %v202_v53 = vadd.f32 %v201_v42, %v200_v36  ;;  %v274_v42 = vrot.slane %v273_v21, 1 }
 0x11b   :  { %v331_v10 = vadd.f32 %v330_v0, %v329_v56  ;;  %v323_v12 = vrot.slane %v322_v2, 2  ;;  %v155_v44 = vadd.f32 %v154_v26, %v153_v9  ;;  %v591_v56 = vmul.f32 32.0, %v1032_v37 }
 0x11c   :  { %v211_v59 = vadd.f32 %v210_v51, %v209_v43  ;;  %v203_v62 = vrot.slane %v202_v53, 2  ;;  %v146_v43 = vadd.f32 %v145_v25, %v144_v7  ;;  %v275_v7 = vadd.f32 %v274_v42, %v273_v21 }
 0x11d   :  { %v318_v39 = vpop.f32.mrf.mxu3  ;;  %v332_v60 = vrot.slane %v331_v10, 2  ;;  %v324_v30 = vadd.f32 %v323_v12, %v322_v2 }
 0x11e   :  { %v198_v41 = vpop.f32.mrf.mxu1  ;;  %v212_v4 = vrot.slane %v211_v59, 2  ;;  %v204_v6 = vadd.f32 %v203_v62, %v202_v53 }
 0x11f   :  { %v325_v46 = vrot.slane %v324_v30, 1  ;;  %v333_v47 = vadd.f32 %v332_v60, %v331_v10 }
 0x120   :  { %v213_v18 = vadd.f32 %v212_v4, %v211_v59  ;;  %v205_v22 = vrot.slane %v204_v6, 1 }
 0x122   :  { %v214_v36 = vrot.slane %v213_v18, 1  ;;  %v206_v38 = vadd.f32 %v205_v22, %v204_v6  ;;  %v326_v22 = vadd.f32 %v325_v46, %v324_v30 }
 0x124   :  { %v215_v53 = vadd.f32 %v214_v36, %v213_v18  ;;  %v207_v58 = vadd.f32 %v206_v38, %v146_v43 }
 0x125   :  { %v1018_v57 = vpop.f32.mrf.mxu2 }
 0x126   :  { %v513_v8 = vsel %vm139_vm3, %v1018_v57, 0.0  ;;  %v521_v13 = vmul.f32 %v1018_v57, %v1018_v57  ;;  %v216_v12 = vadd.f32 %v215_v53, %v155_v44 }
 0x127   :  { %v514_v23 = vrot.slane %v513_v8, 4 }
 0x128   :  { %v522_v11 = vsel %vm139_vm3, %v521_v13, 0.0  ;;  %v267_v13 = vadd.f32 %v266_v35, %v207_v58 }
 0x129   :  { %v515_v39 = vadd.f32 %v514_v23, %v513_v8  ;;  %v523_v45 = vrot.slane %v522_v11, 4  ;;  %v592_v8 = vsub.f32 1.0, %v591_v56  ;;  %v334_v23 = vrot.slane %v333_v47, 1 }
 0x12a   :  { %v327_v36 = vadd.f32 %v326_v22, %v267_v13  ;;  %v614_v22 = vld [vmem:[%s1094_s3] sm:$0x1] }
 0x12b   :  { %v516_v59 = vrot.slane %v515_v39, 2  ;;  %v524_v63 = vadd.f32 %v523_v45, %v522_v11  ;;  %v593_v35 = vmul.f32 %v1032_v37, %v592_v8  ;;  %v335_v42 = vadd.f32 %v334_v23, %v333_v47 }
 0x12d   :  { %v1024_v14 = vpop.f32.mrf.mxu0  ;;  %v511_v15 = vpop.f32.mrf.mxu2  ;;  %v517_v17 = vadd.f32 %v516_v59, %v515_v39  ;;  %v525_v18 = vrot.slane %v524_v63, 2 }
 0x12e   :  { %v393_v19 = vsel %vm139_vm3, %v1024_v14, 0.0  ;;  %v401_v20 = vmul.f32 %v1024_v14, %v1024_v14 }
 0x12f   :  { %v394_v24 = vrot.slane %v393_v19, 4  ;;  %v518_v38 = vrot.slane %v517_v17, 1 }
 0x130   :  { %v402_v29 = vsel %vm139_vm3, %v401_v20, 0.0 }
 0x131   :  { %v395_v33 = vadd.f32 %v394_v24, %v393_v19  ;;  %v403_v34 = vrot.slane %v402_v29, 4  ;;  %v519_v53 = vadd.f32 %v518_v38, %v517_v17 }
 0x133   :  { %v396_v40 = vrot.slane %v395_v33, 2  ;;  %v404_v41 = vadd.f32 %v403_v34, %v402_v29  ;;  %v276_v34 = vadd.f32 %v275_v7, %v216_v12 }
 0x135   :  { %v397_v48 = vadd.f32 %v396_v40, %v395_v33  ;;  %v405_v50 = vrot.slane %v404_v41, 2  ;;  %v391_v51 = vpop.f32.mrf.mxu0  ;;  %v1034_v52 = vpop.f32.mrf.mxu3  ;;  %v526_v40 = vadd.f32 %v525_v18, %v524_v63 }
 0x136   :  { %v573_v54 = vsel %vm139_vm3, %v1034_v52, 0.0  ;;  %v581_v49 = vmul.f32 %v1034_v52, %v1034_v52  ;;  %v1040_v55 = vpop.f32.mrf.mxu1  ;;  %v594_v51 = vadd.f32 %v1032_v37, %v593_v35 }
 0x137   :  { %v574_v61 = vrot.slane %v573_v54, 4  ;;  %v453_v62 = vsel %vm139_vm3, %v1040_v55, 0.0  ;;  %v461_v2 = vmul.f32 %v1040_v55, %v1040_v55  ;;  %v398_v3 = vrot.slane %v397_v48, 1 }
 0x138   :  { %v582_v1 = vsel %vm139_vm3, %v581_v49, 0.0  ;;  %v454_v0 = vrot.slane %v453_v62, 4  ;;  %v406_v4 = vadd.f32 %v405_v50, %v404_v41  ;;  %v336_v50 = vadd.f32 %v335_v42, %v276_v34 }
 0x139   :  { %v575_v5 = vadd.f32 %v574_v61, %v573_v54  ;;  %v583_v6 = vrot.slane %v582_v1, 4  ;;  %v462_v10 = vsel %vm139_vm3, %v461_v2, 0.0  ;;  %v399_v24 = vadd.f32 %v398_v3, %v397_v48 }
 0x13a   :  { %v455_v9 = vadd.f32 %v454_v0, %v453_v62  ;;  %v463_v20 = vrot.slane %v462_v10, 4  ;;  %v407_v25 = vrot.slane %v406_v4, 1  ;;  %v527_v54 = vrot.slane %v526_v40, 1 }
 0x13b   :  { %v576_v15 = vrot.slane %v575_v5, 2  ;;  %v584_v16 = vadd.f32 %v583_v6, %v582_v1  ;;  %v400_v43 = vadd.f32 %v399_v24, %v327_v36  ;;  %v596_v63 = vsel %vm595_vm4, %v1032_v37, %v594_v51  ;;  %v601_v37 = vld [vmem:[%s1093_s2] sm:$0x1] }
 0x13c   :  { %v456_v19 = vrot.slane %v455_v9, 2  ;;  %v464_v11 = vadd.f32 %v463_v20, %v462_v10  ;;  %v408_v30 = vadd.f32 %v407_v25, %v406_v4  ;;  %v528_v1 = vadd.f32 %v527_v54, %v526_v40 }
 0x13d   :  { %v571_v26 = vpop.f32.mrf.mxu3  ;;  %v577_v60 = vadd.f32 %v576_v15, %v575_v5  ;;  %v585_v29 = vrot.slane %v584_v16, 2 }
 0x13e   :  { %v457_v21 = vadd.f32 %v456_v19, %v455_v9  ;;  %v451_v33 = vpop.f32.mrf.mxu1  ;;  %v465_v41 = vrot.slane %v464_v11, 2  ;;  %v409_v58 = vadd.f32 %v408_v30, %v336_v50 }
 0x13f   :  { %v578_v44 = vrot.slane %v577_v60, 1  ;;  %v586_v45 = vadd.f32 %v585_v29, %v584_v16 }
 0x140   :  { %v458_v39 = vrot.slane %v457_v21, 1  ;;  %v466_v48 = vadd.f32 %v465_v41, %v464_v11 }
 0x141   :  { %v579_v59 = vadd.f32 %v578_v44, %v577_v60  ;;  %v587_v61 = vrot.slane %v586_v45, 1 }
 0x142   :  { %v459_v46 = vadd.f32 %v458_v39, %v457_v21  ;;  %v467_v56 = vrot.slane %v466_v48, 1 }
 0x143   :  { %v588_v3 = vadd.f32 %v587_v61, %v586_v45 }
 0x144   :  { %v460_v49 = vadd.f32 %v459_v46, %v400_v43  ;;  %v468_v62 = vadd.f32 %v467_v56, %v466_v48 }
 0x146   :  { %v520_v47 = vadd.f32 %v519_v53, %v460_v49  ;;  %v469_v0 = vadd.f32 %v468_v62, %v409_v58 }
 0x148   :  { %v580_v2 = vadd.f32 %v579_v59, %v520_v47  ;;  %v529_v4 = vadd.f32 %v528_v1, %v469_v0 }
 0x14a   :  { %v597_v5 = vmul.f32 %v596_v63, %v580_v2  ;;  %v589_v6 = vadd.f32 %v588_v3, %v529_v4 }
 0x14c   :  { %v599_v7 = vmul.f32 %v597_v5, %v597_v5  ;;  %v598_v9 = vmul.f32 %v596_v63, %v589_v6 }
 0x14e   :  { %v600_v10 = vsub.f32 %v598_v9, %v599_v7 }
 0x150   :  { %v602_v8 = vadd.f32 1e-05, %v600_v10 }
 0x152   :  { %759 = vrsqrt.f32 %v602_v8  ;;  %vm609_vm6 = vweird.f32 %v602_v8 }
 0x158   :  { %v760_v12 = vpop.eup %759 }
 0x159   :  { %v604_v13 = vmul.f32 %v760_v12, %v602_v8  ;;  %vm610_vm5 = vweird.f32 %v760_v12 }
 0x15a   :  { %vm611_vm7 = vmor %vm609_vm6, %vm610_vm5 }
 0x15b   :  { %v605_v15 = vmul.f32 %v760_v12, %v604_v13 }
 0x15d   :  { %v606_v16 = vmul.f32 0.5, %v605_v15 }
 0x15f   :  { %v607_v17 = vsub.f32 1.5, %v606_v16 }
 0x161   :  { %v608_v18 = vmul.f32 %v760_v12, %v607_v17 }
 0x163   :  { %v612_v19 = vsel %vm611_vm7, %v760_v12, %v608_v18 }
 0x164   :  { %v613_v20 = vmul.f32 %v612_v19, %v601_v37 }
 0x166   :  { %v615_v23 = vmul.f32 %v613_v20, %v597_v5  ;;  %v618_v24 = vperm.slane %v613_v20, 0 }
 0x168   :  { %v616_v25 = vsub.f32 %v614_v22, %v615_v23  ;;  %v620_v26 = vmul.f32 %v618_v24, %v992_v28  ;;  %v630_v29 = vmul.f32 %v618_v24, %v996_v32  ;;  %v640_v21 = vmul.f32 %v618_v24, %v990_v27 }
 0x169   :  { %v647_v11 = vmul.f32 %v618_v24, %v994_v31  ;;  %v657_v33 = vmul.f32 %v618_v24, %v1024_v14  ;;  %v664_v34 = vmul.f32 %v618_v24, %v1040_v55  ;;  %v674_v36 = vmul.f32 %v618_v24, %v1018_v57 }
 0x16a   :  { %v622_v60 = vperm.slane %v616_v25, 0  ;;  %v681_v35 = vmul.f32 %v618_v24, %v1034_v52 }
 0x16c   :  { %v624_v38 = vadd.f32 %v622_v60, %v620_v26  ;;  %v631_v40 = vadd.f32 %v630_v29, %v622_v60  ;;  %v641_v39 = vadd.f32 %v640_v21, %v622_v60  ;;  %v648_v41 = vadd.f32 %v647_v11, %v622_v60 }
 0x16d   :  { %v658_v28 = vadd.f32 %v657_v33, %v622_v60  ;;  %v665_v42 = vadd.f32 %v664_v34, %v622_v60  ;;  %v675_v43 = vadd.f32 %v674_v36, %v622_v60  ;;  %v682_v32 = vadd.f32 %v681_v35, %v622_v60 }
 0x16e   :  { %vm625_vm8 = vcmp.gt.f32.partialorder %v624_v38, 0.0  ;;  %v626_v27 = vmul.f32 0.2, %v624_v38  ;;  %vm632_vm9 = vcmp.gt.f32.partialorder %v631_v40, 0.0  ;;  %v633_v31 = vmul.f32 0.2, %v631_v40 }
 0x16f   :  { %vm642_vm10 = vcmp.gt.f32.partialorder %v641_v39, 0.0  ;;  %v643_v14 = vmul.f32 0.2, %v641_v39  ;;  %vm649_vm11 = vcmp.gt.f32.partialorder %v648_v41, 0.0  ;;  %v650_v55 = vmul.f32 0.2, %v648_v41 }
 0x170   :  { %v627_v30 = vsel %vm625_vm8, %v624_v38, %v626_v27  ;;  %v634_v57 = vsel %vm632_vm9, %v631_v40, %v633_v31  ;;  %vm659_vm12 = vcmp.gt.f32.partialorder %v658_v28, 0.0  ;;  %v660_v52 = vmul.f32 0.2, %v658_v28 }
 0x171   :  { %v628_v44 = vpack.c.bf16 %v627_v30, %v627_v30  ;;  %v635_v45 = vpack.c.bf16 %v634_v57, %v634_v57  ;;  %v644_v46 = vsel %vm642_vm10, %v641_v39, %v643_v14  ;;  %v651_v48 = vsel %vm649_vm11, %v648_v41, %v650_v55 }
 0x172   :  { %v645_v50 = vpack.c.bf16 %v644_v46, %v644_v46  ;;  %v652_v51 = vpack.c.bf16 %v651_v48, %v651_v48  ;;  %v661_v53 = vsel %vm659_vm12, %v658_v28, %v660_v52  ;;  %vm666_vm13 = vcmp.gt.f32.partialorder %v665_v42, 0.0 }
 0x173   :  { %629 = vst [vmem:[%s1095_s4] sm:$0x3] %v628_v44  ;;  %v637_v54 = vrot.slane %v635_v45, 6  ;;  %v662_v49 = vpack.c.bf16 %v661_v53, %v661_v53  ;;  %v667_v56 = vmul.f32 0.2, %v665_v42  ;;  %vm676_vm14 = vcmp.gt.f32.partialorder %v675_v43, 0.0 }
 0x174   :  { %646 = vst [vmem:[%s1095_s4 + $0x4] sm:$0x3] %v645_v50  ;;  %v654_v58 = vrot.slane %v652_v51, 6  ;;  %v677_v59 = vmul.f32 0.2, %v675_v43  ;;  %vm683_vm15 = vcmp.gt.f32.partialorder %v682_v32, 0.0 }
 0x175   :  { %639 = vst [vmem:[%s1095_s4] sm:$0xc] %v637_v54  ;;  %v668_v61 = vsel %vm666_vm13, %v665_v42, %v667_v56  ;;  %v684_v62 = vmul.f32 0.2, %v682_v32 }
 0x176   :  { %656 = vst [vmem:[%s1095_s4 + $0x4] sm:$0xc] %v654_v58  ;;  %v669_v47 = vpack.c.bf16 %v668_v61, %v668_v61  ;;  %v678_v63 = vsel %vm676_vm14, %v675_v43, %v677_v59 }
 0x177   :  { %663 = vst [vmem:[%s1095_s4 + $0x8] sm:$0x3] %v662_v49  ;;  %v679_v1 = vpack.c.bf16 %v678_v63, %v678_v63  ;;  %v685_v0 = vsel %vm683_vm15, %v682_v32, %v684_v62 }
 0x178   :  { %v671_v2 = vrot.slane %v669_v47, 6  ;;  %v686_v3 = vpack.c.bf16 %v685_v0, %v685_v0 }
 0x179   :  { %680 = vst [vmem:[%s1095_s4 + $0xc] sm:$0x3] %v679_v1 }
 0x17a   :  { %673 = vst [vmem:[%s1095_s4 + $0x8] sm:$0xc] %v671_v2  ;;  %v688_v4 = vrot.slane %v686_v3, 6 }
 0x17c   :  { %690 = vst [vmem:[%s1095_s4 + $0xc] sm:$0xc] %v688_v4 }

// kernel: _lambda_.3
= control target key start
LH: loop header
LB: loop body
LE: loop exit
PB: predicated region body
PF: predicated region fallthrough
CT: control target
= control target key end

     0   :  { %s1260_s25 = smov 64   ;;  %s1261_s8 = smov 32   ;;  %vm63_vm0 = vcmask 261120   ;;  %vm67_vm1 = vcmask 523264   ;;  %vm70_vm2 = vcmask 785408   ;;  %s1863_s0 = inlined_call_operand.vmem [shape: bf16[2,9,9,32], index: 0, kind: input, shape index: {}]   ;;  %s1864_s1 = inlined_call_operand.vmem [shape: bf16[128,128], index: 1, kind: input, shape index: {}]   ;;  %s1865_s2 = inlined_call_operand.vmem [shape: bf16[128,128], index: 2, kind: output, shape index: {}]  }
   0x1   :  { %v1123_v0 = vld [vmem:[%s1863_s0 + $0x18] sm:$0xf]  ;;  %v1127_v1 = vld [vmem:[%s1863_s0 + $0x10] sm:$0xf]  ;;  %v1243_v2 = vld [vmem:[%s1863_s0 + $0x10] sm:$0x10] }
   0x2   :  { %v222_v3 = vunpack.c.l.b16 %v1123_v0  ;;  %v1128_v4 = vor.u32 %v1243_v2, %v1127_v1  ;;  %v1131_v5 = vld [vmem:[%s1863_s0 + $0x20] sm:$0xf]  ;;  %v1135_v6 = vld [vmem:[%s1863_s0 + $0x18] sm:$0xf]  ;;  %v1244_v7 = vld [vmem:[%s1863_s0 + $0x18] sm:$0x10] }
   0x3   :  { %v1136_v8 = vor.u32 %v1244_v7, %v1135_v6  ;;  %v1119_v9 = vld [vmem:[%s1863_s0 + $0x8] sm:$0xf]  ;;  %v1242_v10 = vld [vmem:[%s1863_s0 + $0x8] sm:$0x10]  ;;  %v284_v14 = vunpack.c.l.b16 %v1131_v5  ;;  %v1079_v18 = vld [vmem:[%s1863_s0] sm:$0xf] }
   0x4   :  { %v223_v11 = vpack.c.b16 %v222_v3, %v222_v3  ;;  %v213_v12 = vshrl.u32 %v1128_v4, 16  ;;  %v215_v13 = vshll.u32 %v1128_v4, 16  ;;  %v1120_v15 = vor.u32 %v1242_v10, %v1119_v9  ;;  %v1241_v19 = vld [vmem:[%s1863_s0] sm:$0x10]  ;;  %v1075_v20 = vld [vmem:[%s1863_s0 + $0x8] sm:$0xf] }
   0x5   :  { %v277_v17 = vshll.u32 %v1136_v8, 16  ;;  %v1076_v21 = vld [vmem:[%s1863_s0 + $0xc] sm:$0x1]  ;;  %v1124_v22 = vld [vmem:[%s1863_s0 + $0x1c] sm:$0x1]  ;;  %v285_v25 = vpack.c.b16 %v284_v14, %v284_v14  ;;  %v275_v26 = vshrl.u32 %v1136_v8, 16  ;;  %v1080_v28 = vor.u32 %v1241_v19, %v1079_v18 }
   0x6   :  { %224 = vrot.lane.b32.xlu1 %v223_v11, %s1260_s25  ;;  %v217_v16 = vrot.slane %v215_v13, 1  ;;  %v227_v24 = vunpack.c.l.b16 %v1124_v22  ;;  %v153_v27 = vshll.u32 %v1120_v15, 16  ;;  %v1319_v30 = vunpack.c.l.b16 %v1075_v20  ;;  %v1132_v33 = vld [vmem:[%s1863_s0 + $0x24] sm:$0x1]  ;;  %s1262_s11 = smov 96  }
   0x7   :  { %v279_v29 = vrot.slane %v277_v17, 1  ;;  %v52_v31 = vunpack.c.l.b16 %v1076_v21  ;;  %v151_v36 = vshrl.u32 %v1120_v15, 16  ;;  %v40_v37 = vshll.u32 %v1080_v28, 16  ;;  %v1167_v50 = vld [vmem:[%s1863_s0 + $0x38] sm:$0xf] }
   0x8   :  { %v218_v23 = vor.u32 %v217_v16, %v213_v12  ;;  %v228_v32 = vpack.c.b16 %v227_v24, %v222_v3  ;;  %v289_v38 = vunpack.c.l.b16 %v1132_v33  ;;  %v155_v40 = vrot.slane %v153_v27, 1  ;;  %v1248_v51 = vld [vmem:[%s1863_s0 + $0x38] sm:$0x10]  ;;  %v1116_v54 = vld [vmem:[%s1863_s0 + $0x14] sm:$0x1] }
   0x9   :  { %v280_v39 = vor.u32 %v279_v29, %v275_v26  ;;  %v53_v41 = vpack.c.b16 %v52_v31, %v1319_v30  ;;  %v38_v45 = vshrl.u32 %v1080_v28, 16  ;;  %v42_v46 = vrot.slane %v40_v37, 1  ;;  %v1115_v56 = vld [vmem:[%s1863_s0 + $0x10] sm:$0xf]  ;;  %v1247_v61 = vld [vmem:[%s1863_s0 + $0x30] sm:$0x10] }
   0xa   :  { %219 = vrot.lane.b32.xlu0 %v218_v23, %s1261_s8  ;;  %v230_v34 = vshrl.u32 %v228_v32, 16  ;;  %v232_v35 = vshll.u32 %v228_v32, 16  ;;  %v290_v43 = vpack.c.b16 %v289_v38, %v284_v14  ;;  %v156_v48 = vor.u32 %v155_v40, %v151_v36  ;;  %v1159_v60 = vld [vmem:[%s1863_s0 + $0x30] sm:$0xf]  ;;  %v1155_v0 = vld [vmem:[%s1863_s0 + $0x38] sm:$0xf] }
   0xb   :  { %v57_v49 = vshll.u32 %v53_v41, 16  ;;  %v43_v55 = vor.u32 %v42_v46, %v38_v45  ;;  %v1168_v57 = vor.u32 %v1248_v51, %v1167_v50  ;;  %v55_v58 = vshrl.u32 %v53_v41, 16  ;;  %v1156_v1 = vld [vmem:[%s1863_s0 + $0x3c] sm:$0x1]  ;;  %v1151_v18 = vld [vmem:[%s1863_s0 + $0x28] sm:$0xf] }
   0xc   :  { %v234_v42 = vrot.slane %v232_v35, 1  ;;  %v294_v47 = vshll.u32 %v290_v43, 16  ;;  %v292_v52 = vshrl.u32 %v290_v43, 16  ;;  %v165_v63 = vunpack.c.l.b16 %v1116_v54  ;;  %v1246_v21 = vld [vmem:[%s1863_s0 + $0x28] sm:$0x10] }
   0xd   :  { %v59_v59 = vrot.slane %v57_v49, 1  ;;  %v160_v2 = vunpack.c.l.b16 %v1115_v56  ;;  %v525_v3 = vshll.u32 %v1168_v57, 16  ;;  %v1160_v4 = vor.u32 %v1247_v61, %v1159_v60  ;;  %v1164_v24 = vld [vmem:[%s1863_s0 + $0x44] sm:$0x1]  ;;  %v1163_v26 = vld [vmem:[%s1863_s0 + $0x40] sm:$0xf] }
   0xe   :  { %286 = vrot.lane.b32.xlu1 %v285_v25, %s1260_s25  ;;  %v235_v44 = vor.u32 %v234_v42, %v230_v34  ;;  %v296_v53 = vrot.slane %v294_v47, 1  ;;  %v470_v6 = vunpack.c.l.b16 %v1155_v0  ;;  %v475_v7 = vunpack.c.l.b16 %v1156_v1  ;;  %v1143_v28 = vld [vmem:[%s1863_s0 + $0x20] sm:$0xf]  ;;  %v1245_v29 = vld [vmem:[%s1863_s0 + $0x20] sm:$0x10] }
   0xf   :  { %v60_v5 = vor.u32 %v59_v59, %v55_v58  ;;  %v166_v8 = vpack.c.b16 %v165_v63, %v160_v2  ;;  %v161_v9 = vpack.c.b16 %v160_v2, %v160_v2  ;;  %v523_v10 = vshrl.u32 %v1168_v57, 16  ;;  %v1139_v33 = vld [vmem:[%s1863_s0 + $0x28] sm:$0xf]  ;;  %v1140_v34 = vld [vmem:[%s1863_s0 + $0x2c] sm:$0x1] }
  0x10   :  { %236 = vrot.lane.b32.xlu2 %v235_v44, %s1262_s11  ;;  %v297_v62 = vor.u32 %v296_v53, %v292_v52  ;;  %v463_v11 = vshll.u32 %v1160_v4, 16  ;;  %v527_v12 = vrot.slane %v525_v3, 1  ;;  %v476_v13 = vpack.c.b16 %v475_v7, %v470_v6  ;;  %v1199_v54 = vld [vmem:[%s1863_s0 + $0x60] sm:$0xf]  ;;  %v1148_v58 = vld [vmem:[%s1863_s0 + $0x34] sm:$0x1] }
  0x11   :  { %v48_v14 = vpack.c.b16 %v1319_v30, %v1319_v30  ;;  %v170_v15 = vshll.u32 %v166_v8, 16  ;;  %v461_v16 = vshrl.u32 %v1160_v4, 16  ;;  %v168_v22 = vshrl.u32 %v166_v8, 16  ;;  %v1147_v60 = vld [vmem:[%s1863_s0 + $0x30] sm:$0xf] }
  0x12   :  { %281 = vrot.lane.b32.xlu0 %v280_v39, %s1261_s8  ;;  %v465_v17 = vrot.slane %v463_v11, 1  ;;  %v528_v19 = vor.u32 %v527_v12, %v523_v10  ;;  %v480_v20 = vshll.u32 %v476_v13, 16  ;;  %v1152_v27 = vor.u32 %v1246_v21, %v1151_v18  ;;  %v1187_v1 = vld [vmem:[%s1863_s0 + $0x60] sm:$0xf]  ;;  %v1188_v2 = vld [vmem:[%s1863_s0 + $0x64] sm:$0x1] }
  0x13   :  { %v172_v23 = vrot.slane %v170_v15, 1  ;;  %v478_v30 = vshrl.u32 %v476_v13, 16  ;;  %v537_v35 = vunpack.c.l.b16 %v1164_v24  ;;  %v532_v36 = vunpack.c.l.b16 %v1163_v26  ;;  %v1191_v4 = vld [vmem:[%s1863_s0 + $0x58] sm:$0xf] }
  0x14   :  { %v466_v25 = vor.u32 %v465_v17, %v461_v16  ;;  %v482_v31 = vrot.slane %v480_v20, 1  ;;  %v1144_v37 = vor.u32 %v1245_v29, %v1143_v28  ;;  %v1385_v38 = vunpack.c.l.b16 %v1139_v33  ;;  %v1429_v20 = vld [vmem:[%s1864_s1 + $0x38] sm:$0xff]  ;;  %v1183_v28 = vld [vmem:[%s1863_s0 + $0x50] sm:$0xf]  ;;  %v1250_v29 = vld [vmem:[%s1863_s0 + $0x50] sm:$0x10] }
  0x15   :  { %v173_v32 = vor.u32 %v172_v23, %v168_v22  ;;  %v351_v39 = vunpack.c.l.b16 %v1140_v34  ;;  %v401_v41 = vshll.u32 %v1152_v27, 16  ;;  %v538_v42 = vpack.c.b16 %v537_v35, %v532_v36  ;;  %246 = vmatpush.bf16.msra.mxu2 %v1429_v20  ;;  %308 = vmatpush.bf16.msra.mxu3 %v1429_v20  ;;  %v1195_v33 = vld [vmem:[%s1863_s0 + $0x68] sm:$0xf] }
  0x16   :  { %157 = vrot.lane.b32.xlu1 %v156_v48, %s1261_s8  ;;  %v483_v40 = vor.u32 %v482_v31, %v478_v30  ;;  %v533_v43 = vpack.c.b16 %v532_v36, %v532_v36  ;;  %v339_v44 = vshll.u32 %v1144_v37, 16  ;;  %v399_v46 = vshrl.u32 %v1152_v27, 16  ;;  %122 = vmatpush.bf16.msra.mxu0 %v1429_v20  ;;  %v1440_v27 = vld [vmem:[%s1864_s1 + $0x30] sm:$0xff]  ;;  %v1196_v30 = vld [vmem:[%s1863_s0 + $0x6c] sm:$0x1] }
  0x17   :  { %v352_v45 = vpack.c.b16 %v351_v39, %v1385_v38  ;;  %v403_v47 = vrot.slane %v401_v41, 1  ;;  %v471_v48 = vpack.c.b16 %v470_v6, %v470_v6  ;;  %v542_v49 = vshll.u32 %v538_v42, 16  ;;  %184 = vmatpush.bf16.msra.mxu1 %v1429_v20  ;;  %v1175_v36 = vld [vmem:[%s1863_s0 + $0x48] sm:$0xf]  ;;  %v1171_v41 = vld [vmem:[%s1863_s0 + $0x50] sm:$0xf] }
  0x18   :  { %298 = vrot.lane.b32.xlu2 %v297_v62, %s1262_s11  ;;  %v337_v50 = vshrl.u32 %v1144_v37, 16  ;;  %v341_v51 = vrot.slane %v339_v44, 1  ;;  %v540_v56 = vshrl.u32 %v538_v42, 16  ;;  %v413_v3 = vunpack.c.l.b16 %v1148_v58  ;;  %v1249_v37 = vld [vmem:[%s1863_s0 + $0x48] sm:$0x10]  ;;  %v1500_v58 = vld [vmem:[%s1864_s1 + $0x18] sm:$0xff] }
  0x19   :  { %v356_v52 = vshll.u32 %v352_v45, 16  ;;  %v404_v53 = vor.u32 %v403_v47, %v399_v46  ;;  %v544_v57 = vrot.slane %v542_v49, 1  ;;  %v354_v62 = vshrl.u32 %v352_v45, 16  ;;  %247 = vmatpush.bf16.msra.mxu2 %v1440_v27  ;;  %309 = vmatpush.bf16.msra.mxu3 %v1440_v27  ;;  %v1468_v39 = vld [vmem:[%s1864_s1 + $0x28] sm:$0xff]  ;;  %v1172_v42 = vld [vmem:[%s1863_s0 + $0x54] sm:$0x1] }
  0x1a   :  { %44 = vrot.lane.b32.xlu0 %v43_v55, %s1261_s8  ;;  %v1252_v55 = vld [vmem:[%s1863_s0 + $0x60] sm:$0x10]  ;;  %v342_v59 = vor.u32 %v341_v51, %v337_v50  ;;  %v408_v6 = vunpack.c.l.b16 %v1147_v60  ;;  %v1418_v8 = vunpack.c.l.b16 %v1187_v1  ;;  %v347_v18 = vpack.c.b16 %v1385_v38, %v1385_v38  ;;  %123 = vmatpush.bf16.msra.mxu0 %v1440_v27 }
  0x1b   :  { %v1200_v61 = vor.u32 %v1252_v55, %v1199_v54  ;;  %v358_v63 = vrot.slane %v356_v52, 1  ;;  %v545_v0 = vor.u32 %v544_v57, %v540_v56  ;;  %185 = vmatpush.bf16.msra.mxu1 %v1440_v27  ;;  %v1184_v35 = vor.u32 %v1250_v29, %v1183_v28  ;;  %v1487_v50 = vld [vmem:[%s1864_s1 + $0x20] sm:$0xff] }
  0x1c   :  { %v414_v12 = vpack.c.b16 %v413_v3, %v408_v6  ;;  %v409_v16 = vpack.c.b16 %v408_v6, %v408_v6  ;;  %v1176_v45 = vor.u32 %v1249_v37, %v1175_v36  ;;  %v1482_v47 = vunpack.c.l.b16 %v1171_v41  ;;  %v1517_v3 = vld [vmem:[%s1864_s1 + $0x10] sm:$0xff]  ;;  %v1179_v6 = vld [vmem:[%s1863_s0 + $0x58] sm:$0xf] }
  0x1d   :  { %v774_v7 = vshll.u32 %v1200_v61, 16  ;;  %v359_v10 = vor.u32 %v358_v63, %v354_v62  ;;  %v772_v13 = vshrl.u32 %v1200_v61, 16  ;;  %248 = vmatpush.bf16.msra.mxu2 %v1468_v39  ;;  %310 = vmatpush.bf16.msra.mxu3 %v1468_v39  ;;  %v650_v46 = vshll.u32 %v1184_v35, 16  ;;  %v1231_v61 = vld [vmem:[%s1863_s0 + $0x80] sm:$0xf] }
  0x1e   :  { %61 = vrot.lane.b32.xlu1 %v60_v5, %s1262_s11  ;;  %v1251_v5 = vld [vmem:[%s1863_s0 + $0x58] sm:$0x10]  ;;  %124 = vmatpush.bf16.msra.mxu0 %v1468_v39  ;;  %v648_v52 = vshrl.u32 %v1184_v35, 16  ;;  %v720_v56 = vpack.c.b16 %v1418_v8, %v1418_v8  ;;  %v1215_v41 = vld [vmem:[%s1863_s0 + $0x70] sm:$0xf] }
  0x1f   :  { %v1192_v11 = vor.u32 %v1251_v5, %v1191_v4  ;;  %186 = vmatpush.bf16.msra.mxu1 %v1468_v39  ;;  %v652_v54 = vrot.slane %v650_v46, 1  ;;  %v1180_v4 = vld [vmem:[%s1863_s0 + $0x5c] sm:$0x1]  ;;  %v1227_v46 = vld [vmem:[%s1863_s0 + $0x88] sm:$0xf] }
  0x20   :  { %49 = vrot.lane.b32.xlu2 %v48_v14, %s1260_s25  ;;  %v776_v14 = vrot.slane %v774_v7, 1 }
  0x21   :  { %v712_v17 = vshll.u32 %v1192_v11, 16  ;;  %v710_v23 = vshrl.u32 %v1192_v11, 16  ;;  %249 = vmatpush.bf16.msra.mxu2 %v1487_v50  ;;  %311 = vmatpush.bf16.msra.mxu3 %v1487_v50  ;;  %v653_v62 = vor.u32 %v652_v54, %v648_v52  ;;  %v1219_v11 = vld [vmem:[%s1863_s0 + $0x80] sm:$0xf]  ;;  %v1203_v54 = vld [vmem:[%s1863_s0 + $0x70] sm:$0xf] }
  0x22   :  { %162 = vrot.lane.b32.xlu0 %v161_v9, %s1260_s25  ;;  %v724_v9 = vunpack.c.l.b16 %v1188_v2  ;;  %v777_v21 = vor.u32 %v776_v14, %v772_v13  ;;  %125 = vmatpush.bf16.msra.mxu0 %v1487_v50  ;;  %v662_v13 = vunpack.c.l.b16 %v1180_v4  ;;  %v1223_v14 = vld [vmem:[%s1863_s0 + $0x78] sm:$0xf] }
  0x23   :  { %v714_v24 = vrot.slane %v712_v17, 1  ;;  %187 = vmatpush.bf16.msra.mxu1 %v1487_v50  ;;  %v657_v17 = vunpack.c.l.b16 %v1179_v6 }
  0x24   :  { %v725_v15 = vpack.c.b16 %v724_v9, %v1418_v8 }
  0x25   :  { %v715_v34 = vor.u32 %v714_v24, %v710_v23  ;;  %250 = vmatpush.bf16.msra.mxu2 %v1500_v58  ;;  %312 = vmatpush.bf16.msra.mxu3 %v1500_v58  ;;  %v663_v24 = vpack.c.b16 %v662_v13, %v657_v17 }
  0x26   :  { %529 = vrot.lane.b32.xlu1 %v528_v19, %s1261_s8  ;;  %v418_v19 = vshll.u32 %v414_v12, 16  ;;  %v729_v22 = vshll.u32 %v725_v15, 16  ;;  %v727_v31 = vshrl.u32 %v725_v15, 16  ;;  %126 = vmatpush.bf16.msra.mxu0 %v1500_v58  ;;  %v1255_v15 = vld [vmem:[%s1863_s0 + $0x78] sm:$0x10] }
  0x27   :  { %188 = vmatpush.bf16.msra.mxu1 %v1500_v58  ;;  %v1224_v23 = vor.u32 %v1255_v15, %v1223_v14  ;;  %v1212_v15 = vld [vmem:[%s1863_s0 + $0x7c] sm:$0x1] }
  0x28   :  { %174 = vrot.lane.b32.xlu2 %v173_v32, %s1262_s11  ;;  %v420_v26 = vrot.slane %v418_v19, 1  ;;  %v731_v32 = vrot.slane %v729_v22, 1  ;;  %v1547_v19 = vunpack.c.l.b16 %v1219_v11 }
  0x29   :  { %251 = vmatpush.bf16.msra.mxu2 %v1517_v3  ;;  %313 = vmatpush.bf16.msra.mxu3 %v1517_v3  ;;  %v958_v36 = vshrl.u32 %v1224_v23, 16 }
  0x2a   :  { %467 = vrot.lane.b32.xlu0 %v466_v25, %s1261_s8  ;;  %v416_v25 = vshrl.u32 %v414_v12, 16  ;;  %v732_v44 = vor.u32 %v731_v32, %v727_v31  ;;  %127 = vmatpush.bf16.msra.mxu0 %v1517_v3  ;;  %v1220_v12 = vld [vmem:[%s1863_s0 + $0x84] sm:$0x1]  ;;  %v960_v31 = vshll.u32 %v1224_v23, 16  ;;  %v596_v32 = vpack.c.b16 %v1482_v47, %v1482_v47 }
  0x2b   :  { %189 = vmatpush.bf16.msra.mxu1 %v1517_v3 }
  0x2c   :  { %v421_v38 = vor.u32 %v420_v26, %v416_v25  ;;  %v1556_v25 = vld [vmem:[%s1864_s1] sm:$0xff]  ;;  %v962_v37 = vrot.slane %v960_v31, 1 }
  0x2e   :  { %484 = vrot.lane.b32.xlu1 %v483_v40, %s1262_s11  ;;  %v786_v40 = vunpack.c.l.b16 %v1196_v30  ;;  %v658_v30 = vpack.c.b16 %v657_v17, %v657_v17 }
  0x30   :  { %472 = vrot.lane.b32.xlu2 %v471_v48, %s1260_s25  ;;  %v600_v48 = vunpack.c.l.b16 %v1172_v42  ;;  %v1254_v42 = vld [vmem:[%s1863_s0 + $0x70] sm:$0x10] }
  0x32   :  { %534 = vrot.lane.b32.xlu0 %v533_v43, %s1260_s25  ;;  %v781_v43 = vunpack.c.l.b16 %v1195_v33  ;;  %v601_v55 = vpack.c.b16 %v600_v48, %v1482_v47  ;;  %v667_v33 = vshll.u32 %v663_v24, 16  ;;  %v963_v47 = vor.u32 %v962_v37, %v958_v36 }
  0x33   :  { %v1216_v48 = vor.u32 %v1254_v42, %v1215_v41  ;;  %v1129_v42 = vld [vmem:[%s1863_s0 + $0x18] sm:$0xf] }
  0x34   :  { %v787_v49 = vpack.c.b16 %v786_v40, %v781_v43  ;;  %v782_v51 = vpack.c.b16 %v781_v43, %v781_v43  ;;  %v605_v63 = vshll.u32 %v601_v55, 16  ;;  %v603_v8 = vshrl.u32 %v601_v55, 16  ;;  %v1228_v43 = vld [vmem:[%s1863_s0 + $0x8c] sm:$0x1]  ;;  %v1204_v55 = vld [vmem:[%s1863_s0 + $0x74] sm:$0x1] }
  0x35   :  { %v669_v40 = vrot.slane %v667_v33, 1 }
  0x36   :  { %405 = vrot.lane.b32.xlu1 %v404_v53, %s1261_s8  ;;  %v588_v53 = vshll.u32 %v1176_v45, 16  ;;  %v791_v57 = vshll.u32 %v787_v49, 16  ;;  %v789_v1 = vshrl.u32 %v787_v49, 16  ;;  %v607_v9 = vrot.slane %v605_v63, 1  ;;  %v1207_v49 = vld [vmem:[%s1863_s0 + $0x68] sm:$0xf] }
  0x38   :  { %546 = vrot.lane.b32.xlu2 %v545_v0, %s1262_s11  ;;  %v590_v60 = vrot.slane %v588_v53, 1  ;;  %v1256_v0 = vld [vmem:[%s1863_s0 + $0x80] sm:$0x10]  ;;  %v793_v2 = vrot.slane %v791_v57, 1  ;;  %v608_v22 = vor.u32 %v607_v9, %v603_v8  ;;  %v1034_v53 = vunpack.c.l.b16 %v1228_v43 }
  0x39   :  { %v1232_v7 = vor.u32 %v1256_v0, %v1231_v61  ;;  %v1609_v61 = vunpack.c.l.b16 %v1203_v54 }
  0x3a   :  { %343 = vrot.lane.b32.xlu0 %v342_v59, %s1261_s8  ;;  %v586_v59 = vshrl.u32 %v1176_v45, 16 }
  0x3b   :  { %v1020_v26 = vshrl.u32 %v1232_v7, 16  ;;  %v844_v37 = vpack.c.b16 %v1609_v61, %v1609_v61 }
  0x3c   :  { %v591_v5 = vor.u32 %v590_v60, %v586_v59  ;;  %v898_v60 = vshll.u32 %v1216_v48, 16 }
  0x3e   :  { %360 = vrot.lane.b32.xlu1 %v359_v10, %s1262_s11  ;;  %v794_v10 = vor.u32 %v793_v2, %v789_v1  ;;  %v896_v2 = vshrl.u32 %v1216_v48, 16 }
  0x40   :  { %348 = vrot.lane.b32.xlu2 %v347_v18, %s1260_s25  ;;  %v1022_v18 = vshll.u32 %v1232_v7, 16  ;;  %v968_v7 = vpack.c.b16 %v1547_v19, %v1547_v19 }
  0x42   :  { %410 = vrot.lane.b32.xlu0 %v409_v16, %s1260_s25  ;;  %v1545_v16 = vld [vmem:[%s1864_s1 + $0x8] sm:$0xff]  ;;  %v1024_v28 = vrot.slane %v1022_v18, 1 }
  0x43   :  { %252 = vmatpush.bf16.msra.mxu2 %v1545_v16  ;;  %314 = vmatpush.bf16.msra.mxu3 %v1545_v16 }
  0x44   :  { %128 = vmatpush.bf16.msra.mxu0 %v1545_v16  ;;  %190 = vmatpush.bf16.msra.mxu1 %v1545_v16 }
  0x46   :  { %778 = vrot.lane.b32.xlu1 %v777_v21, %s1261_s8  ;;  %v972_v21 = vunpack.c.l.b16 %v1220_v12 }
  0x47   :  { %253 = vmatpush.bf16.msra.mxu2 %v1556_v25  ;;  %315 = vmatpush.bf16.msra.mxu3 %v1556_v25 }
  0x48   :  { %422 = vrot.lane.b32.xlu2 %v421_v38, %s1262_s11  ;;  %v973_v29 = vpack.c.b16 %v972_v21, %v1547_v19  ;;  %129 = vmatpush.bf16.msra.mxu0 %v1556_v25  ;;  %v665_v38 = vshrl.u32 %v663_v24, 16  ;;  %v1211_v19 = vld [vmem:[%s1863_s0 + $0x78] sm:$0xf]  ;;  %v910_v24 = vunpack.c.l.b16 %v1212_v15 }
  0x49   :  { %191 = vmatpush.bf16.msra.mxu1 %v1556_v25 }
  0x4a   :  { %716 = vrot.lane.b32.xlu0 %v715_v34, %s1261_s8  ;;  %v1025_v34 = vor.u32 %v1024_v28, %v1020_v26  ;;  %v977_v35 = vshll.u32 %v973_v29, 16  ;;  %v670_v52 = vor.u32 %v669_v40, %v665_v38  ;;  %v905_v28 = vunpack.c.l.b16 %v1211_v19 }
  0x4b   :  { %494 = vmatpush.bf16.msrb.mxu2 %v1429_v20  ;;  %556 = vmatpush.bf16.msrb.mxu3 %v1429_v20 }
  0x4c   :  { %370 = vmatpush.bf16.msrb.mxu0 %v1429_v20  ;;  %v979_v45 = vrot.slane %v977_v35, 1  ;;  %v911_v31 = vpack.c.b16 %v910_v24, %v905_v28  ;;  %v906_v36 = vpack.c.b16 %v905_v28, %v905_v28 }
  0x4d   :  { %432 = vmatpush.bf16.msrb.mxu1 %v1429_v20 }
  0x4e   :  { %733 = vrot.lane.b32.xlu1 %v732_v44, %s1262_s11  ;;  %v975_v44 = vshrl.u32 %v973_v29, 16  ;;  %v1121_v29 = vld [vmem:[%s1863_s0 + $0x10] sm:$0xf]  ;;  %v915_v38 = vshll.u32 %v911_v31, 16  ;;  %v913_v43 = vshrl.u32 %v911_v31, 16 }
  0x4f   :  { %495 = vmatpush.bf16.msrb.mxu2 %v1440_v27  ;;  %557 = vmatpush.bf16.msrb.mxu3 %v1440_v27 }
  0x50   :  { %721 = vrot.lane.b32.xlu2 %v720_v56, %s1260_s25  ;;  %371 = vmatpush.bf16.msrb.mxu0 %v1440_v27  ;;  %v1029_v56 = vunpack.c.l.b16 %v1227_v46  ;;  %v980_v57 = vor.u32 %v979_v45, %v975_v44  ;;  %v917_v44 = vrot.slane %v915_v38, 1 }
  0x51   :  { %433 = vmatpush.bf16.msrb.mxu1 %v1440_v27 }
  0x52   :  { %783 = vrot.lane.b32.xlu0 %v782_v51, %s1260_s25  ;;  %v1253_v51 = vld [vmem:[%s1863_s0 + $0x68] sm:$0x10]  ;;  %v1035_v63 = vpack.c.b16 %v1034_v53, %v1029_v56  ;;  %v1030_v1 = vpack.c.b16 %v1029_v56, %v1029_v56  ;;  %v27_v53 = vld [vmem:[%s1863_s0] sm:$0xf] }
  0x53   :  { %496 = vmatpush.bf16.msrb.mxu2 %v1468_v39  ;;  %558 = vmatpush.bf16.msrb.mxu3 %v1468_v39  ;;  %v1208_v59 = vor.u32 %v1253_v51, %v1207_v49  ;;  %v918_v49 = vor.u32 %v917_v44, %v913_v43 }
  0x54   :  { %372 = vmatpush.bf16.msrb.mxu0 %v1468_v39  ;;  %v1039_v8 = vshll.u32 %v1035_v63, 16  ;;  %v1037_v13 = vshrl.u32 %v1035_v63, 16 }
  0x55   :  { %434 = vmatpush.bf16.msrb.mxu1 %v1468_v39  ;;  %v836_v4 = vshll.u32 %v1208_v59, 16  ;;  %v834_v9 = vshrl.u32 %v1208_v59, 16 }
  0x56   :  { %654 = vrot.lane.b32.xlu1 %v653_v62, %s1261_s8  ;;  %v848_v62 = vunpack.c.l.b16 %v1204_v55  ;;  %v1041_v14 = vrot.slane %v1039_v8, 1 }
  0x57   :  { %497 = vmatpush.bf16.msrb.mxu2 %v1487_v50  ;;  %559 = vmatpush.bf16.msrb.mxu3 %v1487_v50 }
  0x58   :  { %795 = vrot.lane.b32.xlu2 %v794_v10, %s1262_s11  ;;  %373 = vmatpush.bf16.msrb.mxu0 %v1487_v50  ;;  %v849_v6 = vpack.c.b16 %v848_v62, %v1609_v61  ;;  %v838_v10 = vrot.slane %v836_v4, 1  ;;  %v1042_v23 = vor.u32 %v1041_v14, %v1037_v13 }
  0x59   :  { %435 = vmatpush.bf16.msrb.mxu1 %v1487_v50 }
  0x5a   :  { %592 = vrot.lane.b32.xlu0 %v591_v5, %s1261_s8  ;;  %v900_v5 = vrot.slane %v898_v60, 1  ;;  %v853_v12 = vshll.u32 %v849_v6, 16  ;;  %v839_v18 = vor.u32 %v838_v10, %v834_v9  ;;  %v851_v21 = vshrl.u32 %v849_v6, 16  ;;  %v1113_v60 = vld [vmem:[%s1863_s0 + $0x8] sm:$0xf] }
  0x5b   :  { %498 = vmatpush.bf16.msrb.mxu2 %v1500_v58  ;;  %560 = vmatpush.bf16.msrb.mxu3 %v1500_v58 }
  0x5c   :  { %374 = vmatpush.bf16.msrb.mxu0 %v1500_v58  ;;  %v901_v11 = vor.u32 %v900_v5, %v896_v2  ;;  %v1153_v5 = vld [vmem:[%s1863_s0 + $0x30] sm:$0xf] }
  0x5d   :  { %436 = vmatpush.bf16.msrb.mxu1 %v1500_v58 }
  0x5e   :  { %609 = vrot.lane.b32.xlu1 %v608_v22, %s1262_s11  ;;  %v855_v22 = vrot.slane %v853_v12, 1 }
  0x5f   :  { %499 = vmatpush.bf16.msrb.mxu2 %v1517_v3  ;;  %561 = vmatpush.bf16.msrb.mxu3 %v1517_v3 }
  0x60   :  { %597 = vrot.lane.b32.xlu2 %v596_v32, %s1260_s25  ;;  %375 = vmatpush.bf16.msrb.mxu0 %v1517_v3 }
  0x61   :  { %437 = vmatpush.bf16.msrb.mxu1 %v1517_v3 }
  0x62   :  { %659 = vrot.lane.b32.xlu0 %v658_v30, %s1260_s25  ;;  %v856_v30 = vor.u32 %v855_v22, %v851_v21  ;;  %v1137_v21 = vld [vmem:[%s1863_s0 + $0x20] sm:$0xf] }
  0x63   :  { %500 = vmatpush.bf16.msrb.mxu2 %v1545_v16  ;;  %562 = vmatpush.bf16.msrb.mxu3 %v1545_v16 }
  0x64   :  { %376 = vmatpush.bf16.msrb.mxu0 %v1545_v16 }
  0x65   :  { %438 = vmatpush.bf16.msrb.mxu1 %v1545_v16 }
  0x66   :  { %1026 = vrot.lane.b32.xlu1 %v1025_v34, %s1261_s8 }
  0x67   :  { %501 = vmatpush.bf16.msrb.mxu2 %v1556_v25  ;;  %563 = vmatpush.bf16.msrb.mxu3 %v1556_v25 }
  0x68   :  { %671 = vrot.lane.b32.xlu2 %v670_v52, %s1262_s11  ;;  %377 = vmatpush.bf16.msrb.mxu0 %v1556_v25 }
  0x69   :  { %439 = vmatpush.bf16.msrb.mxu1 %v1556_v25 }
  0x6a   :  { %964 = vrot.lane.b32.xlu0 %v963_v47, %s1261_s8  ;;  %v1613_v0 = vpop.permute.xlu2 %236 }
  0x6e   :  { %981 = vrot.lane.b32.xlu1 %v980_v57, %s1262_s11 }
  0x70   :  { %969 = vrot.lane.b32.xlu2 %v968_v7, %s1260_s25 }
  0x72   :  { %1031 = vrot.lane.b32.xlu0 %v1030_v1, %s1260_s25  ;;  %v299_v17 = vpop.permute.xlu2 %298 }
  0x76   :  { %902 = vrot.lane.b32.xlu1 %v901_v11, %s1261_s8  ;;  %v1161_v11 = vld [vmem:[%s1863_s0 + $0x38] sm:$0xf] }
  0x78   :  { %v225_v26 = vpop.permute.xlu1 %224  ;;  %1043 = vrot.lane.b32.xlu2 %v1042_v23, %s1262_s11 }
  0x7a   :  { %840 = vrot.lane.b32.xlu0 %v839_v18, %s1261_s8  ;;  %v50_v33 = vpop.permute.xlu2 %49 }
  0x7c   :  { %v220_v32 = vpop.permute.xlu0 %219 }
  0x7d   :  { %v240_v34 = vsel %vm63_vm0, %v1121_v29, %v220_v32  ;;  %v1145_v29 = vld [vmem:[%s1863_s0 + $0x28] sm:$0xf] }
  0x7e   :  { %857 = vrot.lane.b32.xlu1 %v856_v30, %s1262_s11  ;;  %v242_v35 = vsel %vm67_vm1, %v240_v34, %v225_v26 }
  0x7f   :  { %v244_v40 = vsel %vm70_vm2, %v242_v35, %v1613_v0 }
  0x80   :  { %v287_v41 = vpop.permute.xlu1 %286  ;;  %254 = vmatmul.bf16.vlgmr.msra.gmra.mxu2 %v244_v40  ;;  %845 = vrot.lane.b32.xlu2 %v844_v37, %s1260_s25  ;;  %v1185_v37 = vld [vmem:[%s1863_s0 + $0x58] sm:$0xf] }
  0x81   :  { %743 = vmatpush.bf16.msra.mxu2 %v1429_v20 }
  0x82   :  { %907 = vrot.lane.b32.xlu0 %v906_v36, %s1260_s25  ;;  %v175_v46 = vpop.permute.xlu2 %174 }
  0x84   :  { %v282_v45 = vpop.permute.xlu0 %281 }
  0x85   :  { %v302_v47 = vsel %vm63_vm0, %v1129_v42, %v282_v45  ;;  %744 = vmatpush.bf16.msra.mxu2 %v1440_v27  ;;  %v1193_v42 = vld [vmem:[%s1863_s0 + $0x60] sm:$0xf] }
  0x86   :  { %v304_v48 = vsel %vm67_vm1, %v302_v47, %v287_v41 }
  0x87   :  { %v306_v51 = vsel %vm70_vm2, %v304_v48, %v299_v17  ;;  %v1169_v48 = vld [vmem:[%s1863_s0 + $0x48] sm:$0xf] }
  0x88   :  { %316 = vmatmul.bf16.vlgmr.msra.gmra.mxu3 %v306_v51  ;;  %v158_v52 = vpop.permute.xlu1 %157  ;;  %919 = vrot.lane.b32.xlu2 %v918_v49, %s1262_s11 }
  0x89   :  { %805 = vmatpush.bf16.msra.mxu3 %v1429_v20  ;;  %745 = vmatpush.bf16.msra.mxu2 %v1468_v39  ;;  %v178_v62 = vsel %vm63_vm0, %v1113_v60, %v158_v52 }
  0x8a   :  { %v473_v55 = vpop.permute.xlu2 %472 }
  0x8c   :  { %v45_v54 = vpop.permute.xlu0 %44 }
  0x8d   :  { %v66_v56 = vsel %vm63_vm0, %v27_v53, %v45_v54  ;;  %806 = vmatpush.bf16.msra.mxu3 %v1440_v27  ;;  %746 = vmatpush.bf16.msra.mxu2 %v1487_v50 }
  0x8e   :  { %v69_v57 = vsel %vm67_vm1, %v66_v56, %v50_v33 }
  0x90   :  { %v62_v59 = vpop.permute.xlu1 %61 }
  0x91   :  { %v72_v61 = vsel %vm70_vm2, %v69_v57, %v62_v59  ;;  %807 = vmatpush.bf16.msra.mxu3 %v1468_v39  ;;  %747 = vmatpush.bf16.msra.mxu2 %v1500_v58 }
  0x92   :  { %130 = vmatmul.bf16.vlgmr.msra.gmra.mxu0 %v72_v61  ;;  %v547_v0 = vpop.permute.xlu2 %546 }
  0x93   :  { %619 = vmatpush.bf16.msra.mxu0 %v1429_v20 }
  0x94   :  { %v163_v63 = vpop.permute.xlu0 %162 }
  0x95   :  { %v180_v1 = vsel %vm67_vm1, %v178_v62, %v163_v63  ;;  %808 = vmatpush.bf16.msra.mxu3 %v1487_v50  ;;  %748 = vmatpush.bf16.msra.mxu2 %v1517_v3 }
  0x96   :  { %v182_v2 = vsel %vm70_vm2, %v180_v1, %v175_v46 }
  0x97   :  { %192 = vmatmul.bf16.vlgmr.msra.gmra.mxu1 %v182_v2  ;;  %620 = vmatpush.bf16.msra.mxu0 %v1440_v27 }
  0x98   :  { %v530_v4 = vpop.permute.xlu1 %529  ;;  %681 = vmatpush.bf16.msra.mxu1 %v1429_v20 }
  0x99   :  { %809 = vmatpush.bf16.msra.mxu3 %v1500_v58  ;;  %749 = vmatpush.bf16.msra.mxu2 %v1545_v16  ;;  %v550_v13 = vsel %vm63_vm0, %v1161_v11, %v530_v4 }
  0x9a   :  { %v349_v7 = vpop.permute.xlu2 %348 }
  0x9b   :  { %621 = vmatpush.bf16.msra.mxu0 %v1468_v39 }
  0x9c   :  { %v468_v6 = vpop.permute.xlu0 %467  ;;  %682 = vmatpush.bf16.msra.mxu1 %v1440_v27 }
  0x9d   :  { %v488_v8 = vsel %vm63_vm0, %v1153_v5, %v468_v6  ;;  %810 = vmatpush.bf16.msra.mxu3 %v1517_v3  ;;  %750 = vmatpush.bf16.msra.mxu2 %v1556_v25 }
  0x9e   :  { %v490_v9 = vsel %vm67_vm1, %v488_v8, %v473_v55 }
  0x9f   :  { %622 = vmatpush.bf16.msra.mxu0 %v1487_v50 }
  0xa0   :  { %v485_v10 = vpop.permute.xlu1 %484  ;;  %683 = vmatpush.bf16.msra.mxu1 %v1468_v39 }
  0xa1   :  { %v492_v12 = vsel %vm70_vm2, %v490_v9, %v485_v10  ;;  %811 = vmatpush.bf16.msra.mxu3 %v1545_v16  ;;  %v1201_v10 = vld [vmem:[%s1863_s0 + $0x68] sm:$0xf] }
  0xa2   :  { %502 = vmatmul.bf16.vlgmr.msrb.gmra.mxu2 %v492_v12  ;;  %v423_v15 = vpop.permute.xlu2 %422 }
  0xa3   :  { %623 = vmatpush.bf16.msra.mxu0 %v1500_v58  ;;  %991 = vmatpush.bf16.msrb.mxu2 %v1429_v20 }
  0xa4   :  { %v535_v14 = vpop.permute.xlu0 %534  ;;  %684 = vmatpush.bf16.msra.mxu1 %v1487_v50 }
  0xa5   :  { %v552_v17 = vsel %vm67_vm1, %v550_v13, %v535_v14  ;;  %812 = vmatpush.bf16.msra.mxu3 %v1556_v25 }
  0xa6   :  { %v554_v18 = vsel %vm70_vm2, %v552_v17, %v547_v0 }
  0xa7   :  { %564 = vmatmul.bf16.vlgmr.msrb.gmra.mxu3 %v554_v18  ;;  %624 = vmatpush.bf16.msra.mxu0 %v1517_v3 }
  0xa8   :  { %v406_v19 = vpop.permute.xlu1 %405  ;;  %992 = vmatpush.bf16.msrb.mxu2 %v1440_v27  ;;  %685 = vmatpush.bf16.msra.mxu1 %v1500_v58 }
  0xa9   :  { %1053 = vmatpush.bf16.msrb.mxu3 %v1429_v20  ;;  %v426_v31 = vsel %vm63_vm0, %v1145_v29, %v406_v19 }
  0xaa   :  { %v722_v24 = vpop.permute.xlu2 %721 }
  0xab   :  { %625 = vmatpush.bf16.msra.mxu0 %v1545_v16 }
  0xac   :  { %v344_v22 = vpop.permute.xlu0 %343  ;;  %993 = vmatpush.bf16.msrb.mxu2 %v1468_v39  ;;  %686 = vmatpush.bf16.msra.mxu1 %v1517_v3 }
  0xad   :  { %v364_v23 = vsel %vm63_vm0, %v1137_v21, %v344_v22  ;;  %1054 = vmatpush.bf16.msrb.mxu3 %v1440_v27 }
  0xae   :  { %v366_v26 = vsel %vm67_vm1, %v364_v23, %v349_v7 }
  0xaf   :  { %626 = vmatpush.bf16.msra.mxu0 %v1556_v25 }
  0xb0   :  { %v361_v28 = vpop.permute.xlu1 %360  ;;  %994 = vmatpush.bf16.msrb.mxu2 %v1487_v50  ;;  %687 = vmatpush.bf16.msra.mxu1 %v1545_v16 }
  0xb1   :  { %v368_v30 = vsel %vm70_vm2, %v366_v26, %v361_v28  ;;  %1055 = vmatpush.bf16.msrb.mxu3 %v1468_v39 }
  0xb2   :  { %378 = vmatmul.bf16.vlgmr.msrb.gmra.mxu0 %v368_v30  ;;  %v796_v35 = vpop.permute.xlu2 %795 }
  0xb3   :  { %867 = vmatpush.bf16.msrb.mxu0 %v1429_v20 }
  0xb4   :  { %v411_v32 = vpop.permute.xlu0 %410  ;;  %995 = vmatpush.bf16.msrb.mxu2 %v1500_v58  ;;  %688 = vmatpush.bf16.msra.mxu1 %v1556_v25 }
  0xb5   :  { %v428_v33 = vsel %vm67_vm1, %v426_v31, %v411_v32  ;;  %1056 = vmatpush.bf16.msrb.mxu3 %v1487_v50 }
  0xb6   :  { %v430_v34 = vsel %vm70_vm2, %v428_v33, %v423_v15  ;;  %v1209_v15 = vld [vmem:[%s1863_s0 + $0x70] sm:$0xf] }
  0xb7   :  { %440 = vmatmul.bf16.vlgmr.msrb.gmra.mxu1 %v430_v34  ;;  %868 = vmatpush.bf16.msrb.mxu0 %v1440_v27 }
  0xb8   :  { %v779_v36 = vpop.permute.xlu1 %778  ;;  %996 = vmatpush.bf16.msrb.mxu2 %v1517_v3  ;;  %929 = vmatpush.bf16.msrb.mxu1 %v1429_v20 }
  0xb9   :  { %1057 = vmatpush.bf16.msrb.mxu3 %v1500_v58  ;;  %v799_v44 = vsel %vm63_vm0, %v1193_v42, %v779_v36 }
  0xbb   :  { %869 = vmatpush.bf16.msrb.mxu0 %v1468_v39 }
  0xbc   :  { %v717_v38 = vpop.permute.xlu0 %716  ;;  %997 = vmatpush.bf16.msrb.mxu2 %v1545_v16  ;;  %930 = vmatpush.bf16.msrb.mxu1 %v1440_v27  ;;  %v598_v27 = vpop.permute.xlu2 %597 }
  0xbd   :  { %v737_v40 = vsel %vm63_vm0, %v1185_v37, %v717_v38  ;;  %1058 = vmatpush.bf16.msrb.mxu3 %v1517_v3 }
  0xbe   :  { %v739_v20 = vsel %vm67_vm1, %v737_v40, %v722_v24 }
  0xbf   :  { %870 = vmatpush.bf16.msrb.mxu0 %v1487_v50 }
  0xc0   :  { %v734_v41 = vpop.permute.xlu1 %733  ;;  %998 = vmatpush.bf16.msrb.mxu2 %v1556_v25  ;;  %931 = vmatpush.bf16.msrb.mxu1 %v1468_v39 }
  0xc1   :  { %v741_v43 = vsel %vm70_vm2, %v739_v20, %v734_v41  ;;  %1059 = vmatpush.bf16.msrb.mxu3 %v1545_v16 }
  0xc2   :  { %751 = vmatmul.bf16.vlgmr.msra.gmra.mxu2 %v741_v43 }
  0xc3   :  { %871 = vmatpush.bf16.msrb.mxu0 %v1500_v58 }
  0xc4   :  { %v784_v45 = vpop.permute.xlu0 %783  ;;  %932 = vmatpush.bf16.msrb.mxu1 %v1487_v50  ;;  %v672_v49 = vpop.permute.xlu2 %671 }
  0xc5   :  { %v801_v46 = vsel %vm67_vm1, %v799_v44, %v784_v45  ;;  %1060 = vmatpush.bf16.msrb.mxu3 %v1556_v25 }
  0xc6   :  { %v803_v39 = vsel %vm70_vm2, %v801_v46, %v796_v35 }
  0xc7   :  { %813 = vmatmul.bf16.vlgmr.msra.gmra.mxu3 %v803_v39  ;;  %872 = vmatpush.bf16.msrb.mxu0 %v1517_v3 }
  0xc8   :  { %v655_v47 = vpop.permute.xlu1 %654  ;;  %933 = vmatpush.bf16.msrb.mxu1 %v1500_v58  ;;  %v1177_v58 = vld [vmem:[%s1863_s0 + $0x50] sm:$0xf] }
  0xc9   :  { %v675_v55 = vsel %vm63_vm0, %v1177_v58, %v655_v47 }
  0xcb   :  { %873 = vmatpush.bf16.msrb.mxu0 %v1545_v16 }
  0xcc   :  { %v593_v50 = vpop.permute.xlu0 %592  ;;  %934 = vmatpush.bf16.msrb.mxu1 %v1517_v3  ;;  %v970_v57 = vpop.permute.xlu2 %969 }
  0xcd   :  { %v613_v51 = vsel %vm63_vm0, %v1169_v48, %v593_v50 }
  0xce   :  { %v615_v52 = vsel %vm67_vm1, %v613_v51, %v598_v27 }
  0xcf   :  { %874 = vmatpush.bf16.msrb.mxu0 %v1556_v25 }
  0xd0   :  { %v610_v53 = vpop.permute.xlu1 %609  ;;  %935 = vmatpush.bf16.msrb.mxu1 %v1545_v16  ;;  %v1217_v16 = vld [vmem:[%s1863_s0 + $0x78] sm:$0xf] }
  0xd1   :  { %v617_v54 = vsel %vm70_vm2, %v615_v52, %v610_v53 }
  0xd2   :  { %627 = vmatmul.bf16.vlgmr.msra.gmra.mxu0 %v617_v54 }
  0xd4   :  { %v660_v56 = vpop.permute.xlu0 %659  ;;  %936 = vmatpush.bf16.msrb.mxu1 %v1556_v25  ;;  %v1044_v63 = vpop.permute.xlu2 %1043  ;;  %v1225_v25 = vld [vmem:[%s1863_s0 + $0x80] sm:$0xf] }
  0xd5   :  { %v677_v3 = vsel %vm67_vm1, %v675_v55, %v660_v56 }
  0xd6   :  { %v679_v59 = vsel %vm70_vm2, %v677_v3, %v672_v49 }
  0xd7   :  { %689 = vmatmul.bf16.vlgmr.msra.gmra.mxu1 %v679_v59 }
  0xd8   :  { %v1027_v60 = vpop.permute.xlu1 %1026 }
  0xd9   :  { %v1047_v4 = vsel %vm63_vm0, %v1225_v25, %v1027_v60 }
  0xdc   :  { %v965_v61 = vpop.permute.xlu0 %964  ;;  %v846_v9 = vpop.permute.xlu2 %845 }
  0xdd   :  { %v985_v62 = vsel %vm63_vm0, %v1217_v16, %v965_v61 }
  0xde   :  { %v987_v0 = vsel %vm67_vm1, %v985_v62, %v970_v57 }
  0xe0   :  { %v982_v1 = vpop.permute.xlu1 %981 }
  0xe1   :  { %v989_v2 = vsel %vm70_vm2, %v987_v0, %v982_v1 }
  0xe2   :  { %999 = vmatmul.bf16.vlgmr.msrb.gmra.mxu2 %v989_v2 }
  0xe4   :  { %v1032_v5 = vpop.permute.xlu0 %1031  ;;  %v920_v18 = vpop.permute.xlu2 %919 }
  0xe5   :  { %v1049_v6 = vsel %vm67_vm1, %v1047_v4, %v1032_v5 }
  0xe6   :  { %v1051_v7 = vsel %vm70_vm2, %v1049_v6, %v1044_v63 }
  0xe7   :  { %1061 = vmatmul.bf16.vlgmr.msrb.gmra.mxu3 %v1051_v7 }
  0xe8   :  { %v903_v8 = vpop.permute.xlu1 %902 }
  0xe9   :  { %v923_v19 = vsel %vm63_vm0, %v1209_v15, %v903_v8 }
  0xec   :  { %v841_v11 = vpop.permute.xlu0 %840 }
  0xed   :  { %v861_v12 = vsel %vm63_vm0, %v1201_v10, %v841_v11 }
  0xee   :  { %v863_v13 = vsel %vm67_vm1, %v861_v12, %v846_v9 }
  0xf0   :  { %v858_v14 = vpop.permute.xlu1 %857 }
  0xf1   :  { %v865_v17 = vsel %vm70_vm2, %v863_v13, %v858_v14 }
  0xf2   :  { %875 = vmatmul.bf16.vlgmr.msrb.gmra.mxu0 %v865_v17 }
  0xf4   :  { %v908_v21 = vpop.permute.xlu0 %907 }
  0xf5   :  { %v925_v22 = vsel %vm67_vm1, %v923_v19, %v908_v21 }
  0xf6   :  { %v927_v23 = vsel %vm70_vm2, %v925_v22, %v920_v18 }
  0xf7   :  { %937 = vmatmul.bf16.vlgmr.msrb.gmra.mxu1 %v927_v23 }
 0x103   :  { %v255_v24 = vpop.f32.mrf.mxu2 }
 0x104   :  { %vm259_vm3 = vcmp.gt.f32.partialorder %v255_v24, 0.0  ;;  %v260_v26 = vmul.f32 0.2, %v255_v24 }
 0x106   :  { %v261_v28 = vsel %vm259_vm3, %v255_v24, %v260_v26 }
 0x107   :  { %v262_v29 = vpack.c.bf16 %v261_v28, %v261_v28 }
 0x109   :  { %263 = vst [vmem:[%s1865_s2 + $0x8] sm:$0xf] %v262_v29 }
 0x10b   :  { %v257_v30 = vpop.f32.mrf.mxu2  ;;  %v317_v31 = vpop.f32.mrf.mxu3 }
 0x10c   :  { %vm321_vm4 = vcmp.gt.f32.partialorder %v317_v31, 0.0  ;;  %v322_v32 = vmul.f32 0.2, %v317_v31 }
 0x10e   :  { %v323_v33 = vsel %vm321_vm4, %v317_v31, %v322_v32 }
 0x10f   :  { %v324_v34 = vpack.c.bf16 %v323_v33, %v323_v33  ;;  %v131_v35 = vpop.f32.mrf.mxu0 }
 0x110   :  { %vm135_vm5 = vcmp.gt.f32.partialorder %v131_v35, 0.0  ;;  %v136_v36 = vmul.f32 0.2, %v131_v35 }
 0x111   :  { %325 = vst [vmem:[%s1865_s2 + $0xc] sm:$0xf] %v324_v34 }
 0x112   :  { %v137_v37 = vsel %vm135_vm5, %v131_v35, %v136_v36 }
 0x113   :  { %v138_v38 = vpack.c.bf16 %v137_v37, %v137_v37  ;;  %v319_v40 = vpop.f32.mrf.mxu3 }
 0x114   :  { %v193_v20 = vpop.f32.mrf.mxu1 }
 0x115   :  { %139 = vst [vmem:[%s1865_s2] sm:$0xf] %v138_v38  ;;  %vm197_vm6 = vcmp.gt.f32.partialorder %v193_v20, 0.0  ;;  %v198_v41 = vmul.f32 0.2, %v193_v20 }
 0x117   :  { %v199_v42 = vsel %vm197_vm6, %v193_v20, %v198_v41  ;;  %v133_v43 = vpop.f32.mrf.mxu0 }
 0x118   :  { %v200_v27 = vpack.c.bf16 %v199_v42, %v199_v42 }
 0x11a   :  { %201 = vst [vmem:[%s1865_s2 + $0x4] sm:$0xf] %v200_v27 }
 0x11c   :  { %v195_v44 = vpop.f32.mrf.mxu1 }
 0x125   :  { %v503_v45 = vpop.f32.mrf.mxu2 }
 0x126   :  { %vm507_vm7 = vcmp.gt.f32.partialorder %v503_v45, 0.0  ;;  %v508_v46 = vmul.f32 0.2, %v503_v45 }
 0x128   :  { %v509_v39 = vsel %vm507_vm7, %v503_v45, %v508_v46 }
 0x129   :  { %v510_v47 = vpack.c.bf16 %v509_v39, %v509_v39 }
 0x12a   :  { %v565_v48 = vpop.f32.mrf.mxu3 }
 0x12b   :  { %511 = vst [vmem:[%s1865_s2 + $0x18] sm:$0xf] %v510_v47  ;;  %vm569_vm8 = vcmp.gt.f32.partialorder %v565_v48, 0.0  ;;  %v570_v49 = vmul.f32 0.2, %v565_v48 }
 0x12d   :  { %v571_v50 = vsel %vm569_vm8, %v565_v48, %v570_v49  ;;  %v505_v51 = vpop.f32.mrf.mxu2 }
 0x12e   :  { %v572_v52 = vpack.c.bf16 %v571_v50, %v571_v50 }
 0x12f   :  { %v379_v53 = vpop.f32.mrf.mxu0 }
 0x130   :  { %573 = vst [vmem:[%s1865_s2 + $0x1c] sm:$0xf] %v572_v52  ;;  %vm383_vm9 = vcmp.gt.f32.partialorder %v379_v53, 0.0  ;;  %v384_v58 = vmul.f32 0.2, %v379_v53 }
 0x132   :  { %v385_v54 = vsel %vm383_vm9, %v379_v53, %v384_v58  ;;  %v567_v55 = vpop.f32.mrf.mxu3 }
 0x133   :  { %v386_v56 = vpack.c.bf16 %v385_v54, %v385_v54 }
 0x134   :  { %v441_v3 = vpop.f32.mrf.mxu1 }
 0x135   :  { %387 = vst [vmem:[%s1865_s2 + $0x10] sm:$0xf] %v386_v56  ;;  %vm445_vm10 = vcmp.gt.f32.partialorder %v441_v3, 0.0  ;;  %v446_v57 = vmul.f32 0.2, %v441_v3 }
 0x137   :  { %v447_v59 = vsel %vm445_vm10, %v441_v3, %v446_v57  ;;  %v381_v60 = vpop.f32.mrf.mxu0 }
 0x138   :  { %v448_v16 = vpack.c.bf16 %v447_v59, %v447_v59 }
 0x13a   :  { %449 = vst [vmem:[%s1865_s2 + $0x14] sm:$0xf] %v448_v16 }
 0x13c   :  { %v443_v61 = vpop.f32.mrf.mxu1 }
 0x145   :  { %v752_v62 = vpop.f32.mrf.mxu2 }
 0x146   :  { %vm756_vm11 = vcmp.gt.f32.partialorder %v752_v62, 0.0  ;;  %v757_v63 = vmul.f32 0.2, %v752_v62 }
 0x148   :  { %v758_v0 = vsel %vm756_vm11, %v752_v62, %v757_v63 }
 0x149   :  { %v759_v1 = vpack.c.bf16 %v758_v0, %v758_v0 }
 0x14a   :  { %v814_v25 = vpop.f32.mrf.mxu3 }
 0x14b   :  { %760 = vst [vmem:[%s1865_s2 + $0x28] sm:$0xf] %v759_v1  ;;  %vm818_vm12 = vcmp.gt.f32.partialorder %v814_v25, 0.0  ;;  %v819_v2 = vmul.f32 0.2, %v814_v25 }
 0x14d   :  { %v820_v4 = vsel %vm818_vm12, %v814_v25, %v819_v2  ;;  %v754_v5 = vpop.f32.mrf.mxu2 }
 0x14e   :  { %v821_v6 = vpack.c.bf16 %v820_v4, %v820_v4 }
 0x14f   :  { %v628_v7 = vpop.f32.mrf.mxu0 }
 0x150   :  { %822 = vst [vmem:[%s1865_s2 + $0x2c] sm:$0xf] %v821_v6  ;;  %vm632_vm13 = vcmp.gt.f32.partialorder %v628_v7, 0.0  ;;  %v633_v8 = vmul.f32 0.2, %v628_v7 }
 0x152   :  { %v634_v9 = vsel %vm632_vm13, %v628_v7, %v633_v8  ;;  %v816_v10 = vpop.f32.mrf.mxu3 }
 0x153   :  { %v635_v11 = vpack.c.bf16 %v634_v9, %v634_v9 }
 0x154   :  { %v690_v12 = vpop.f32.mrf.mxu1 }
 0x155   :  { %636 = vst [vmem:[%s1865_s2 + $0x20] sm:$0xf] %v635_v11  ;;  %vm694_vm14 = vcmp.gt.f32.partialorder %v690_v12, 0.0  ;;  %v695_v13 = vmul.f32 0.2, %v690_v12 }
 0x157   :  { %v696_v14 = vsel %vm694_vm14, %v690_v12, %v695_v13  ;;  %v630_v15 = vpop.f32.mrf.mxu0 }
 0x158   :  { %v697_v17 = vpack.c.bf16 %v696_v14, %v696_v14 }
 0x15a   :  { %698 = vst [vmem:[%s1865_s2 + $0x24] sm:$0xf] %v697_v17 }
 0x15c   :  { %v692_v18 = vpop.f32.mrf.mxu1 }
 0x165   :  { %v1000_v19 = vpop.f32.mrf.mxu2 }
 0x166   :  { %vm1004_vm15 = vcmp.gt.f32.partialorder %v1000_v19, 0.0  ;;  %v1005_v21 = vmul.f32 0.2, %v1000_v19 }
 0x168   :  { %v1006_v22 = vsel %vm1004_vm15, %v1000_v19, %v1005_v21 }
 0x169   :  { %v1007_v23 = vpack.c.bf16 %v1006_v22, %v1006_v22 }
 0x16a   :  { %v1062_v24 = vpop.f32.mrf.mxu3 }
 0x16b   :  { %1008 = vst [vmem:[%s1865_s2 + $0x38] sm:$0xf] %v1007_v23  ;;  %vm1066_vm0 = vcmp.gt.f32.partialorder %v1062_v24, 0.0  ;;  %v1067_v26 = vmul.f32 0.2, %v1062_v24 }
 0x16d   :  { %v1068_v28 = vsel %vm1066_vm0, %v1062_v24, %v1067_v26  ;;  %v1002_v29 = vpop.f32.mrf.mxu2 }
 0x16e   :  { %v1069_v30 = vpack.c.bf16 %v1068_v28, %v1068_v28 }
 0x16f   :  { %v876_v31 = vpop.f32.mrf.mxu0 }
 0x170   :  { %1070 = vst [vmem:[%s1865_s2 + $0x3c] sm:$0xf] %v1069_v30  ;;  %vm880_vm1 = vcmp.gt.f32.partialorder %v876_v31, 0.0  ;;  %v881_v32 = vmul.f32 0.2, %v876_v31 }
 0x172   :  { %v882_v33 = vsel %vm880_vm1, %v876_v31, %v881_v32  ;;  %v1064_v34 = vpop.f32.mrf.mxu3 }
 0x173   :  { %v883_v35 = vpack.c.bf16 %v882_v33, %v882_v33 }
 0x174   :  { %v938_v36 = vpop.f32.mrf.mxu1 }
 0x175   :  { %884 = vst [vmem:[%s1865_s2 + $0x30] sm:$0xf] %v883_v35  ;;  %vm942_vm2 = vcmp.gt.f32.partialorder %v938_v36, 0.0  ;;  %v943_v37 = vmul.f32 0.2, %v938_v36 }
 0x177   :  { %v944_v38 = vsel %vm942_vm2, %v938_v36, %v943_v37  ;;  %v878_v40 = vpop.f32.mrf.mxu0 }
 0x178   :  { %v945_v20 = vpack.c.bf16 %v944_v38, %v944_v38 }
 0x17a   :  { %946 = vst [vmem:[%s1865_s2 + $0x34] sm:$0xf] %v945_v20 }
 0x17c   :  { %v940_v41 = vpop.f32.mrf.mxu1 }

// kernel: _lambda_.5
= control target key start
LH: loop header
LB: loop body
LE: loop exit
PB: predicated region body
PF: predicated region fallthrough
CT: control target
= control target key end

     0   :  { %s367_s0 = inlined_call_operand.vmem [shape: bf16[2,256], index: 0, kind: input, shape index: {}]   ;;  %s368_s1 = inlined_call_operand.vmem [shape: bf16[256,128], index: 1, kind: input, shape index: {}]   ;;  %s369_s2 = inlined_call_operand.hbm [shape: f32[2,128], index: 2, kind: output, shape index: {}]  }
   0x1   :  { %v261_v0 = vld [vmem:[%s368_s1 + $0x38] sm:$0xff]  ;;  %v260_v2 = vld [vmem:[%s368_s1 + $0x30] sm:$0xff]  ;;  %v12_v4 = vld [vmem:[%s367_s0] sm:$0x3] }
   0x2   :  { %v269_v1 = vld [vmem:[%s368_s1 + $0x78] sm:$0xff]  ;;  %147 = vmatpush.bf16.msra.mxu0 %v261_v0  ;;  %v268_v3 = vld [vmem:[%s368_s1 + $0x70] sm:$0xff] }
   0x3   :  { %160 = vmatpush.bf16.msra.mxu1 %v269_v1 }
   0x4   :  { %7 = vsyncpa [#allocation3], 0  ;;  %v259_v5 = vld [vmem:[%s368_s1 + $0x28] sm:$0xff]  ;;  %46 = vst [vmem:[#allocation1] ss:$9 sm:$0xff] %v12_v4  ;;  %v258_v7 = vld [vmem:[%s368_s1 + $0x20] sm:$0xff] }
   0x5   :  { %v267_v6 = vld [vmem:[%s368_s1 + $0x68] sm:$0xff]  ;;  %v266_v8 = vld [vmem:[%s368_s1 + $0x60] sm:$0xff]  ;;  %v257_v9 = vld [vmem:[%s368_s1 + $0x18] sm:$0xff]  ;;  %s297_s14 = smov [#allocation2]   ;;  %s181_s18 = sshll.u32 %s369_s2, 4  ;;  %s182_s18 = int_to_ptr.hbm [resolvable:$true] %s181_s18 }
   0x6   :  { %148 = vmatpush.bf16.msra.mxu0 %v260_v2  ;;  %v265_v10 = vld [vmem:[%s368_s1 + $0x58] sm:$0xff]  ;;  %v256_v11 = vld [vmem:[%s368_s1 + $0x10] sm:$0xff]  ;;  %v255_v13 = vld [vmem:[%s368_s1 + $0x8] sm:$0xff]  ;;  %s179_s15 = sshll.u32 %s297_s14, 4  ;;  %s180_s15 = int_to_ptr.vmem [resolvable:$true] %s179_s15 }
   0x7   :  { %161 = vmatpush.bf16.msra.mxu1 %v268_v3  ;;  %v264_v12 = vld [vmem:[%s368_s1 + $0x50] sm:$0xff]  ;;  %v263_v14 = vld [vmem:[%s368_s1 + $0x48] sm:$0xff]  ;;  %v254_v15 = vld [vmem:[%s368_s1] sm:$0xff] }
   0x8   :  { %v262_v16 = vld [vmem:[%s368_s1 + $0x40] sm:$0xff] }
   0xa   :  { %149 = vmatpush.bf16.msra.mxu0 %v259_v5 }
   0xb   :  { %162 = vmatpush.bf16.msra.mxu1 %v267_v6  ;;  %v47_v17 = vld [vmem:[#allocation1] sm:$0xff]  ;;  %v48_v18 = vld [vmem:[#allocation1 + $0x9] sm:$0xff] }
   0xe   :  { %150 = vmatpush.bf16.msra.mxu0 %v258_v7 }
   0xf   :  { %163 = vmatpush.bf16.msra.mxu1 %v266_v8 }
  0x12   :  { %151 = vmatpush.bf16.msra.mxu0 %v257_v9 }
  0x13   :  { %164 = vmatpush.bf16.msra.mxu1 %v265_v10 }
  0x16   :  { %152 = vmatpush.bf16.msra.mxu0 %v256_v11 }
  0x17   :  { %165 = vmatpush.bf16.msra.mxu1 %v264_v12 }
  0x1a   :  { %153 = vmatpush.bf16.msra.mxu0 %v255_v13 }
  0x1b   :  { %166 = vmatpush.bf16.msra.mxu1 %v263_v14 }
  0x1e   :  { %154 = vmatpush.bf16.msra.mxu0 %v254_v15 }
  0x1f   :  { %167 = vmatpush.bf16.msra.mxu1 %v262_v16 }
  0x21   :  { %155 = vmatmul.bf16.vlgmr.msra.gmra.mxu0 %v47_v17 }
  0x22   :  { %168 = vmatmul.bf16.vlgmr.msra.gmra.mxu1 %v48_v18 }
  0x9e   :  { %v156_v19 = vpop.f32.mrf.mxu0 }
  0x9f   :  { %v169_v20 = vpop.f32.mrf.mxu1 }
  0xa0   :  { %v170_v21 = vadd.f32 %v169_v20, %v156_v19 }
  0xa2   :  { %173 = vst [vmem:[#allocation2] sm:$0x3] %v170_v21 }
  0xa3   :  { %184 = dma.vmem_to_hbm [thread:$0]  %s180_s15, 32, %s182_s18, [#allocation3]  }
  0xa6   :  { %v158_v22 = vpop.f32.mrf.mxu0 }
  0xa7   :  { %v171_v23 = vpop.f32.mrf.mxu1 }
  0xa8   :  { %295 = dma.done.wait [#allocation3], 32  }
  0xa9   :  { %296 = vsyncadd [#allocation3], 4294967264 }
  0xaa   :  { %189 = vsyncpa [#allocation3], 1 }

</bundles_post_ra>
